<compile_context>
chip_gen: v5e
topology: v5e:2x2
jax: 0.10.0
libtpu: 0.0.40
codegen_flags: <defaults>
</compile_context>

<pallas_src>
import jax
import jax.numpy as jnp
from jax import lax
from jax.experimental import pallas as pl
from jax.experimental.pallas import tpu as pltpu


# ----------------------------------------------------------------------------
# Fully fused Encoder kernel
# ----------------------------------------------------------------------------
def _encoder_fused_kernel(
    # inputs -----------------------------------------------------------------
    emb_ref,    # (T, B, E)   embedded tokens (dropout = identity in eval mode)
    wih_ref,    # (2, E, 3H)  input-projection weights  [dir][E, r|z|n]
    bih_ref,    # (2, 1, 3H)  input-projection biases
    whh_ref,    # (2, H, 3H)  hidden-projection weights [dir][H, r|z|n]
    bhh_ref,    # (2, 1, 3H)  hidden-projection biases
    fcw_ref,    # (2H, D)     fc weight, rows [0:H]=fwd-final, [H:2H]=bwd-final
    fcb_ref,    # (1, D)      fc bias
    # outputs ----------------------------------------------------------------
    out_ref,    # (T, B, 2H)  encoder_output (fwd || bwd)
    hid_ref,    # (B, D)      encoder_hidden
    # scratch ----------------------------------------------------------------
    gif_sc,     # (T, B, 3H)  precomputed x@Wih+bih, forward direction
    gib_sc,     # (T, B, 3H)  precomputed x@Wih+bih, backward direction
):
    T, B, H3 = gif_sc.shape
    H = H3 // 3

    # --- Prologue: input projection for all timesteps / both directions / all gates.
    # Off the serial recurrence path; all-2D statically-indexed ops.
    wih_f = wih_ref[0]
    wih_b = wih_ref[1]
    bih_f = bih_ref[0]
    bih_b = bih_ref[1]
    for t in range(T):
        e = emb_ref[t]                                                   # (B, E)
        gif_sc[t] = jnp.dot(e, wih_f, preferred_element_type=jnp.float32) + bih_f
        gib_sc[t] = jnp.dot(e, wih_b, preferred_element_type=jnp.float32) + bih_b

    # --- Hoist recurrence weights/biases into locals (reused by every unrolled step).
    whh_f = whh_ref[0]                                                   # (H, 3H)
    whh_b = whh_ref[1]
    bhh_f = bhh_ref[0]                                                   # (1, 3H)
    bhh_b = bhh_ref[1]

    def sig(x):
        # sigmoid via a single EUP tanh (no divide on the serial chain)
        return 0.5 * jnp.tanh(0.5 * x) + 0.5

    def gru_cell(gi, h, whh, bhh):
        # One packed hidden matmul per direction per step: (B,H)@(H,3H).
        gh = jnp.dot(h, whh, preferred_element_type=jnp.float32) + bhh   # (B, 3H)
        r = sig(gi[:, 0:H] + gh[:, 0:H])
        z = sig(gi[:, H:2 * H] + gh[:, H:2 * H])
        n = jnp.tanh(gi[:, 2 * H:3 * H] + r * gh[:, 2 * H:3 * H])        # b_hh_n inside r* (PyTorch)
        return (1.0 - z) * n + z * h

    def step(t, carry):
        h_f, h_b = carry
        tb = T - 1 - t
        h_f = gru_cell(gif_sc[t], h_f, whh_f, bhh_f)
        h_b = gru_cell(gib_sc[tb], h_b, whh_b, bhh_b)
        # Write results straight into the concatenated output (no scratch / no epilogue copy).
        out_ref[t, :, 0:H] = h_f
        out_ref[tb, :, H:2 * H] = h_b
        return (h_f, h_b)

    h0 = jnp.zeros((B, H), jnp.float32)
    h_f, h_b = lax.fori_loop(0, T, step, (h0, h0), unroll=True)

    # --- Fused fc + tanh epilogue: single (B,2H)@(2H,D) matmul on [h_f ; h_b].
    h_cat = jnp.concatenate([h_f, h_b], axis=-1)                         # (B, 2H)
    hid_ref[...] = jnp.tanh(
        jnp.dot(h_cat, fcw_ref[...], preferred_element_type=jnp.float32) + fcb_ref[...]
    )


# ----------------------------------------------------------------------------
# Full Encoder forward
# ----------------------------------------------------------------------------
def encoder_forward(x_tokens, params):
    """x_tokens: (T, B) int32 token ids.

    Returns (encoder_output (T, B, 2H), encoder_hidden (B, D)), matching the
    PyTorch Encoder.forward semantics (dropout = eval-mode identity).
    """
    T, B = x_tokens.shape
    H = params["whh"].shape[-1] // 3
    D = params["fcw"].shape[-1]

    # Embedding gather (+ dropout identity) — glue, plain JAX / XLA.
    embedded = params["embedding"][x_tokens].astype(jnp.float32)         # (T, B, E)

    vmem = pl.BlockSpec(memory_space=pltpu.MemorySpace.VMEM)
    kernel = pl.pallas_call(
        _encoder_fused_kernel,
        out_shape=(
            jax.ShapeDtypeStruct((T, B, 2 * H), jnp.float32),
            jax.ShapeDtypeStruct((B, D), jnp.float32),
        ),
        in_specs=[vmem] * 7,
        out_specs=(vmem, vmem),
        scratch_shapes=[
            pltpu.VMEM((T, B, 3 * H), jnp.float32),
            pltpu.VMEM((T, B, 3 * H), jnp.float32),
        ],
    )
    encoder_output, encoder_hidden = kernel(
        embedded,
        params["wih"], params["bih"], params["whh"], params["bhh"],
        params["fcw"], params["fcb"],
    )
    return encoder_output, encoder_hidden


# ----------------------------------------------------------------------------
# Parameters. NOTE: layout is the transpose of PyTorch's nn.GRU ((3H,E)/(3H,H)
# stacked [r|z|n]); importing torch weights requires a transpose (gate order kept r,z,n).
# ----------------------------------------------------------------------------
def init_params(key, vocab, embed_dim, enc_hidden, dec_hidden):
    ks = jax.random.split(key, 7)
    s = 0.1
    E, H, D = embed_dim, enc_hidden, dec_hidden
    return {
        "embedding": jax.random.normal(ks[0], (vocab, E), jnp.float32) * s,
        "wih": jax.random.normal(ks[1], (2, E, 3 * H), jnp.float32) * s,   # [dir, E, r|z|n]
        "bih": jax.random.normal(ks[2], (2, 1, 3 * H), jnp.float32) * s,
        "whh": jax.random.normal(ks[3], (2, H, 3 * H), jnp.float32) * s,   # [dir, H, r|z|n]
        "bhh": jax.random.normal(ks[4], (2, 1, 3 * H), jnp.float32) * s,
        "fcw": jax.random.normal(ks[5], (2 * H, D), jnp.float32) * s,      # rows [:H]=fwd, [H:]=bwd
        "fcb": jax.random.normal(ks[6], (1, D), jnp.float32) * s,
    }


# ----------------------------------------------------------------------------
# Pure-JAX reference (PyTorch GRU semantics) for a numeric sanity check
# ----------------------------------------------------------------------------
def encoder_reference(x_tokens, params):
    embedded = params["embedding"][x_tokens].astype(jnp.float32)
    T, B, _ = embedded.shape
    H = params["whh"].shape[-1] // 3

    def run_dir(d, xs):
        wih, whh = params["wih"][d], params["whh"][d]
        bih, bhh = params["bih"][d], params["bhh"][d]

        def step(h, x):
            gi = x @ wih + bih
            gh = h @ whh + bhh
            r = jax.nn.sigmoid(gi[:, 0:H] + gh[:, 0:H])
            z = jax.nn.sigmoid(gi[:, H:2 * H] + gh[:, H:2 * H])
            n = jnp.tanh(gi[:, 2 * H:] + r * gh[:, 2 * H:])
            h_new = (1.0 - z) * n + z * h
            return h_new, h_new

        h_last, ys = lax.scan(step, jnp.zeros((B, H), jnp.float32), xs)
        return h_last, ys

    h_f, out_f = run_dir(0, embedded)
    h_b, out_b_rev = run_dir(1, embedded[::-1])
    out_b = out_b_rev[::-1]
    enc_out = jnp.concatenate([out_f, out_b], axis=-1)
    enc_hid = jnp.tanh(
        jnp.concatenate([h_f, h_b], axis=-1) @ params["fcw"] + params["fcb"]
    )
    return enc_out, enc_hid


if __name__ == "__main__":
    # Small shapes consistent with the module: vocab=50, embed=32, H=32, D=32, T=8, B=4
    VOCAB, EMBED, ENC_H, DEC_H = 50, 32, 32, 32
    T, B = 8, 4

    key = jax.random.PRNGKey(0)
    pkey, xkey = jax.random.split(key)
    params = init_params(pkey, VOCAB, EMBED, ENC_H, DEC_H)
    x_tokens = jax.random.randint(xkey, (T, B), 0, VOCAB, dtype=jnp.int32)

    with jax.default_matmul_precision("float32"):
        enc_out, enc_hid = jax.jit(encoder_forward)(x_tokens, params)
        jax.block_until_ready((enc_out, enc_hid))
        ref_out, ref_hid = jax.jit(encoder_reference)(x_tokens, params)
        jax.block_until_ready((ref_out, ref_hid))

    assert enc_out.shape == (T, B, 2 * ENC_H)
    assert enc_hid.shape == (B, DEC_H)
    err_out = float(jnp.max(jnp.abs(enc_out - ref_out)))
    err_hid = float(jnp.max(jnp.abs(enc_hid - ref_hid)))
    assert err_out < 5e-3 and err_hid < 5e-3, (err_out, err_hid)
    print("KERNEL_OK")
</pallas_src>

<mosaic_0001>
module attributes {stable_mosaic.version = 11 : i64} {
  func.func @_encoder_fused_kernel(%arg0: memref<8x4x32xf32, #tpu.memory_space<vmem>>, %arg1: memref<2x32x96xf32, #tpu.memory_space<vmem>>, %arg2: memref<2x1x96xf32, #tpu.memory_space<vmem>>, %arg3: memref<2x32x96xf32, #tpu.memory_space<vmem>>, %arg4: memref<2x1x96xf32, #tpu.memory_space<vmem>>, %arg5: memref<64x32xf32, #tpu.memory_space<vmem>>, %arg6: memref<1x32xf32, #tpu.memory_space<vmem>>, %arg7: memref<8x4x64xf32, #tpu.memory_space<vmem>>, %arg8: memref<4x32xf32, #tpu.memory_space<vmem>>, %arg9: memref<8x4x96xf32, #tpu.memory_space<vmem>>, %arg10: memref<8x4x96xf32, #tpu.memory_space<vmem>>) attributes {dimension_semantics = [], scalar_prefetch = 0 : i64, scratch_operands = 2 : i64, tpu.core_type = #tpu.core_type<tc>} {
    %c0 = arith.constant 0 : index
    %c0_0 = arith.constant 0 : index
    %c0_1 = arith.constant 0 : index
    %0 = vector.load %arg1[%c0, %c0_0, %c0_1] : memref<2x32x96xf32, #tpu.memory_space<vmem>>, vector<1x32x96xf32>
    %1 = vector.shape_cast %0 : vector<1x32x96xf32> to vector<32x96xf32>
    %c1 = arith.constant 1 : index
    %c0_2 = arith.constant 0 : index
    %c0_3 = arith.constant 0 : index
    %2 = vector.load %arg1[%c1, %c0_2, %c0_3] : memref<2x32x96xf32, #tpu.memory_space<vmem>>, vector<1x32x96xf32>
    %3 = vector.shape_cast %2 : vector<1x32x96xf32> to vector<32x96xf32>
    %c0_4 = arith.constant 0 : index
    %c0_5 = arith.constant 0 : index
    %c0_6 = arith.constant 0 : index
    %4 = vector.load %arg2[%c0_4, %c0_5, %c0_6] : memref<2x1x96xf32, #tpu.memory_space<vmem>>, vector<1x1x96xf32>
    %5 = vector.shape_cast %4 : vector<1x1x96xf32> to vector<1x96xf32>
    %c1_7 = arith.constant 1 : index
    %c0_8 = arith.constant 0 : index
    %c0_9 = arith.constant 0 : index
    %6 = vector.load %arg2[%c1_7, %c0_8, %c0_9] : memref<2x1x96xf32, #tpu.memory_space<vmem>>, vector<1x1x96xf32>
    %7 = vector.shape_cast %6 : vector<1x1x96xf32> to vector<1x96xf32>
    %c0_10 = arith.constant 0 : index
    %c0_11 = arith.constant 0 : index
    %c0_12 = arith.constant 0 : index
    %8 = vector.load %arg0[%c0_10, %c0_11, %c0_12] : memref<8x4x32xf32, #tpu.memory_space<vmem>>, vector<1x4x32xf32>
    %9 = vector.shape_cast %8 : vector<1x4x32xf32> to vector<4x32xf32>
    %cst = arith.constant dense<0.000000e+00> : vector<4x96xf32>
    %10 = tpu.matmul %9, %1, %cst {dimension_numbers = #tpu.dot_dimension_numbers<[1], [0], [0], [1], [0, 0, 1, 1], [], []>, precision = #tpu.contract_precision<fp32>} : vector<4x32xf32>, vector<32x96xf32>, vector<4x96xf32> -> vector<4x96xf32>
    %11 = vector.broadcast %5 : vector<1x96xf32> to vector<4x96xf32>
    %12 = arith.addf %10, %11 : vector<4x96xf32>
    %c0_13 = arith.constant 0 : index
    %c0_14 = arith.constant 0 : index
    %c0_15 = arith.constant 0 : index
    %13 = vector.load %arg9[%c0_13, %c0_14, %c0_15] : memref<8x4x96xf32, #tpu.memory_space<vmem>>, vector<1x4x96xf32>
    %14 = vector.shape_cast %13 : vector<1x4x96xf32> to vector<4x96xf32>
    %15 = vector.shape_cast %12 : vector<4x96xf32> to vector<1x4x96xf32>
    tpu.vector_store %arg9[%c0_13, %c0_14, %c0_15], %15 {strides = array<i32>} : memref<8x4x96xf32, #tpu.memory_space<vmem>>, vector<1x4x96xf32>,
    %cst_16 = arith.constant dense<0.000000e+00> : vector<4x96xf32>
    %16 = tpu.matmul %9, %3, %cst_16 {dimension_numbers = #tpu.dot_dimension_numbers<[1], [0], [0], [1], [0, 0, 1, 1], [], []>, precision = #tpu.contract_precision<fp32>} : vector<4x32xf32>, vector<32x96xf32>, vector<4x96xf32> -> vector<4x96xf32>
    %17 = vector.broadcast %7 : vector<1x96xf32> to vector<4x96xf32>
    %18 = arith.addf %16, %17 : vector<4x96xf32>
    %c0_17 = arith.constant 0 : index
    %c0_18 = arith.constant 0 : index
    %c0_19 = arith.constant 0 : index
    %19 = vector.load %arg10[%c0_17, %c0_18, %c0_19] : memref<8x4x96xf32, #tpu.memory_space<vmem>>, vector<1x4x96xf32>
    %20 = vector.shape_cast %19 : vector<1x4x96xf32> to vector<4x96xf32>
    %21 = vector.shape_cast %18 : vector<4x96xf32> to vector<1x4x96xf32>
    tpu.vector_store %arg10[%c0_17, %c0_18, %c0_19], %21 {strides = array<i32>} : memref<8x4x96xf32, #tpu.memory_space<vmem>>, vector<1x4x96xf32>,
    %c1_20 = arith.constant 1 : index
    %c0_21 = arith.constant 0 : index
    %c0_22 = arith.constant 0 : index
    %22 = vector.load %arg0[%c1_20, %c0_21, %c0_22] : memref<8x4x32xf32, #tpu.memory_space<vmem>>, vector<1x4x32xf32>
    %23 = vector.shape_cast %22 : vector<1x4x32xf32> to vector<4x32xf32>
    %cst_23 = arith.constant dense<0.000000e+00> : vector<4x96xf32>
    %24 = tpu.matmul %23, %1, %cst_23 {dimension_numbers = #tpu.dot_dimension_numbers<[1], [0], [0], [1], [0, 0, 1, 1], [], []>, precision = #tpu.contract_precision<fp32>} : vector<4x32xf32>, vector<32x96xf32>, vector<4x96xf32> -> vector<4x96xf32>
    %25 = vector.broadcast %5 : vector<1x96xf32> to vector<4x96xf32>
    %26 = arith.addf %24, %25 : vector<4x96xf32>
    %c1_24 = arith.constant 1 : index
    %c0_25 = arith.constant 0 : index
    %c0_26 = arith.constant 0 : index
    %27 = vector.load %arg9[%c1_24, %c0_25, %c0_26] : memref<8x4x96xf32, #tpu.memory_space<vmem>>, vector<1x4x96xf32>
    %28 = vector.shape_cast %27 : vector<1x4x96xf32> to vector<4x96xf32>
    %29 = vector.shape_cast %26 : vector<4x96xf32> to vector<1x4x96xf32>
    tpu.vector_store %arg9[%c1_24, %c0_25, %c0_26], %29 {strides = array<i32>} : memref<8x4x96xf32, #tpu.memory_space<vmem>>, vector<1x4x96xf32>,
    %cst_27 = arith.constant dense<0.000000e+00> : vector<4x96xf32>
    %30 = tpu.matmul %23, %3, %cst_27 {dimension_numbers = #tpu.dot_dimension_numbers<[1], [0], [0], [1], [0, 0, 1, 1], [], []>, precision = #tpu.contract_precision<fp32>} : vector<4x32xf32>, vector<32x96xf32>, vector<4x96xf32> -> vector<4x96xf32>
    %31 = vector.broadcast %7 : vector<1x96xf32> to vector<4x96xf32>
    %32 = arith.addf %30, %31 : vector<4x96xf32>
    %c1_28 = arith.constant 1 : index
    %c0_29 = arith.constant 0 : index
    %c0_30 = arith.constant 0 : index
    %33 = vector.load %arg10[%c1_28, %c0_29, %c0_30] : memref<8x4x96xf32, #tpu.memory_space<vmem>>, vector<1x4x96xf32>
    %34 = vector.shape_cast %33 : vector<1x4x96xf32> to vector<4x96xf32>
    %35 = vector.shape_cast %32 : vector<4x96xf32> to vector<1x4x96xf32>
    tpu.vector_store %arg10[%c1_28, %c0_29, %c0_30], %35 {strides = array<i32>} : memref<8x4x96xf32, #tpu.memory_space<vmem>>, vector<1x4x96xf32>,
    %c2 = arith.constant 2 : index
    %c0_31 = arith.constant 0 : index
    %c0_32 = arith.constant 0 : index
    %36 = vector.load %arg0[%c2, %c0_31, %c0_32] : memref<8x4x32xf32, #tpu.memory_space<vmem>>, vector<1x4x32xf32>
    %37 = vector.shape_cast %36 : vector<1x4x32xf32> to vector<4x32xf32>
    %cst_33 = arith.constant dense<0.000000e+00> : vector<4x96xf32>
    %38 = tpu.matmul %37, %1, %cst_33 {dimension_numbers = #tpu.dot_dimension_numbers<[1], [0], [0], [1], [0, 0, 1, 1], [], []>, precision = #tpu.contract_precision<fp32>} : vector<4x32xf32>, vector<32x96xf32>, vector<4x96xf32> -> vector<4x96xf32>
    %39 = vector.broadcast %5 : vector<1x96xf32> to vector<4x96xf32>
    %40 = arith.addf %38, %39 : vector<4x96xf32>
    %c2_34 = arith.constant 2 : index
    %c0_35 = arith.constant 0 : index
    %c0_36 = arith.constant 0 : index
    %41 = vector.load %arg9[%c2_34, %c0_35, %c0_36] : memref<8x4x96xf32, #tpu.memory_space<vmem>>, vector<1x4x96xf32>
    %42 = vector.shape_cast %41 : vector<1x4x96xf32> to vector<4x96xf32>
    %43 = vector.shape_cast %40 : vector<4x96xf32> to vector<1x4x96xf32>
    tpu.vector_store %arg9[%c2_34, %c0_35, %c0_36], %43 {strides = array<i32>} : memref<8x4x96xf32, #tpu.memory_space<vmem>>, vector<1x4x96xf32>,
    %cst_37 = arith.constant dense<0.000000e+00> : vector<4x96xf32>
    %44 = tpu.matmul %37, %3, %cst_37 {dimension_numbers = #tpu.dot_dimension_numbers<[1], [0], [0], [1], [0, 0, 1, 1], [], []>, precision = #tpu.contract_precision<fp32>} : vector<4x32xf32>, vector<32x96xf32>, vector<4x96xf32> -> vector<4x96xf32>
    %45 = vector.broadcast %7 : vector<1x96xf32> to vector<4x96xf32>
    %46 = arith.addf %44, %45 : vector<4x96xf32>
    %c2_38 = arith.constant 2 : index
    %c0_39 = arith.constant 0 : index
    %c0_40 = arith.constant 0 : index
    %47 = vector.load %arg10[%c2_38, %c0_39, %c0_40] : memref<8x4x96xf32, #tpu.memory_space<vmem>>, vector<1x4x96xf32>
    %48 = vector.shape_cast %47 : vector<1x4x96xf32> to vector<4x96xf32>
    %49 = vector.shape_cast %46 : vector<4x96xf32> to vector<1x4x96xf32>
    tpu.vector_store %arg10[%c2_38, %c0_39, %c0_40], %49 {strides = array<i32>} : memref<8x4x96xf32, #tpu.memory_space<vmem>>, vector<1x4x96xf32>,
    %c3 = arith.constant 3 : index
    %c0_41 = arith.constant 0 : index
    %c0_42 = arith.constant 0 : index
    %50 = vector.load %arg0[%c3, %c0_41, %c0_42] : memref<8x4x32xf32, #tpu.memory_space<vmem>>, vector<1x4x32xf32>
    %51 = vector.shape_cast %50 : vector<1x4x32xf32> to vector<4x32xf32>
    %cst_43 = arith.constant dense<0.000000e+00> : vector<4x96xf32>
    %52 = tpu.matmul %51, %1, %cst_43 {dimension_numbers = #tpu.dot_dimension_numbers<[1], [0], [0], [1], [0, 0, 1, 1], [], []>, precision = #tpu.contract_precision<fp32>} : vector<4x32xf32>, vector<32x96xf32>, vector<4x96xf32> -> vector<4x96xf32>
    %53 = vector.broadcast %5 : vector<1x96xf32> to vector<4x96xf32>
    %54 = arith.addf %52, %53 : vector<4x96xf32>
    %c3_44 = arith.constant 3 : index
    %c0_45 = arith.constant 0 : index
    %c0_46 = arith.constant 0 : index
    %55 = vector.load %arg9[%c3_44, %c0_45, %c0_46] : memref<8x4x96xf32, #tpu.memory_space<vmem>>, vector<1x4x96xf32>
    %56 = vector.shape_cast %55 : vector<1x4x96xf32> to vector<4x96xf32>
    %57 = vector.shape_cast %54 : vector<4x96xf32> to vector<1x4x96xf32>
    tpu.vector_store %arg9[%c3_44, %c0_45, %c0_46], %57 {strides = array<i32>} : memref<8x4x96xf32, #tpu.memory_space<vmem>>, vector<1x4x96xf32>,
    %cst_47 = arith.constant dense<0.000000e+00> : vector<4x96xf32>
    %58 = tpu.matmul %51, %3, %cst_47 {dimension_numbers = #tpu.dot_dimension_numbers<[1], [0], [0], [1], [0, 0, 1, 1], [], []>, precision = #tpu.contract_precision<fp32>} : vector<4x32xf32>, vector<32x96xf32>, vector<4x96xf32> -> vector<4x96xf32>
    %59 = vector.broadcast %7 : vector<1x96xf32> to vector<4x96xf32>
    %60 = arith.addf %58, %59 : vector<4x96xf32>
    %c3_48 = arith.constant 3 : index
    %c0_49 = arith.constant 0 : index
    %c0_50 = arith.constant 0 : index
    %61 = vector.load %arg10[%c3_48, %c0_49, %c0_50] : memref<8x4x96xf32, #tpu.memory_space<vmem>>, vector<1x4x96xf32>
    %62 = vector.shape_cast %61 : vector<1x4x96xf32> to vector<4x96xf32>
    %63 = vector.shape_cast %60 : vector<4x96xf32> to vector<1x4x96xf32>
    tpu.vector_store %arg10[%c3_48, %c0_49, %c0_50], %63 {strides = array<i32>} : memref<8x4x96xf32, #tpu.memory_space<vmem>>, vector<1x4x96xf32>,
    %c4 = arith.constant 4 : index
    %c0_51 = arith.constant 0 : index
    %c0_52 = arith.constant 0 : index
    %64 = vector.load %arg0[%c4, %c0_51, %c0_52] : memref<8x4x32xf32, #tpu.memory_space<vmem>>, vector<1x4x32xf32>
    %65 = vector.shape_cast %64 : vector<1x4x32xf32> to vector<4x32xf32>
    %cst_53 = arith.constant dense<0.000000e+00> : vector<4x96xf32>
    %66 = tpu.matmul %65, %1, %cst_53 {dimension_numbers = #tpu.dot_dimension_numbers<[1], [0], [0], [1], [0, 0, 1, 1], [], []>, precision = #tpu.contract_precision<fp32>} : vector<4x32xf32>, vector<32x96xf32>, vector<4x96xf32> -> vector<4x96xf32>
    %67 = vector.broadcast %5 : vector<1x96xf32> to vector<4x96xf32>
    %68 = arith.addf %66, %67 : vector<4x96xf32>
    %c4_54 = arith.constant 4 : index
    %c0_55 = arith.constant 0 : index
    %c0_56 = arith.constant 0 : index
    %69 = vector.load %arg9[%c4_54, %c0_55, %c0_56] : memref<8x4x96xf32, #tpu.memory_space<vmem>>, vector<1x4x96xf32>
    %70 = vector.shape_cast %69 : vector<1x4x96xf32> to vector<4x96xf32>
    %71 = vector.shape_cast %68 : vector<4x96xf32> to vector<1x4x96xf32>
    tpu.vector_store %arg9[%c4_54, %c0_55, %c0_56], %71 {strides = array<i32>} : memref<8x4x96xf32, #tpu.memory_space<vmem>>, vector<1x4x96xf32>,
    %cst_57 = arith.constant dense<0.000000e+00> : vector<4x96xf32>
    %72 = tpu.matmul %65, %3, %cst_57 {dimension_numbers = #tpu.dot_dimension_numbers<[1], [0], [0], [1], [0, 0, 1, 1], [], []>, precision = #tpu.contract_precision<fp32>} : vector<4x32xf32>, vector<32x96xf32>, vector<4x96xf32> -> vector<4x96xf32>
    %73 = vector.broadcast %7 : vector<1x96xf32> to vector<4x96xf32>
    %74 = arith.addf %72, %73 : vector<4x96xf32>
    %c4_58 = arith.constant 4 : index
    %c0_59 = arith.constant 0 : index
    %c0_60 = arith.constant 0 : index
    %75 = vector.load %arg10[%c4_58, %c0_59, %c0_60] : memref<8x4x96xf32, #tpu.memory_space<vmem>>, vector<1x4x96xf32>
    %76 = vector.shape_cast %75 : vector<1x4x96xf32> to vector<4x96xf32>
    %77 = vector.shape_cast %74 : vector<4x96xf32> to vector<1x4x96xf32>
    tpu.vector_store %arg10[%c4_58, %c0_59, %c0_60], %77 {strides = array<i32>} : memref<8x4x96xf32, #tpu.memory_space<vmem>>, vector<1x4x96xf32>,
    %c5 = arith.constant 5 : index
    %c0_61 = arith.constant 0 : index
    %c0_62 = arith.constant 0 : index
    %78 = vector.load %arg0[%c5, %c0_61, %c0_62] : memref<8x4x32xf32, #tpu.memory_space<vmem>>, vector<1x4x32xf32>
    %79 = vector.shape_cast %78 : vector<1x4x32xf32> to vector<4x32xf32>
    %cst_63 = arith.constant dense<0.000000e+00> : vector<4x96xf32>
    %80 = tpu.matmul %79, %1, %cst_63 {dimension_numbers = #tpu.dot_dimension_numbers<[1], [0], [0], [1], [0, 0, 1, 1], [], []>, precision = #tpu.contract_precision<fp32>} : vector<4x32xf32>, vector<32x96xf32>, vector<4x96xf32> -> vector<4x96xf32>
    %81 = vector.broadcast %5 : vector<1x96xf32> to vector<4x96xf32>
    %82 = arith.addf %80, %81 : vector<4x96xf32>
    %c5_64 = arith.constant 5 : index
    %c0_65 = arith.constant 0 : index
    %c0_66 = arith.constant 0 : index
    %83 = vector.load %arg9[%c5_64, %c0_65, %c0_66] : memref<8x4x96xf32, #tpu.memory_space<vmem>>, vector<1x4x96xf32>
    %84 = vector.shape_cast %83 : vector<1x4x96xf32> to vector<4x96xf32>
    %85 = vector.shape_cast %82 : vector<4x96xf32> to vector<1x4x96xf32>
    tpu.vector_store %arg9[%c5_64, %c0_65, %c0_66], %85 {strides = array<i32>} : memref<8x4x96xf32, #tpu.memory_space<vmem>>, vector<1x4x96xf32>,
    %cst_67 = arith.constant dense<0.000000e+00> : vector<4x96xf32>
    %86 = tpu.matmul %79, %3, %cst_67 {dimension_numbers = #tpu.dot_dimension_numbers<[1], [0], [0], [1], [0, 0, 1, 1], [], []>, precision = #tpu.contract_precision<fp32>} : vector<4x32xf32>, vector<32x96xf32>, vector<4x96xf32> -> vector<4x96xf32>
    %87 = vector.broadcast %7 : vector<1x96xf32> to vector<4x96xf32>
    %88 = arith.addf %86, %87 : vector<4x96xf32>
    %c5_68 = arith.constant 5 : index
    %c0_69 = arith.constant 0 : index
    %c0_70 = arith.constant 0 : index
    %89 = vector.load %arg10[%c5_68, %c0_69, %c0_70] : memref<8x4x96xf32, #tpu.memory_space<vmem>>, vector<1x4x96xf32>
    %90 = vector.shape_cast %89 : vector<1x4x96xf32> to vector<4x96xf32>
    %91 = vector.shape_cast %88 : vector<4x96xf32> to vector<1x4x96xf32>
    tpu.vector_store %arg10[%c5_68, %c0_69, %c0_70], %91 {strides = array<i32>} : memref<8x4x96xf32, #tpu.memory_space<vmem>>, vector<1x4x96xf32>,
    %c6 = arith.constant 6 : index
    %c0_71 = arith.constant 0 : index
    %c0_72 = arith.constant 0 : index
    %92 = vector.load %arg0[%c6, %c0_71, %c0_72] : memref<8x4x32xf32, #tpu.memory_space<vmem>>, vector<1x4x32xf32>
    %93 = vector.shape_cast %92 : vector<1x4x32xf32> to vector<4x32xf32>
    %cst_73 = arith.constant dense<0.000000e+00> : vector<4x96xf32>
    %94 = tpu.matmul %93, %1, %cst_73 {dimension_numbers = #tpu.dot_dimension_numbers<[1], [0], [0], [1], [0, 0, 1, 1], [], []>, precision = #tpu.contract_precision<fp32>} : vector<4x32xf32>, vector<32x96xf32>, vector<4x96xf32> -> vector<4x96xf32>
    %95 = vector.broadcast %5 : vector<1x96xf32> to vector<4x96xf32>
    %96 = arith.addf %94, %95 : vector<4x96xf32>
    %c6_74 = arith.constant 6 : index
    %c0_75 = arith.constant 0 : index
    %c0_76 = arith.constant 0 : index
    %97 = vector.load %arg9[%c6_74, %c0_75, %c0_76] : memref<8x4x96xf32, #tpu.memory_space<vmem>>, vector<1x4x96xf32>
    %98 = vector.shape_cast %97 : vector<1x4x96xf32> to vector<4x96xf32>
    %99 = vector.shape_cast %96 : vector<4x96xf32> to vector<1x4x96xf32>
    tpu.vector_store %arg9[%c6_74, %c0_75, %c0_76], %99 {strides = array<i32>} : memref<8x4x96xf32, #tpu.memory_space<vmem>>, vector<1x4x96xf32>,
    %cst_77 = arith.constant dense<0.000000e+00> : vector<4x96xf32>
    %100 = tpu.matmul %93, %3, %cst_77 {dimension_numbers = #tpu.dot_dimension_numbers<[1], [0], [0], [1], [0, 0, 1, 1], [], []>, precision = #tpu.contract_precision<fp32>} : vector<4x32xf32>, vector<32x96xf32>, vector<4x96xf32> -> vector<4x96xf32>
    %101 = vector.broadcast %7 : vector<1x96xf32> to vector<4x96xf32>
    %102 = arith.addf %100, %101 : vector<4x96xf32>
    %c6_78 = arith.constant 6 : index
    %c0_79 = arith.constant 0 : index
    %c0_80 = arith.constant 0 : index
    %103 = vector.load %arg10[%c6_78, %c0_79, %c0_80] : memref<8x4x96xf32, #tpu.memory_space<vmem>>, vector<1x4x96xf32>
    %104 = vector.shape_cast %103 : vector<1x4x96xf32> to vector<4x96xf32>
    %105 = vector.shape_cast %102 : vector<4x96xf32> to vector<1x4x96xf32>
    tpu.vector_store %arg10[%c6_78, %c0_79, %c0_80], %105 {strides = array<i32>} : memref<8x4x96xf32, #tpu.memory_space<vmem>>, vector<1x4x96xf32>,
    %c7 = arith.constant 7 : index
    %c0_81 = arith.constant 0 : index
    %c0_82 = arith.constant 0 : index
    %106 = vector.load %arg0[%c7, %c0_81, %c0_82] : memref<8x4x32xf32, #tpu.memory_space<vmem>>, vector<1x4x32xf32>
    %107 = vector.shape_cast %106 : vector<1x4x32xf32> to vector<4x32xf32>
    %cst_83 = arith.constant dense<0.000000e+00> : vector<4x96xf32>
    %108 = tpu.matmul %107, %1, %cst_83 {dimension_numbers = #tpu.dot_dimension_numbers<[1], [0], [0], [1], [0, 0, 1, 1], [], []>, precision = #tpu.contract_precision<fp32>} : vector<4x32xf32>, vector<32x96xf32>, vector<4x96xf32> -> vector<4x96xf32>
    %109 = vector.broadcast %5 : vector<1x96xf32> to vector<4x96xf32>
    %110 = arith.addf %108, %109 : vector<4x96xf32>
    %c7_84 = arith.constant 7 : index
    %c0_85 = arith.constant 0 : index
    %c0_86 = arith.constant 0 : index
    %111 = vector.load %arg9[%c7_84, %c0_85, %c0_86] : memref<8x4x96xf32, #tpu.memory_space<vmem>>, vector<1x4x96xf32>
    %112 = vector.shape_cast %111 : vector<1x4x96xf32> to vector<4x96xf32>
    %113 = vector.shape_cast %110 : vector<4x96xf32> to vector<1x4x96xf32>
    tpu.vector_store %arg9[%c7_84, %c0_85, %c0_86], %113 {strides = array<i32>} : memref<8x4x96xf32, #tpu.memory_space<vmem>>, vector<1x4x96xf32>,
    %cst_87 = arith.constant dense<0.000000e+00> : vector<4x96xf32>
    %114 = tpu.matmul %107, %3, %cst_87 {dimension_numbers = #tpu.dot_dimension_numbers<[1], [0], [0], [1], [0, 0, 1, 1], [], []>, precision = #tpu.contract_precision<fp32>} : vector<4x32xf32>, vector<32x96xf32>, vector<4x96xf32> -> vector<4x96xf32>
    %115 = vector.broadcast %7 : vector<1x96xf32> to vector<4x96xf32>
    %116 = arith.addf %114, %115 : vector<4x96xf32>
    %c7_88 = arith.constant 7 : index
    %c0_89 = arith.constant 0 : index
    %c0_90 = arith.constant 0 : index
    %117 = vector.load %arg10[%c7_88, %c0_89, %c0_90] : memref<8x4x96xf32, #tpu.memory_space<vmem>>, vector<1x4x96xf32>
    %118 = vector.shape_cast %117 : vector<1x4x96xf32> to vector<4x96xf32>
    %119 = vector.shape_cast %116 : vector<4x96xf32> to vector<1x4x96xf32>
    tpu.vector_store %arg10[%c7_88, %c0_89, %c0_90], %119 {strides = array<i32>} : memref<8x4x96xf32, #tpu.memory_space<vmem>>, vector<1x4x96xf32>,
    %c0_91 = arith.constant 0 : index
    %c0_92 = arith.constant 0 : index
    %c0_93 = arith.constant 0 : index
    %120 = vector.load %arg3[%c0_91, %c0_92, %c0_93] : memref<2x32x96xf32, #tpu.memory_space<vmem>>, vector<1x32x96xf32>
    %121 = vector.shape_cast %120 : vector<1x32x96xf32> to vector<32x96xf32>
    %c1_94 = arith.constant 1 : index
    %c0_95 = arith.constant 0 : index
    %c0_96 = arith.constant 0 : index
    %122 = vector.load %arg3[%c1_94, %c0_95, %c0_96] : memref<2x32x96xf32, #tpu.memory_space<vmem>>, vector<1x32x96xf32>
    %123 = vector.shape_cast %122 : vector<1x32x96xf32> to vector<32x96xf32>
    %c0_97 = arith.constant 0 : index
    %c0_98 = arith.constant 0 : index
    %c0_99 = arith.constant 0 : index
    %124 = vector.load %arg4[%c0_97, %c0_98, %c0_99] : memref<2x1x96xf32, #tpu.memory_space<vmem>>, vector<1x1x96xf32>
    %125 = vector.shape_cast %124 : vector<1x1x96xf32> to vector<1x96xf32>
    %c1_100 = arith.constant 1 : index
    %c0_101 = arith.constant 0 : index
    %c0_102 = arith.constant 0 : index
    %126 = vector.load %arg4[%c1_100, %c0_101, %c0_102] : memref<2x1x96xf32, #tpu.memory_space<vmem>>, vector<1x1x96xf32>
    %127 = vector.shape_cast %126 : vector<1x1x96xf32> to vector<1x96xf32>
    %cst_103 = arith.constant 0.000000e+00 : f32
    %128 = vector.broadcast %cst_103 : f32 to vector<4x32xf32>
    %c0_i32 = arith.constant 0 : i32
    %c7_i32 = arith.constant 7 : i32
    %129 = arith.subi %c7_i32, %c0_i32 : i32
    %130 = arith.index_cast %c0_i32 : i32 to index
    %c0_104 = arith.constant 0 : index
    %c0_105 = arith.constant 0 : index
    %131 = vector.load %arg9[%130, %c0_104, %c0_105] : memref<8x4x96xf32, #tpu.memory_space<vmem>>, vector<1x4x96xf32>
    %132 = vector.shape_cast %131 : vector<1x4x96xf32> to vector<4x96xf32>
    %cst_106 = arith.constant dense<0.000000e+00> : vector<4x96xf32>
    %133 = tpu.matmul %128, %121, %cst_106 {dimension_numbers = #tpu.dot_dimension_numbers<[1], [0], [0], [1], [0, 0, 1, 1], [], []>, precision = #tpu.contract_precision<fp32>} : vector<4x32xf32>, vector<32x96xf32>, vector<4x96xf32> -> vector<4x96xf32>
    %134 = vector.broadcast %125 : vector<1x96xf32> to vector<4x96xf32>
    %135 = arith.addf %133, %134 : vector<4x96xf32>
    %136 = vector.extract_strided_slice %132 {offsets = [0, 0], sizes = [4, 32], strides = [1, 1]} : vector<4x96xf32> to vector<4x32xf32>
    %137 = vector.extract_strided_slice %135 {offsets = [0, 0], sizes = [4, 32], strides = [1, 1]} : vector<4x96xf32> to vector<4x32xf32>
    %138 = arith.addf %136, %137 : vector<4x32xf32>
    %cst_107 = arith.constant 5.000000e-01 : f32
    %139 = vector.broadcast %cst_107 : f32 to vector<4x32xf32>
    %140 = arith.mulf %139, %138 : vector<4x32xf32>
    %141 = math.tanh %140 : vector<4x32xf32>
    %cst_108 = arith.constant 5.000000e-01 : f32
    %142 = vector.broadcast %cst_108 : f32 to vector<4x32xf32>
    %143 = arith.mulf %142, %141 : vector<4x32xf32>
    %cst_109 = arith.constant 5.000000e-01 : f32
    %144 = vector.broadcast %cst_109 : f32 to vector<4x32xf32>
    %145 = arith.addf %143, %144 : vector<4x32xf32>
    %146 = vector.extract_strided_slice %132 {offsets = [0, 32], sizes = [4, 32], strides = [1, 1]} : vector<4x96xf32> to vector<4x32xf32>
    %147 = vector.extract_strided_slice %135 {offsets = [0, 32], sizes = [4, 32], strides = [1, 1]} : vector<4x96xf32> to vector<4x32xf32>
    %148 = arith.addf %146, %147 : vector<4x32xf32>
    %cst_110 = arith.constant 5.000000e-01 : f32
    %149 = vector.broadcast %cst_110 : f32 to vector<4x32xf32>
    %150 = arith.mulf %149, %148 : vector<4x32xf32>
    %151 = math.tanh %150 : vector<4x32xf32>
    %cst_111 = arith.constant 5.000000e-01 : f32
    %152 = vector.broadcast %cst_111 : f32 to vector<4x32xf32>
    %153 = arith.mulf %152, %151 : vector<4x32xf32>
    %cst_112 = arith.constant 5.000000e-01 : f32
    %154 = vector.broadcast %cst_112 : f32 to vector<4x32xf32>
    %155 = arith.addf %153, %154 : vector<4x32xf32>
    %156 = vector.extract_strided_slice %132 {offsets = [0, 64], sizes = [4, 32], strides = [1, 1]} : vector<4x96xf32> to vector<4x32xf32>
    %157 = vector.extract_strided_slice %135 {offsets = [0, 64], sizes = [4, 32], strides = [1, 1]} : vector<4x96xf32> to vector<4x32xf32>
    %158 = arith.mulf %145, %157 : vector<4x32xf32>
    %159 = arith.addf %156, %158 : vector<4x32xf32>
    %160 = math.tanh %159 : vector<4x32xf32>
    %cst_113 = arith.constant 1.000000e+00 : f32
    %161 = vector.broadcast %cst_113 : f32 to vector<4x32xf32>
    %162 = arith.subf %161, %155 : vector<4x32xf32>
    %163 = arith.mulf %162, %160 : vector<4x32xf32>
    %164 = arith.mulf %155, %128 : vector<4x32xf32>
    %165 = arith.addf %163, %164 : vector<4x32xf32>
    %166 = arith.index_cast %129 : i32 to index
    %c0_114 = arith.constant 0 : index
    %c0_115 = arith.constant 0 : index
    %167 = vector.load %arg10[%166, %c0_114, %c0_115] : memref<8x4x96xf32, #tpu.memory_space<vmem>>, vector<1x4x96xf32>
    %168 = vector.shape_cast %167 : vector<1x4x96xf32> to vector<4x96xf32>
    %cst_116 = arith.constant dense<0.000000e+00> : vector<4x96xf32>
    %169 = tpu.matmul %128, %123, %cst_116 {dimension_numbers = #tpu.dot_dimension_numbers<[1], [0], [0], [1], [0, 0, 1, 1], [], []>, precision = #tpu.contract_precision<fp32>} : vector<4x32xf32>, vector<32x96xf32>, vector<4x96xf32> -> vector<4x96xf32>
    %170 = vector.broadcast %127 : vector<1x96xf32> to vector<4x96xf32>
    %171 = arith.addf %169, %170 : vector<4x96xf32>
    %172 = vector.extract_strided_slice %168 {offsets = [0, 0], sizes = [4, 32], strides = [1, 1]} : vector<4x96xf32> to vector<4x32xf32>
    %173 = vector.extract_strided_slice %171 {offsets = [0, 0], sizes = [4, 32], strides = [1, 1]} : vector<4x96xf32> to vector<4x32xf32>
    %174 = arith.addf %172, %173 : vector<4x32xf32>
    %cst_117 = arith.constant 5.000000e-01 : f32
    %175 = vector.broadcast %cst_117 : f32 to vector<4x32xf32>
    %176 = arith.mulf %175, %174 : vector<4x32xf32>
    %177 = math.tanh %176 : vector<4x32xf32>
    %cst_118 = arith.constant 5.000000e-01 : f32
    %178 = vector.broadcast %cst_118 : f32 to vector<4x32xf32>
    %179 = arith.mulf %178, %177 : vector<4x32xf32>
    %cst_119 = arith.constant 5.000000e-01 : f32
    %180 = vector.broadcast %cst_119 : f32 to vector<4x32xf32>
    %181 = arith.addf %179, %180 : vector<4x32xf32>
    %182 = vector.extract_strided_slice %168 {offsets = [0, 32], sizes = [4, 32], strides = [1, 1]} : vector<4x96xf32> to vector<4x32xf32>
    %183 = vector.extract_strided_slice %171 {offsets = [0, 32], sizes = [4, 32], strides = [1, 1]} : vector<4x96xf32> to vector<4x32xf32>
    %184 = arith.addf %182, %183 : vector<4x32xf32>
    %cst_120 = arith.constant 5.000000e-01 : f32
    %185 = vector.broadcast %cst_120 : f32 to vector<4x32xf32>
    %186 = arith.mulf %185, %184 : vector<4x32xf32>
    %187 = math.tanh %186 : vector<4x32xf32>
    %cst_121 = arith.constant 5.000000e-01 : f32
    %188 = vector.broadcast %cst_121 : f32 to vector<4x32xf32>
    %189 = arith.mulf %188, %187 : vector<4x32xf32>
    %cst_122 = arith.constant 5.000000e-01 : f32
    %190 = vector.broadcast %cst_122 : f32 to vector<4x32xf32>
    %191 = arith.addf %189, %190 : vector<4x32xf32>
    %192 = vector.extract_strided_slice %168 {offsets = [0, 64], sizes = [4, 32], strides = [1, 1]} : vector<4x96xf32> to vector<4x32xf32>
    %193 = vector.extract_strided_slice %171 {offsets = [0, 64], sizes = [4, 32], strides = [1, 1]} : vector<4x96xf32> to vector<4x32xf32>
    %194 = arith.mulf %181, %193 : vector<4x32xf32>
    %195 = arith.addf %192, %194 : vector<4x32xf32>
    %196 = math.tanh %195 : vector<4x32xf32>
    %cst_123 = arith.constant 1.000000e+00 : f32
    %197 = vector.broadcast %cst_123 : f32 to vector<4x32xf32>
    %198 = arith.subf %197, %191 : vector<4x32xf32>
    %199 = arith.mulf %198, %196 : vector<4x32xf32>
    %200 = arith.mulf %191, %128 : vector<4x32xf32>
    %201 = arith.addf %199, %200 : vector<4x32xf32>
    %202 = arith.index_cast %c0_i32 : i32 to index
    %c0_124 = arith.constant 0 : index
    %c0_125 = arith.constant 0 : index
    %203 = vector.load %arg7[%202, %c0_124, %c0_125] : memref<8x4x64xf32, #tpu.memory_space<vmem>>, vector<1x4x32xf32>
    %204 = vector.shape_cast %203 : vector<1x4x32xf32> to vector<4x32xf32>
    %205 = vector.shape_cast %165 : vector<4x32xf32> to vector<1x4x32xf32>
    tpu.vector_store %arg7[%202, %c0_124, %c0_125], %205 {strides = array<i32>} : memref<8x4x64xf32, #tpu.memory_space<vmem>>, vector<1x4x32xf32>,
    %206 = arith.index_cast %129 : i32 to index
    %c0_126 = arith.constant 0 : index
    %c32 = arith.constant 32 : index
    %207 = vector.load %arg7[%206, %c0_126, %c32] : memref<8x4x64xf32, #tpu.memory_space<vmem>>, vector<1x4x32xf32>
    %208 = vector.shape_cast %207 : vector<1x4x32xf32> to vector<4x32xf32>
    %209 = vector.shape_cast %201 : vector<4x32xf32> to vector<1x4x32xf32>
    tpu.vector_store %arg7[%206, %c0_126, %c32], %209 {strides = array<i32>} : memref<8x4x64xf32, #tpu.memory_space<vmem>>, vector<1x4x32xf32>,
    %c1_i32 = arith.constant 1 : i32
    %c7_i32_127 = arith.constant 7 : i32
    %210 = arith.subi %c7_i32_127, %c1_i32 : i32
    %211 = arith.index_cast %c1_i32 : i32 to index
    %c0_128 = arith.constant 0 : index
    %c0_129 = arith.constant 0 : index
    %212 = vector.load %arg9[%211, %c0_128, %c0_129] : memref<8x4x96xf32, #tpu.memory_space<vmem>>, vector<1x4x96xf32>
    %213 = vector.shape_cast %212 : vector<1x4x96xf32> to vector<4x96xf32>
    %cst_130 = arith.constant dense<0.000000e+00> : vector<4x96xf32>
    %214 = tpu.matmul %165, %121, %cst_130 {dimension_numbers = #tpu.dot_dimension_numbers<[1], [0], [0], [1], [0, 0, 1, 1], [], []>, precision = #tpu.contract_precision<fp32>} : vector<4x32xf32>, vector<32x96xf32>, vector<4x96xf32> -> vector<4x96xf32>
    %215 = vector.broadcast %125 : vector<1x96xf32> to vector<4x96xf32>
    %216 = arith.addf %214, %215 : vector<4x96xf32>
    %217 = vector.extract_strided_slice %213 {offsets = [0, 0], sizes = [4, 32], strides = [1, 1]} : vector<4x96xf32> to vector<4x32xf32>
    %218 = vector.extract_strided_slice %216 {offsets = [0, 0], sizes = [4, 32], strides = [1, 1]} : vector<4x96xf32> to vector<4x32xf32>
    %219 = arith.addf %217, %218 : vector<4x32xf32>
    %cst_131 = arith.constant 5.000000e-01 : f32
    %220 = vector.broadcast %cst_131 : f32 to vector<4x32xf32>
    %221 = arith.mulf %220, %219 : vector<4x32xf32>
    %222 = math.tanh %221 : vector<4x32xf32>
    %cst_132 = arith.constant 5.000000e-01 : f32
    %223 = vector.broadcast %cst_132 : f32 to vector<4x32xf32>
    %224 = arith.mulf %223, %222 : vector<4x32xf32>
    %cst_133 = arith.constant 5.000000e-01 : f32
    %225 = vector.broadcast %cst_133 : f32 to vector<4x32xf32>
    %226 = arith.addf %224, %225 : vector<4x32xf32>
    %227 = vector.extract_strided_slice %213 {offsets = [0, 32], sizes = [4, 32], strides = [1, 1]} : vector<4x96xf32> to vector<4x32xf32>
    %228 = vector.extract_strided_slice %216 {offsets = [0, 32], sizes = [4, 32], strides = [1, 1]} : vector<4x96xf32> to vector<4x32xf32>
    %229 = arith.addf %227, %228 : vector<4x32xf32>
    %cst_134 = arith.constant 5.000000e-01 : f32
    %230 = vector.broadcast %cst_134 : f32 to vector<4x32xf32>
    %231 = arith.mulf %230, %229 : vector<4x32xf32>
    %232 = math.tanh %231 : vector<4x32xf32>
    %cst_135 = arith.constant 5.000000e-01 : f32
    %233 = vector.broadcast %cst_135 : f32 to vector<4x32xf32>
    %234 = arith.mulf %233, %232 : vector<4x32xf32>
    %cst_136 = arith.constant 5.000000e-01 : f32
    %235 = vector.broadcast %cst_136 : f32 to vector<4x32xf32>
    %236 = arith.addf %234, %235 : vector<4x32xf32>
    %237 = vector.extract_strided_slice %213 {offsets = [0, 64], sizes = [4, 32], strides = [1, 1]} : vector<4x96xf32> to vector<4x32xf32>
    %238 = vector.extract_strided_slice %216 {offsets = [0, 64], sizes = [4, 32], strides = [1, 1]} : vector<4x96xf32> to vector<4x32xf32>
    %239 = arith.mulf %226, %238 : vector<4x32xf32>
    %240 = arith.addf %237, %239 : vector<4x32xf32>
    %241 = math.tanh %240 : vector<4x32xf32>
    %cst_137 = arith.constant 1.000000e+00 : f32
    %242 = vector.broadcast %cst_137 : f32 to vector<4x32xf32>
    %243 = arith.subf %242, %236 : vector<4x32xf32>
    %244 = arith.mulf %243, %241 : vector<4x32xf32>
    %245 = arith.mulf %236, %165 : vector<4x32xf32>
    %246 = arith.addf %244, %245 : vector<4x32xf32>
    %247 = arith.index_cast %210 : i32 to index
    %c0_138 = arith.constant 0 : index
    %c0_139 = arith.constant 0 : index
    %248 = vector.load %arg10[%247, %c0_138, %c0_139] : memref<8x4x96xf32, #tpu.memory_space<vmem>>, vector<1x4x96xf32>
    %249 = vector.shape_cast %248 : vector<1x4x96xf32> to vector<4x96xf32>
    %cst_140 = arith.constant dense<0.000000e+00> : vector<4x96xf32>
    %250 = tpu.matmul %201, %123, %cst_140 {dimension_numbers = #tpu.dot_dimension_numbers<[1], [0], [0], [1], [0, 0, 1, 1], [], []>, precision = #tpu.contract_precision<fp32>} : vector<4x32xf32>, vector<32x96xf32>, vector<4x96xf32> -> vector<4x96xf32>
    %251 = vector.broadcast %127 : vector<1x96xf32> to vector<4x96xf32>
    %252 = arith.addf %250, %251 : vector<4x96xf32>
    %253 = vector.extract_strided_slice %249 {offsets = [0, 0], sizes = [4, 32], strides = [1, 1]} : vector<4x96xf32> to vector<4x32xf32>
    %254 = vector.extract_strided_slice %252 {offsets = [0, 0], sizes = [4, 32], strides = [1, 1]} : vector<4x96xf32> to vector<4x32xf32>
    %255 = arith.addf %253, %254 : vector<4x32xf32>
    %cst_141 = arith.constant 5.000000e-01 : f32
    %256 = vector.broadcast %cst_141 : f32 to vector<4x32xf32>
    %257 = arith.mulf %256, %255 : vector<4x32xf32>
    %258 = math.tanh %257 : vector<4x32xf32>
    %cst_142 = arith.constant 5.000000e-01 : f32
    %259 = vector.broadcast %cst_142 : f32 to vector<4x32xf32>
    %260 = arith.mulf %259, %258 : vector<4x32xf32>
    %cst_143 = arith.constant 5.000000e-01 : f32
    %261 = vector.broadcast %cst_143 : f32 to vector<4x32xf32>
    %262 = arith.addf %260, %261 : vector<4x32xf32>
    %263 = vector.extract_strided_slice %249 {offsets = [0, 32], sizes = [4, 32], strides = [1, 1]} : vector<4x96xf32> to vector<4x32xf32>
    %264 = vector.extract_strided_slice %252 {offsets = [0, 32], sizes = [4, 32], strides = [1, 1]} : vector<4x96xf32> to vector<4x32xf32>
    %265 = arith.addf %263, %264 : vector<4x32xf32>
    %cst_144 = arith.constant 5.000000e-01 : f32
    %266 = vector.broadcast %cst_144 : f32 to vector<4x32xf32>
    %267 = arith.mulf %266, %265 : vector<4x32xf32>
    %268 = math.tanh %267 : vector<4x32xf32>
    %cst_145 = arith.constant 5.000000e-01 : f32
    %269 = vector.broadcast %cst_145 : f32 to vector<4x32xf32>
    %270 = arith.mulf %269, %268 : vector<4x32xf32>
    %cst_146 = arith.constant 5.000000e-01 : f32
    %271 = vector.broadcast %cst_146 : f32 to vector<4x32xf32>
    %272 = arith.addf %270, %271 : vector<4x32xf32>
    %273 = vector.extract_strided_slice %249 {offsets = [0, 64], sizes = [4, 32], strides = [1, 1]} : vector<4x96xf32> to vector<4x32xf32>
    %274 = vector.extract_strided_slice %252 {offsets = [0, 64], sizes = [4, 32], strides = [1, 1]} : vector<4x96xf32> to vector<4x32xf32>
    %275 = arith.mulf %262, %274 : vector<4x32xf32>
    %276 = arith.addf %273, %275 : vector<4x32xf32>
    %277 = math.tanh %276 : vector<4x32xf32>
    %cst_147 = arith.constant 1.000000e+00 : f32
    %278 = vector.broadcast %cst_147 : f32 to vector<4x32xf32>
    %279 = arith.subf %278, %272 : vector<4x32xf32>
    %280 = arith.mulf %279, %277 : vector<4x32xf32>
    %281 = arith.mulf %272, %201 : vector<4x32xf32>
    %282 = arith.addf %280, %281 : vector<4x32xf32>
    %283 = arith.index_cast %c1_i32 : i32 to index
    %c0_148 = arith.constant 0 : index
    %c0_149 = arith.constant 0 : index
    %284 = vector.load %arg7[%283, %c0_148, %c0_149] : memref<8x4x64xf32, #tpu.memory_space<vmem>>, vector<1x4x32xf32>
    %285 = vector.shape_cast %284 : vector<1x4x32xf32> to vector<4x32xf32>
    %286 = vector.shape_cast %246 : vector<4x32xf32> to vector<1x4x32xf32>
    tpu.vector_store %arg7[%283, %c0_148, %c0_149], %286 {strides = array<i32>} : memref<8x4x64xf32, #tpu.memory_space<vmem>>, vector<1x4x32xf32>,
    %287 = arith.index_cast %210 : i32 to index
    %c0_150 = arith.constant 0 : index
    %c32_151 = arith.constant 32 : index
    %288 = vector.load %arg7[%287, %c0_150, %c32_151] : memref<8x4x64xf32, #tpu.memory_space<vmem>>, vector<1x4x32xf32>
    %289 = vector.shape_cast %288 : vector<1x4x32xf32> to vector<4x32xf32>
    %290 = vector.shape_cast %282 : vector<4x32xf32> to vector<1x4x32xf32>
    tpu.vector_store %arg7[%287, %c0_150, %c32_151], %290 {strides = array<i32>} : memref<8x4x64xf32, #tpu.memory_space<vmem>>, vector<1x4x32xf32>,
    %c2_i32 = arith.constant 2 : i32
    %c7_i32_152 = arith.constant 7 : i32
    %291 = arith.subi %c7_i32_152, %c2_i32 : i32
    %292 = arith.index_cast %c2_i32 : i32 to index
    %c0_153 = arith.constant 0 : index
    %c0_154 = arith.constant 0 : index
    %293 = vector.load %arg9[%292, %c0_153, %c0_154] : memref<8x4x96xf32, #tpu.memory_space<vmem>>, vector<1x4x96xf32>
    %294 = vector.shape_cast %293 : vector<1x4x96xf32> to vector<4x96xf32>
    %cst_155 = arith.constant dense<0.000000e+00> : vector<4x96xf32>
    %295 = tpu.matmul %246, %121, %cst_155 {dimension_numbers = #tpu.dot_dimension_numbers<[1], [0], [0], [1], [0, 0, 1, 1], [], []>, precision = #tpu.contract_precision<fp32>} : vector<4x32xf32>, vector<32x96xf32>, vector<4x96xf32> -> vector<4x96xf32>
    %296 = vector.broadcast %125 : vector<1x96xf32> to vector<4x96xf32>
    %297 = arith.addf %295, %296 : vector<4x96xf32>
    %298 = vector.extract_strided_slice %294 {offsets = [0, 0], sizes = [4, 32], strides = [1, 1]} : vector<4x96xf32> to vector<4x32xf32>
    %299 = vector.extract_strided_slice %297 {offsets = [0, 0], sizes = [4, 32], strides = [1, 1]} : vector<4x96xf32> to vector<4x32xf32>
    %300 = arith.addf %298, %299 : vector<4x32xf32>
    %cst_156 = arith.constant 5.000000e-01 : f32
    %301 = vector.broadcast %cst_156 : f32 to vector<4x32xf32>
    %302 = arith.mulf %301, %300 : vector<4x32xf32>
    %303 = math.tanh %302 : vector<4x32xf32>
    %cst_157 = arith.constant 5.000000e-01 : f32
    %304 = vector.broadcast %cst_157 : f32 to vector<4x32xf32>
    %305 = arith.mulf %304, %303 : vector<4x32xf32>
    %cst_158 = arith.constant 5.000000e-01 : f32
    %306 = vector.broadcast %cst_158 : f32 to vector<4x32xf32>
    %307 = arith.addf %305, %306 : vector<4x32xf32>
    %308 = vector.extract_strided_slice %294 {offsets = [0, 32], sizes = [4, 32], strides = [1, 1]} : vector<4x96xf32> to vector<4x32xf32>
    %309 = vector.extract_strided_slice %297 {offsets = [0, 32], sizes = [4, 32], strides = [1, 1]} : vector<4x96xf32> to vector<4x32xf32>
    %310 = arith.addf %308, %309 : vector<4x32xf32>
    %cst_159 = arith.constant 5.000000e-01 : f32
    %311 = vector.broadcast %cst_159 : f32 to vector<4x32xf32>
    %312 = arith.mulf %311, %310 : vector<4x32xf32>
    %313 = math.tanh %312 : vector<4x32xf32>
    %cst_160 = arith.constant 5.000000e-01 : f32
    %314 = vector.broadcast %cst_160 : f32 to vector<4x32xf32>
    %315 = arith.mulf %314, %313 : vector<4x32xf32>
    %cst_161 = arith.constant 5.000000e-01 : f32
    %316 = vector.broadcast %cst_161 : f32 to vector<4x32xf32>
    %317 = arith.addf %315, %316 : vector<4x32xf32>
    %318 = vector.extract_strided_slice %294 {offsets = [0, 64], sizes = [4, 32], strides = [1, 1]} : vector<4x96xf32> to vector<4x32xf32>
    %319 = vector.extract_strided_slice %297 {offsets = [0, 64], sizes = [4, 32], strides = [1, 1]} : vector<4x96xf32> to vector<4x32xf32>
    %320 = arith.mulf %307, %319 : vector<4x32xf32>
    %321 = arith.addf %318, %320 : vector<4x32xf32>
    %322 = math.tanh %321 : vector<4x32xf32>
    %cst_162 = arith.constant 1.000000e+00 : f32
    %323 = vector.broadcast %cst_162 : f32 to vector<4x32xf32>
    %324 = arith.subf %323, %317 : vector<4x32xf32>
    %325 = arith.mulf %324, %322 : vector<4x32xf32>
    %326 = arith.mulf %317, %246 : vector<4x32xf32>
    %327 = arith.addf %325, %326 : vector<4x32xf32>
    %328 = arith.index_cast %291 : i32 to index
    %c0_163 = arith.constant 0 : index
    %c0_164 = arith.constant 0 : index
    %329 = vector.load %arg10[%328, %c0_163, %c0_164] : memref<8x4x96xf32, #tpu.memory_space<vmem>>, vector<1x4x96xf32>
    %330 = vector.shape_cast %329 : vector<1x4x96xf32> to vector<4x96xf32>
    %cst_165 = arith.constant dense<0.000000e+00> : vector<4x96xf32>
    %331 = tpu.matmul %282, %123, %cst_165 {dimension_numbers = #tpu.dot_dimension_numbers<[1], [0], [0], [1], [0, 0, 1, 1], [], []>, precision = #tpu.contract_precision<fp32>} : vector<4x32xf32>, vector<32x96xf32>, vector<4x96xf32> -> vector<4x96xf32>
    %332 = vector.broadcast %127 : vector<1x96xf32> to vector<4x96xf32>
    %333 = arith.addf %331, %332 : vector<4x96xf32>
    %334 = vector.extract_strided_slice %330 {offsets = [0, 0], sizes = [4, 32], strides = [1, 1]} : vector<4x96xf32> to vector<4x32xf32>
    %335 = vector.extract_strided_slice %333 {offsets = [0, 0], sizes = [4, 32], strides = [1, 1]} : vector<4x96xf32> to vector<4x32xf32>
    %336 = arith.addf %334, %335 : vector<4x32xf32>
    %cst_166 = arith.constant 5.000000e-01 : f32
    %337 = vector.broadcast %cst_166 : f32 to vector<4x32xf32>
    %338 = arith.mulf %337, %336 : vector<4x32xf32>
    %339 = math.tanh %338 : vector<4x32xf32>
    %cst_167 = arith.constant 5.000000e-01 : f32
    %340 = vector.broadcast %cst_167 : f32 to vector<4x32xf32>
    %341 = arith.mulf %340, %339 : vector<4x32xf32>
    %cst_168 = arith.constant 5.000000e-01 : f32
    %342 = vector.broadcast %cst_168 : f32 to vector<4x32xf32>
    %343 = arith.addf %341, %342 : vector<4x32xf32>
    %344 = vector.extract_strided_slice %330 {offsets = [0, 32], sizes = [4, 32], strides = [1, 1]} : vector<4x96xf32> to vector<4x32xf32>
    %345 = vector.extract_strided_slice %333 {offsets = [0, 32], sizes = [4, 32], strides = [1, 1]} : vector<4x96xf32> to vector<4x32xf32>
    %346 = arith.addf %344, %345 : vector<4x32xf32>
    %cst_169 = arith.constant 5.000000e-01 : f32
    %347 = vector.broadcast %cst_169 : f32 to vector<4x32xf32>
    %348 = arith.mulf %347, %346 : vector<4x32xf32>
    %349 = math.tanh %348 : vector<4x32xf32>
    %cst_170 = arith.constant 5.000000e-01 : f32
    %350 = vector.broadcast %cst_170 : f32 to vector<4x32xf32>
    %351 = arith.mulf %350, %349 : vector<4x32xf32>
    %cst_171 = arith.constant 5.000000e-01 : f32
    %352 = vector.broadcast %cst_171 : f32 to vector<4x32xf32>
    %353 = arith.addf %351, %352 : vector<4x32xf32>
    %354 = vector.extract_strided_slice %330 {offsets = [0, 64], sizes = [4, 32], strides = [1, 1]} : vector<4x96xf32> to vector<4x32xf32>
    %355 = vector.extract_strided_slice %333 {offsets = [0, 64], sizes = [4, 32], strides = [1, 1]} : vector<4x96xf32> to vector<4x32xf32>
    %356 = arith.mulf %343, %355 : vector<4x32xf32>
    %357 = arith.addf %354, %356 : vector<4x32xf32>
    %358 = math.tanh %357 : vector<4x32xf32>
    %cst_172 = arith.constant 1.000000e+00 : f32
    %359 = vector.broadcast %cst_172 : f32 to vector<4x32xf32>
    %360 = arith.subf %359, %353 : vector<4x32xf32>
    %361 = arith.mulf %360, %358 : vector<4x32xf32>
    %362 = arith.mulf %353, %282 : vector<4x32xf32>
    %363 = arith.addf %361, %362 : vector<4x32xf32>
    %364 = arith.index_cast %c2_i32 : i32 to index
    %c0_173 = arith.constant 0 : index
    %c0_174 = arith.constant 0 : index
    %365 = vector.load %arg7[%364, %c0_173, %c0_174] : memref<8x4x64xf32, #tpu.memory_space<vmem>>, vector<1x4x32xf32>
    %366 = vector.shape_cast %365 : vector<1x4x32xf32> to vector<4x32xf32>
    %367 = vector.shape_cast %327 : vector<4x32xf32> to vector<1x4x32xf32>
    tpu.vector_store %arg7[%364, %c0_173, %c0_174], %367 {strides = array<i32>} : memref<8x4x64xf32, #tpu.memory_space<vmem>>, vector<1x4x32xf32>,
    %368 = arith.index_cast %291 : i32 to index
    %c0_175 = arith.constant 0 : index
    %c32_176 = arith.constant 32 : index
    %369 = vector.load %arg7[%368, %c0_175, %c32_176] : memref<8x4x64xf32, #tpu.memory_space<vmem>>, vector<1x4x32xf32>
    %370 = vector.shape_cast %369 : vector<1x4x32xf32> to vector<4x32xf32>
    %371 = vector.shape_cast %363 : vector<4x32xf32> to vector<1x4x32xf32>
    tpu.vector_store %arg7[%368, %c0_175, %c32_176], %371 {strides = array<i32>} : memref<8x4x64xf32, #tpu.memory_space<vmem>>, vector<1x4x32xf32>,
    %c3_i32 = arith.constant 3 : i32
    %c7_i32_177 = arith.constant 7 : i32
    %372 = arith.subi %c7_i32_177, %c3_i32 : i32
    %373 = arith.index_cast %c3_i32 : i32 to index
    %c0_178 = arith.constant 0 : index
    %c0_179 = arith.constant 0 : index
    %374 = vector.load %arg9[%373, %c0_178, %c0_179] : memref<8x4x96xf32, #tpu.memory_space<vmem>>, vector<1x4x96xf32>
    %375 = vector.shape_cast %374 : vector<1x4x96xf32> to vector<4x96xf32>
    %cst_180 = arith.constant dense<0.000000e+00> : vector<4x96xf32>
    %376 = tpu.matmul %327, %121, %cst_180 {dimension_numbers = #tpu.dot_dimension_numbers<[1], [0], [0], [1], [0, 0, 1, 1], [], []>, precision = #tpu.contract_precision<fp32>} : vector<4x32xf32>, vector<32x96xf32>, vector<4x96xf32> -> vector<4x96xf32>
    %377 = vector.broadcast %125 : vector<1x96xf32> to vector<4x96xf32>
    %378 = arith.addf %376, %377 : vector<4x96xf32>
    %379 = vector.extract_strided_slice %375 {offsets = [0, 0], sizes = [4, 32], strides = [1, 1]} : vector<4x96xf32> to vector<4x32xf32>
    %380 = vector.extract_strided_slice %378 {offsets = [0, 0], sizes = [4, 32], strides = [1, 1]} : vector<4x96xf32> to vector<4x32xf32>
    %381 = arith.addf %379, %380 : vector<4x32xf32>
    %cst_181 = arith.constant 5.000000e-01 : f32
    %382 = vector.broadcast %cst_181 : f32 to vector<4x32xf32>
    %383 = arith.mulf %382, %381 : vector<4x32xf32>
    %384 = math.tanh %383 : vector<4x32xf32>
    %cst_182 = arith.constant 5.000000e-01 : f32
    %385 = vector.broadcast %cst_182 : f32 to vector<4x32xf32>
    %386 = arith.mulf %385, %384 : vector<4x32xf32>
    %cst_183 = arith.constant 5.000000e-01 : f32
    %387 = vector.broadcast %cst_183 : f32 to vector<4x32xf32>
    %388 = arith.addf %386, %387 : vector<4x32xf32>
    %389 = vector.extract_strided_slice %375 {offsets = [0, 32], sizes = [4, 32], strides = [1, 1]} : vector<4x96xf32> to vector<4x32xf32>
    %390 = vector.extract_strided_slice %378 {offsets = [0, 32], sizes = [4, 32], strides = [1, 1]} : vector<4x96xf32> to vector<4x32xf32>
    %391 = arith.addf %389, %390 : vector<4x32xf32>
    %cst_184 = arith.constant 5.000000e-01 : f32
    %392 = vector.broadcast %cst_184 : f32 to vector<4x32xf32>
    %393 = arith.mulf %392, %391 : vector<4x32xf32>
    %394 = math.tanh %393 : vector<4x32xf32>
    %cst_185 = arith.constant 5.000000e-01 : f32
    %395 = vector.broadcast %cst_185 : f32 to vector<4x32xf32>
    %396 = arith.mulf %395, %394 : vector<4x32xf32>
    %cst_186 = arith.constant 5.000000e-01 : f32
    %397 = vector.broadcast %cst_186 : f32 to vector<4x32xf32>
    %398 = arith.addf %396, %397 : vector<4x32xf32>
    %399 = vector.extract_strided_slice %375 {offsets = [0, 64], sizes = [4, 32], strides = [1, 1]} : vector<4x96xf32> to vector<4x32xf32>
    %400 = vector.extract_strided_slice %378 {offsets = [0, 64], sizes = [4, 32], strides = [1, 1]} : vector<4x96xf32> to vector<4x32xf32>
    %401 = arith.mulf %388, %400 : vector<4x32xf32>
    %402 = arith.addf %399, %401 : vector<4x32xf32>
    %403 = math.tanh %402 : vector<4x32xf32>
    %cst_187 = arith.constant 1.000000e+00 : f32
    %404 = vector.broadcast %cst_187 : f32 to vector<4x32xf32>
    %405 = arith.subf %404, %398 : vector<4x32xf32>
    %406 = arith.mulf %405, %403 : vector<4x32xf32>
    %407 = arith.mulf %398, %327 : vector<4x32xf32>
    %408 = arith.addf %406, %407 : vector<4x32xf32>
    %409 = arith.index_cast %372 : i32 to index
    %c0_188 = arith.constant 0 : index
    %c0_189 = arith.constant 0 : index
    %410 = vector.load %arg10[%409, %c0_188, %c0_189] : memref<8x4x96xf32, #tpu.memory_space<vmem>>, vector<1x4x96xf32>
    %411 = vector.shape_cast %410 : vector<1x4x96xf32> to vector<4x96xf32>
    %cst_190 = arith.constant dense<0.000000e+00> : vector<4x96xf32>
    %412 = tpu.matmul %363, %123, %cst_190 {dimension_numbers = #tpu.dot_dimension_numbers<[1], [0], [0], [1], [0, 0, 1, 1], [], []>, precision = #tpu.contract_precision<fp32>} : vector<4x32xf32>, vector<32x96xf32>, vector<4x96xf32> -> vector<4x96xf32>
    %413 = vector.broadcast %127 : vector<1x96xf32> to vector<4x96xf32>
    %414 = arith.addf %412, %413 : vector<4x96xf32>
    %415 = vector.extract_strided_slice %411 {offsets = [0, 0], sizes = [4, 32], strides = [1, 1]} : vector<4x96xf32> to vector<4x32xf32>
    %416 = vector.extract_strided_slice %414 {offsets = [0, 0], sizes = [4, 32], strides = [1, 1]} : vector<4x96xf32> to vector<4x32xf32>
    %417 = arith.addf %415, %416 : vector<4x32xf32>
    %cst_191 = arith.constant 5.000000e-01 : f32
    %418 = vector.broadcast %cst_191 : f32 to vector<4x32xf32>
    %419 = arith.mulf %418, %417 : vector<4x32xf32>
    %420 = math.tanh %419 : vector<4x32xf32>
    %cst_192 = arith.constant 5.000000e-01 : f32
    %421 = vector.broadcast %cst_192 : f32 to vector<4x32xf32>
    %422 = arith.mulf %421, %420 : vector<4x32xf32>
    %cst_193 = arith.constant 5.000000e-01 : f32
    %423 = vector.broadcast %cst_193 : f32 to vector<4x32xf32>
    %424 = arith.addf %422, %423 : vector<4x32xf32>
    %425 = vector.extract_strided_slice %411 {offsets = [0, 32], sizes = [4, 32], strides = [1, 1]} : vector<4x96xf32> to vector<4x32xf32>
    %426 = vector.extract_strided_slice %414 {offsets = [0, 32], sizes = [4, 32], strides = [1, 1]} : vector<4x96xf32> to vector<4x32xf32>
    %427 = arith.addf %425, %426 : vector<4x32xf32>
    %cst_194 = arith.constant 5.000000e-01 : f32
    %428 = vector.broadcast %cst_194 : f32 to vector<4x32xf32>
    %429 = arith.mulf %428, %427 : vector<4x32xf32>
    %430 = math.tanh %429 : vector<4x32xf32>
    %cst_195 = arith.constant 5.000000e-01 : f32
    %431 = vector.broadcast %cst_195 : f32 to vector<4x32xf32>
    %432 = arith.mulf %431, %430 : vector<4x32xf32>
    %cst_196 = arith.constant 5.000000e-01 : f32
    %433 = vector.broadcast %cst_196 : f32 to vector<4x32xf32>
    %434 = arith.addf %432, %433 : vector<4x32xf32>
    %435 = vector.extract_strided_slice %411 {offsets = [0, 64], sizes = [4, 32], strides = [1, 1]} : vector<4x96xf32> to vector<4x32xf32>
    %436 = vector.extract_strided_slice %414 {offsets = [0, 64], sizes = [4, 32], strides = [1, 1]} : vector<4x96xf32> to vector<4x32xf32>
    %437 = arith.mulf %424, %436 : vector<4x32xf32>
    %438 = arith.addf %435, %437 : vector<4x32xf32>
    %439 = math.tanh %438 : vector<4x32xf32>
    %cst_197 = arith.constant 1.000000e+00 : f32
    %440 = vector.broadcast %cst_197 : f32 to vector<4x32xf32>
    %441 = arith.subf %440, %434 : vector<4x32xf32>
    %442 = arith.mulf %441, %439 : vector<4x32xf32>
    %443 = arith.mulf %434, %363 : vector<4x32xf32>
    %444 = arith.addf %442, %443 : vector<4x32xf32>
    %445 = arith.index_cast %c3_i32 : i32 to index
    %c0_198 = arith.constant 0 : index
    %c0_199 = arith.constant 0 : index
    %446 = vector.load %arg7[%445, %c0_198, %c0_199] : memref<8x4x64xf32, #tpu.memory_space<vmem>>, vector<1x4x32xf32>
    %447 = vector.shape_cast %446 : vector<1x4x32xf32> to vector<4x32xf32>
    %448 = vector.shape_cast %408 : vector<4x32xf32> to vector<1x4x32xf32>
    tpu.vector_store %arg7[%445, %c0_198, %c0_199], %448 {strides = array<i32>} : memref<8x4x64xf32, #tpu.memory_space<vmem>>, vector<1x4x32xf32>,
    %449 = arith.index_cast %372 : i32 to index
    %c0_200 = arith.constant 0 : index
    %c32_201 = arith.constant 32 : index
    %450 = vector.load %arg7[%449, %c0_200, %c32_201] : memref<8x4x64xf32, #tpu.memory_space<vmem>>, vector<1x4x32xf32>
    %451 = vector.shape_cast %450 : vector<1x4x32xf32> to vector<4x32xf32>
    %452 = vector.shape_cast %444 : vector<4x32xf32> to vector<1x4x32xf32>
    tpu.vector_store %arg7[%449, %c0_200, %c32_201], %452 {strides = array<i32>} : memref<8x4x64xf32, #tpu.memory_space<vmem>>, vector<1x4x32xf32>,
    %c4_i32 = arith.constant 4 : i32
    %c7_i32_202 = arith.constant 7 : i32
    %453 = arith.subi %c7_i32_202, %c4_i32 : i32
    %454 = arith.index_cast %c4_i32 : i32 to index
    %c0_203 = arith.constant 0 : index
    %c0_204 = arith.constant 0 : index
    %455 = vector.load %arg9[%454, %c0_203, %c0_204] : memref<8x4x96xf32, #tpu.memory_space<vmem>>, vector<1x4x96xf32>
    %456 = vector.shape_cast %455 : vector<1x4x96xf32> to vector<4x96xf32>
    %cst_205 = arith.constant dense<0.000000e+00> : vector<4x96xf32>
    %457 = tpu.matmul %408, %121, %cst_205 {dimension_numbers = #tpu.dot_dimension_numbers<[1], [0], [0], [1], [0, 0, 1, 1], [], []>, precision = #tpu.contract_precision<fp32>} : vector<4x32xf32>, vector<32x96xf32>, vector<4x96xf32> -> vector<4x96xf32>
    %458 = vector.broadcast %125 : vector<1x96xf32> to vector<4x96xf32>
    %459 = arith.addf %457, %458 : vector<4x96xf32>
    %460 = vector.extract_strided_slice %456 {offsets = [0, 0], sizes = [4, 32], strides = [1, 1]} : vector<4x96xf32> to vector<4x32xf32>
    %461 = vector.extract_strided_slice %459 {offsets = [0, 0], sizes = [4, 32], strides = [1, 1]} : vector<4x96xf32> to vector<4x32xf32>
    %462 = arith.addf %460, %461 : vector<4x32xf32>
    %cst_206 = arith.constant 5.000000e-01 : f32
    %463 = vector.broadcast %cst_206 : f32 to vector<4x32xf32>
    %464 = arith.mulf %463, %462 : vector<4x32xf32>
    %465 = math.tanh %464 : vector<4x32xf32>
    %cst_207 = arith.constant 5.000000e-01 : f32
    %466 = vector.broadcast %cst_207 : f32 to vector<4x32xf32>
    %467 = arith.mulf %466, %465 : vector<4x32xf32>
    %cst_208 = arith.constant 5.000000e-01 : f32
    %468 = vector.broadcast %cst_208 : f32 to vector<4x32xf32>
    %469 = arith.addf %467, %468 : vector<4x32xf32>
    %470 = vector.extract_strided_slice %456 {offsets = [0, 32], sizes = [4, 32], strides = [1, 1]} : vector<4x96xf32> to vector<4x32xf32>
    %471 = vector.extract_strided_slice %459 {offsets = [0, 32], sizes = [4, 32], strides = [1, 1]} : vector<4x96xf32> to vector<4x32xf32>
    %472 = arith.addf %470, %471 : vector<4x32xf32>
    %cst_209 = arith.constant 5.000000e-01 : f32
    %473 = vector.broadcast %cst_209 : f32 to vector<4x32xf32>
    %474 = arith.mulf %473, %472 : vector<4x32xf32>
    %475 = math.tanh %474 : vector<4x32xf32>
    %cst_210 = arith.constant 5.000000e-01 : f32
    %476 = vector.broadcast %cst_210 : f32 to vector<4x32xf32>
    %477 = arith.mulf %476, %475 : vector<4x32xf32>
    %cst_211 = arith.constant 5.000000e-01 : f32
    %478 = vector.broadcast %cst_211 : f32 to vector<4x32xf32>
    %479 = arith.addf %477, %478 : vector<4x32xf32>
    %480 = vector.extract_strided_slice %456 {offsets = [0, 64], sizes = [4, 32], strides = [1, 1]} : vector<4x96xf32> to vector<4x32xf32>
    %481 = vector.extract_strided_slice %459 {offsets = [0, 64], sizes = [4, 32], strides = [1, 1]} : vector<4x96xf32> to vector<4x32xf32>
    %482 = arith.mulf %469, %481 : vector<4x32xf32>
    %483 = arith.addf %480, %482 : vector<4x32xf32>
    %484 = math.tanh %483 : vector<4x32xf32>
    %cst_212 = arith.constant 1.000000e+00 : f32
    %485 = vector.broadcast %cst_212 : f32 to vector<4x32xf32>
    %486 = arith.subf %485, %479 : vector<4x32xf32>
    %487 = arith.mulf %486, %484 : vector<4x32xf32>
    %488 = arith.mulf %479, %408 : vector<4x32xf32>
    %489 = arith.addf %487, %488 : vector<4x32xf32>
    %490 = arith.index_cast %453 : i32 to index
    %c0_213 = arith.constant 0 : index
    %c0_214 = arith.constant 0 : index
    %491 = vector.load %arg10[%490, %c0_213, %c0_214] : memref<8x4x96xf32, #tpu.memory_space<vmem>>, vector<1x4x96xf32>
    %492 = vector.shape_cast %491 : vector<1x4x96xf32> to vector<4x96xf32>
    %cst_215 = arith.constant dense<0.000000e+00> : vector<4x96xf32>
    %493 = tpu.matmul %444, %123, %cst_215 {dimension_numbers = #tpu.dot_dimension_numbers<[1], [0], [0], [1], [0, 0, 1, 1], [], []>, precision = #tpu.contract_precision<fp32>} : vector<4x32xf32>, vector<32x96xf32>, vector<4x96xf32> -> vector<4x96xf32>
    %494 = vector.broadcast %127 : vector<1x96xf32> to vector<4x96xf32>
    %495 = arith.addf %493, %494 : vector<4x96xf32>
    %496 = vector.extract_strided_slice %492 {offsets = [0, 0], sizes = [4, 32], strides = [1, 1]} : vector<4x96xf32> to vector<4x32xf32>
    %497 = vector.extract_strided_slice %495 {offsets = [0, 0], sizes = [4, 32], strides = [1, 1]} : vector<4x96xf32> to vector<4x32xf32>
    %498 = arith.addf %496, %497 : vector<4x32xf32>
    %cst_216 = arith.constant 5.000000e-01 : f32
    %499 = vector.broadcast %cst_216 : f32 to vector<4x32xf32>
    %500 = arith.mulf %499, %498 : vector<4x32xf32>
    %501 = math.tanh %500 : vector<4x32xf32>
    %cst_217 = arith.constant 5.000000e-01 : f32
    %502 = vector.broadcast %cst_217 : f32 to vector<4x32xf32>
    %503 = arith.mulf %502, %501 : vector<4x32xf32>
    %cst_218 = arith.constant 5.000000e-01 : f32
    %504 = vector.broadcast %cst_218 : f32 to vector<4x32xf32>
    %505 = arith.addf %503, %504 : vector<4x32xf32>
    %506 = vector.extract_strided_slice %492 {offsets = [0, 32], sizes = [4, 32], strides = [1, 1]} : vector<4x96xf32> to vector<4x32xf32>
    %507 = vector.extract_strided_slice %495 {offsets = [0, 32], sizes = [4, 32], strides = [1, 1]} : vector<4x96xf32> to vector<4x32xf32>
    %508 = arith.addf %506, %507 : vector<4x32xf32>
    %cst_219 = arith.constant 5.000000e-01 : f32
    %509 = vector.broadcast %cst_219 : f32 to vector<4x32xf32>
    %510 = arith.mulf %509, %508 : vector<4x32xf32>
    %511 = math.tanh %510 : vector<4x32xf32>
    %cst_220 = arith.constant 5.000000e-01 : f32
    %512 = vector.broadcast %cst_220 : f32 to vector<4x32xf32>
    %513 = arith.mulf %512, %511 : vector<4x32xf32>
    %cst_221 = arith.constant 5.000000e-01 : f32
    %514 = vector.broadcast %cst_221 : f32 to vector<4x32xf32>
    %515 = arith.addf %513, %514 : vector<4x32xf32>
    %516 = vector.extract_strided_slice %492 {offsets = [0, 64], sizes = [4, 32], strides = [1, 1]} : vector<4x96xf32> to vector<4x32xf32>
    %517 = vector.extract_strided_slice %495 {offsets = [0, 64], sizes = [4, 32], strides = [1, 1]} : vector<4x96xf32> to vector<4x32xf32>
    %518 = arith.mulf %505, %517 : vector<4x32xf32>
    %519 = arith.addf %516, %518 : vector<4x32xf32>
    %520 = math.tanh %519 : vector<4x32xf32>
    %cst_222 = arith.constant 1.000000e+00 : f32
    %521 = vector.broadcast %cst_222 : f32 to vector<4x32xf32>
    %522 = arith.subf %521, %515 : vector<4x32xf32>
    %523 = arith.mulf %522, %520 : vector<4x32xf32>
    %524 = arith.mulf %515, %444 : vector<4x32xf32>
    %525 = arith.addf %523, %524 : vector<4x32xf32>
    %526 = arith.index_cast %c4_i32 : i32 to index
    %c0_223 = arith.constant 0 : index
    %c0_224 = arith.constant 0 : index
    %527 = vector.load %arg7[%526, %c0_223, %c0_224] : memref<8x4x64xf32, #tpu.memory_space<vmem>>, vector<1x4x32xf32>
    %528 = vector.shape_cast %527 : vector<1x4x32xf32> to vector<4x32xf32>
    %529 = vector.shape_cast %489 : vector<4x32xf32> to vector<1x4x32xf32>
    tpu.vector_store %arg7[%526, %c0_223, %c0_224], %529 {strides = array<i32>} : memref<8x4x64xf32, #tpu.memory_space<vmem>>, vector<1x4x32xf32>,
    %530 = arith.index_cast %453 : i32 to index
    %c0_225 = arith.constant 0 : index
    %c32_226 = arith.constant 32 : index
    %531 = vector.load %arg7[%530, %c0_225, %c32_226] : memref<8x4x64xf32, #tpu.memory_space<vmem>>, vector<1x4x32xf32>
    %532 = vector.shape_cast %531 : vector<1x4x32xf32> to vector<4x32xf32>
    %533 = vector.shape_cast %525 : vector<4x32xf32> to vector<1x4x32xf32>
    tpu.vector_store %arg7[%530, %c0_225, %c32_226], %533 {strides = array<i32>} : memref<8x4x64xf32, #tpu.memory_space<vmem>>, vector<1x4x32xf32>,
    %c5_i32 = arith.constant 5 : i32
    %c7_i32_227 = arith.constant 7 : i32
    %534 = arith.subi %c7_i32_227, %c5_i32 : i32
    %535 = arith.index_cast %c5_i32 : i32 to index
    %c0_228 = arith.constant 0 : index
    %c0_229 = arith.constant 0 : index
    %536 = vector.load %arg9[%535, %c0_228, %c0_229] : memref<8x4x96xf32, #tpu.memory_space<vmem>>, vector<1x4x96xf32>
    %537 = vector.shape_cast %536 : vector<1x4x96xf32> to vector<4x96xf32>
    %cst_230 = arith.constant dense<0.000000e+00> : vector<4x96xf32>
    %538 = tpu.matmul %489, %121, %cst_230 {dimension_numbers = #tpu.dot_dimension_numbers<[1], [0], [0], [1], [0, 0, 1, 1], [], []>, precision = #tpu.contract_precision<fp32>} : vector<4x32xf32>, vector<32x96xf32>, vector<4x96xf32> -> vector<4x96xf32>
    %539 = vector.broadcast %125 : vector<1x96xf32> to vector<4x96xf32>
    %540 = arith.addf %538, %539 : vector<4x96xf32>
    %541 = vector.extract_strided_slice %537 {offsets = [0, 0], sizes = [4, 32], strides = [1, 1]} : vector<4x96xf32> to vector<4x32xf32>
    %542 = vector.extract_strided_slice %540 {offsets = [0, 0], sizes = [4, 32], strides = [1, 1]} : vector<4x96xf32> to vector<4x32xf32>
    %543 = arith.addf %541, %542 : vector<4x32xf32>
    %cst_231 = arith.constant 5.000000e-01 : f32
    %544 = vector.broadcast %cst_231 : f32 to vector<4x32xf32>
    %545 = arith.mulf %544, %543 : vector<4x32xf32>
    %546 = math.tanh %545 : vector<4x32xf32>
    %cst_232 = arith.constant 5.000000e-01 : f32
    %547 = vector.broadcast %cst_232 : f32 to vector<4x32xf32>
    %548 = arith.mulf %547, %546 : vector<4x32xf32>
    %cst_233 = arith.constant 5.000000e-01 : f32
    %549 = vector.broadcast %cst_233 : f32 to vector<4x32xf32>
    %550 = arith.addf %548, %549 : vector<4x32xf32>
    %551 = vector.extract_strided_slice %537 {offsets = [0, 32], sizes = [4, 32], strides = [1, 1]} : vector<4x96xf32> to vector<4x32xf32>
    %552 = vector.extract_strided_slice %540 {offsets = [0, 32], sizes = [4, 32], strides = [1, 1]} : vector<4x96xf32> to vector<4x32xf32>
    %553 = arith.addf %551, %552 : vector<4x32xf32>
    %cst_234 = arith.constant 5.000000e-01 : f32
    %554 = vector.broadcast %cst_234 : f32 to vector<4x32xf32>
    %555 = arith.mulf %554, %553 : vector<4x32xf32>
    %556 = math.tanh %555 : vector<4x32xf32>
    %cst_235 = arith.constant 5.000000e-01 : f32
    %557 = vector.broadcast %cst_235 : f32 to vector<4x32xf32>
    %558 = arith.mulf %557, %556 : vector<4x32xf32>
    %cst_236 = arith.constant 5.000000e-01 : f32
    %559 = vector.broadcast %cst_236 : f32 to vector<4x32xf32>
    %560 = arith.addf %558, %559 : vector<4x32xf32>
    %561 = vector.extract_strided_slice %537 {offsets = [0, 64], sizes = [4, 32], strides = [1, 1]} : vector<4x96xf32> to vector<4x32xf32>
    %562 = vector.extract_strided_slice %540 {offsets = [0, 64], sizes = [4, 32], strides = [1, 1]} : vector<4x96xf32> to vector<4x32xf32>
    %563 = arith.mulf %550, %562 : vector<4x32xf32>
    %564 = arith.addf %561, %563 : vector<4x32xf32>
    %565 = math.tanh %564 : vector<4x32xf32>
    %cst_237 = arith.constant 1.000000e+00 : f32
    %566 = vector.broadcast %cst_237 : f32 to vector<4x32xf32>
    %567 = arith.subf %566, %560 : vector<4x32xf32>
    %568 = arith.mulf %567, %565 : vector<4x32xf32>
    %569 = arith.mulf %560, %489 : vector<4x32xf32>
    %570 = arith.addf %568, %569 : vector<4x32xf32>
    %571 = arith.index_cast %534 : i32 to index
    %c0_238 = arith.constant 0 : index
    %c0_239 = arith.constant 0 : index
    %572 = vector.load %arg10[%571, %c0_238, %c0_239] : memref<8x4x96xf32, #tpu.memory_space<vmem>>, vector<1x4x96xf32>
    %573 = vector.shape_cast %572 : vector<1x4x96xf32> to vector<4x96xf32>
    %cst_240 = arith.constant dense<0.000000e+00> : vector<4x96xf32>
    %574 = tpu.matmul %525, %123, %cst_240 {dimension_numbers = #tpu.dot_dimension_numbers<[1], [0], [0], [1], [0, 0, 1, 1], [], []>, precision = #tpu.contract_precision<fp32>} : vector<4x32xf32>, vector<32x96xf32>, vector<4x96xf32> -> vector<4x96xf32>
    %575 = vector.broadcast %127 : vector<1x96xf32> to vector<4x96xf32>
    %576 = arith.addf %574, %575 : vector<4x96xf32>
    %577 = vector.extract_strided_slice %573 {offsets = [0, 0], sizes = [4, 32], strides = [1, 1]} : vector<4x96xf32> to vector<4x32xf32>
    %578 = vector.extract_strided_slice %576 {offsets = [0, 0], sizes = [4, 32], strides = [1, 1]} : vector<4x96xf32> to vector<4x32xf32>
    %579 = arith.addf %577, %578 : vector<4x32xf32>
    %cst_241 = arith.constant 5.000000e-01 : f32
    %580 = vector.broadcast %cst_241 : f32 to vector<4x32xf32>
    %581 = arith.mulf %580, %579 : vector<4x32xf32>
    %582 = math.tanh %581 : vector<4x32xf32>
    %cst_242 = arith.constant 5.000000e-01 : f32
    %583 = vector.broadcast %cst_242 : f32 to vector<4x32xf32>
    %584 = arith.mulf %583, %582 : vector<4x32xf32>
    %cst_243 = arith.constant 5.000000e-01 : f32
    %585 = vector.broadcast %cst_243 : f32 to vector<4x32xf32>
    %586 = arith.addf %584, %585 : vector<4x32xf32>
    %587 = vector.extract_strided_slice %573 {offsets = [0, 32], sizes = [4, 32], strides = [1, 1]} : vector<4x96xf32> to vector<4x32xf32>
    %588 = vector.extract_strided_slice %576 {offsets = [0, 32], sizes = [4, 32], strides = [1, 1]} : vector<4x96xf32> to vector<4x32xf32>
    %589 = arith.addf %587, %588 : vector<4x32xf32>
    %cst_244 = arith.constant 5.000000e-01 : f32
    %590 = vector.broadcast %cst_244 : f32 to vector<4x32xf32>
    %591 = arith.mulf %590, %589 : vector<4x32xf32>
    %592 = math.tanh %591 : vector<4x32xf32>
    %cst_245 = arith.constant 5.000000e-01 : f32
    %593 = vector.broadcast %cst_245 : f32 to vector<4x32xf32>
    %594 = arith.mulf %593, %592 : vector<4x32xf32>
    %cst_246 = arith.constant 5.000000e-01 : f32
    %595 = vector.broadcast %cst_246 : f32 to vector<4x32xf32>
    %596 = arith.addf %594, %595 : vector<4x32xf32>
    %597 = vector.extract_strided_slice %573 {offsets = [0, 64], sizes = [4, 32], strides = [1, 1]} : vector<4x96xf32> to vector<4x32xf32>
    %598 = vector.extract_strided_slice %576 {offsets = [0, 64], sizes = [4, 32], strides = [1, 1]} : vector<4x96xf32> to vector<4x32xf32>
    %599 = arith.mulf %586, %598 : vector<4x32xf32>
    %600 = arith.addf %597, %599 : vector<4x32xf32>
    %601 = math.tanh %600 : vector<4x32xf32>
    %cst_247 = arith.constant 1.000000e+00 : f32
    %602 = vector.broadcast %cst_247 : f32 to vector<4x32xf32>
    %603 = arith.subf %602, %596 : vector<4x32xf32>
    %604 = arith.mulf %603, %601 : vector<4x32xf32>
    %605 = arith.mulf %596, %525 : vector<4x32xf32>
    %606 = arith.addf %604, %605 : vector<4x32xf32>
    %607 = arith.index_cast %c5_i32 : i32 to index
    %c0_248 = arith.constant 0 : index
    %c0_249 = arith.constant 0 : index
    %608 = vector.load %arg7[%607, %c0_248, %c0_249] : memref<8x4x64xf32, #tpu.memory_space<vmem>>, vector<1x4x32xf32>
    %609 = vector.shape_cast %608 : vector<1x4x32xf32> to vector<4x32xf32>
    %610 = vector.shape_cast %570 : vector<4x32xf32> to vector<1x4x32xf32>
    tpu.vector_store %arg7[%607, %c0_248, %c0_249], %610 {strides = array<i32>} : memref<8x4x64xf32, #tpu.memory_space<vmem>>, vector<1x4x32xf32>,
    %611 = arith.index_cast %534 : i32 to index
    %c0_250 = arith.constant 0 : index
    %c32_251 = arith.constant 32 : index
    %612 = vector.load %arg7[%611, %c0_250, %c32_251] : memref<8x4x64xf32, #tpu.memory_space<vmem>>, vector<1x4x32xf32>
    %613 = vector.shape_cast %612 : vector<1x4x32xf32> to vector<4x32xf32>
    %614 = vector.shape_cast %606 : vector<4x32xf32> to vector<1x4x32xf32>
    tpu.vector_store %arg7[%611, %c0_250, %c32_251], %614 {strides = array<i32>} : memref<8x4x64xf32, #tpu.memory_space<vmem>>, vector<1x4x32xf32>,
    %c6_i32 = arith.constant 6 : i32
    %c7_i32_252 = arith.constant 7 : i32
    %615 = arith.subi %c7_i32_252, %c6_i32 : i32
    %616 = arith.index_cast %c6_i32 : i32 to index
    %c0_253 = arith.constant 0 : index
    %c0_254 = arith.constant 0 : index
    %617 = vector.load %arg9[%616, %c0_253, %c0_254] : memref<8x4x96xf32, #tpu.memory_space<vmem>>, vector<1x4x96xf32>
    %618 = vector.shape_cast %617 : vector<1x4x96xf32> to vector<4x96xf32>
    %cst_255 = arith.constant dense<0.000000e+00> : vector<4x96xf32>
    %619 = tpu.matmul %570, %121, %cst_255 {dimension_numbers = #tpu.dot_dimension_numbers<[1], [0], [0], [1], [0, 0, 1, 1], [], []>, precision = #tpu.contract_precision<fp32>} : vector<4x32xf32>, vector<32x96xf32>, vector<4x96xf32> -> vector<4x96xf32>
    %620 = vector.broadcast %125 : vector<1x96xf32> to vector<4x96xf32>
    %621 = arith.addf %619, %620 : vector<4x96xf32>
    %622 = vector.extract_strided_slice %618 {offsets = [0, 0], sizes = [4, 32], strides = [1, 1]} : vector<4x96xf32> to vector<4x32xf32>
    %623 = vector.extract_strided_slice %621 {offsets = [0, 0], sizes = [4, 32], strides = [1, 1]} : vector<4x96xf32> to vector<4x32xf32>
    %624 = arith.addf %622, %623 : vector<4x32xf32>
    %cst_256 = arith.constant 5.000000e-01 : f32
    %625 = vector.broadcast %cst_256 : f32 to vector<4x32xf32>
    %626 = arith.mulf %625, %624 : vector<4x32xf32>
    %627 = math.tanh %626 : vector<4x32xf32>
    %cst_257 = arith.constant 5.000000e-01 : f32
    %628 = vector.broadcast %cst_257 : f32 to vector<4x32xf32>
    %629 = arith.mulf %628, %627 : vector<4x32xf32>
    %cst_258 = arith.constant 5.000000e-01 : f32
    %630 = vector.broadcast %cst_258 : f32 to vector<4x32xf32>
    %631 = arith.addf %629, %630 : vector<4x32xf32>
    %632 = vector.extract_strided_slice %618 {offsets = [0, 32], sizes = [4, 32], strides = [1, 1]} : vector<4x96xf32> to vector<4x32xf32>
    %633 = vector.extract_strided_slice %621 {offsets = [0, 32], sizes = [4, 32], strides = [1, 1]} : vector<4x96xf32> to vector<4x32xf32>
    %634 = arith.addf %632, %633 : vector<4x32xf32>
    %cst_259 = arith.constant 5.000000e-01 : f32
    %635 = vector.broadcast %cst_259 : f32 to vector<4x32xf32>
    %636 = arith.mulf %635, %634 : vector<4x32xf32>
    %637 = math.tanh %636 : vector<4x32xf32>
    %cst_260 = arith.constant 5.000000e-01 : f32
    %638 = vector.broadcast %cst_260 : f32 to vector<4x32xf32>
    %639 = arith.mulf %638, %637 : vector<4x32xf32>
    %cst_261 = arith.constant 5.000000e-01 : f32
    %640 = vector.broadcast %cst_261 : f32 to vector<4x32xf32>
    %641 = arith.addf %639, %640 : vector<4x32xf32>
    %642 = vector.extract_strided_slice %618 {offsets = [0, 64], sizes = [4, 32], strides = [1, 1]} : vector<4x96xf32> to vector<4x32xf32>
    %643 = vector.extract_strided_slice %621 {offsets = [0, 64], sizes = [4, 32], strides = [1, 1]} : vector<4x96xf32> to vector<4x32xf32>
    %644 = arith.mulf %631, %643 : vector<4x32xf32>
    %645 = arith.addf %642, %644 : vector<4x32xf32>
    %646 = math.tanh %645 : vector<4x32xf32>
    %cst_262 = arith.constant 1.000000e+00 : f32
    %647 = vector.broadcast %cst_262 : f32 to vector<4x32xf32>
    %648 = arith.subf %647, %641 : vector<4x32xf32>
    %649 = arith.mulf %648, %646 : vector<4x32xf32>
    %650 = arith.mulf %641, %570 : vector<4x32xf32>
    %651 = arith.addf %649, %650 : vector<4x32xf32>
    %652 = arith.index_cast %615 : i32 to index
    %c0_263 = arith.constant 0 : index
    %c0_264 = arith.constant 0 : index
    %653 = vector.load %arg10[%652, %c0_263, %c0_264] : memref<8x4x96xf32, #tpu.memory_space<vmem>>, vector<1x4x96xf32>
    %654 = vector.shape_cast %653 : vector<1x4x96xf32> to vector<4x96xf32>
    %cst_265 = arith.constant dense<0.000000e+00> : vector<4x96xf32>
    %655 = tpu.matmul %606, %123, %cst_265 {dimension_numbers = #tpu.dot_dimension_numbers<[1], [0], [0], [1], [0, 0, 1, 1], [], []>, precision = #tpu.contract_precision<fp32>} : vector<4x32xf32>, vector<32x96xf32>, vector<4x96xf32> -> vector<4x96xf32>
    %656 = vector.broadcast %127 : vector<1x96xf32> to vector<4x96xf32>
    %657 = arith.addf %655, %656 : vector<4x96xf32>
    %658 = vector.extract_strided_slice %654 {offsets = [0, 0], sizes = [4, 32], strides = [1, 1]} : vector<4x96xf32> to vector<4x32xf32>
    %659 = vector.extract_strided_slice %657 {offsets = [0, 0], sizes = [4, 32], strides = [1, 1]} : vector<4x96xf32> to vector<4x32xf32>
    %660 = arith.addf %658, %659 : vector<4x32xf32>
    %cst_266 = arith.constant 5.000000e-01 : f32
    %661 = vector.broadcast %cst_266 : f32 to vector<4x32xf32>
    %662 = arith.mulf %661, %660 : vector<4x32xf32>
    %663 = math.tanh %662 : vector<4x32xf32>
    %cst_267 = arith.constant 5.000000e-01 : f32
    %664 = vector.broadcast %cst_267 : f32 to vector<4x32xf32>
    %665 = arith.mulf %664, %663 : vector<4x32xf32>
    %cst_268 = arith.constant 5.000000e-01 : f32
    %666 = vector.broadcast %cst_268 : f32 to vector<4x32xf32>
    %667 = arith.addf %665, %666 : vector<4x32xf32>
    %668 = vector.extract_strided_slice %654 {offsets = [0, 32], sizes = [4, 32], strides = [1, 1]} : vector<4x96xf32> to vector<4x32xf32>
    %669 = vector.extract_strided_slice %657 {offsets = [0, 32], sizes = [4, 32], strides = [1, 1]} : vector<4x96xf32> to vector<4x32xf32>
    %670 = arith.addf %668, %669 : vector<4x32xf32>
    %cst_269 = arith.constant 5.000000e-01 : f32
    %671 = vector.broadcast %cst_269 : f32 to vector<4x32xf32>
    %672 = arith.mulf %671, %670 : vector<4x32xf32>
    %673 = math.tanh %672 : vector<4x32xf32>
    %cst_270 = arith.constant 5.000000e-01 : f32
    %674 = vector.broadcast %cst_270 : f32 to vector<4x32xf32>
    %675 = arith.mulf %674, %673 : vector<4x32xf32>
    %cst_271 = arith.constant 5.000000e-01 : f32
    %676 = vector.broadcast %cst_271 : f32 to vector<4x32xf32>
    %677 = arith.addf %675, %676 : vector<4x32xf32>
    %678 = vector.extract_strided_slice %654 {offsets = [0, 64], sizes = [4, 32], strides = [1, 1]} : vector<4x96xf32> to vector<4x32xf32>
    %679 = vector.extract_strided_slice %657 {offsets = [0, 64], sizes = [4, 32], strides = [1, 1]} : vector<4x96xf32> to vector<4x32xf32>
    %680 = arith.mulf %667, %679 : vector<4x32xf32>
    %681 = arith.addf %678, %680 : vector<4x32xf32>
    %682 = math.tanh %681 : vector<4x32xf32>
    %cst_272 = arith.constant 1.000000e+00 : f32
    %683 = vector.broadcast %cst_272 : f32 to vector<4x32xf32>
    %684 = arith.subf %683, %677 : vector<4x32xf32>
    %685 = arith.mulf %684, %682 : vector<4x32xf32>
    %686 = arith.mulf %677, %606 : vector<4x32xf32>
    %687 = arith.addf %685, %686 : vector<4x32xf32>
    %688 = arith.index_cast %c6_i32 : i32 to index
    %c0_273 = arith.constant 0 : index
    %c0_274 = arith.constant 0 : index
    %689 = vector.load %arg7[%688, %c0_273, %c0_274] : memref<8x4x64xf32, #tpu.memory_space<vmem>>, vector<1x4x32xf32>
    %690 = vector.shape_cast %689 : vector<1x4x32xf32> to vector<4x32xf32>
    %691 = vector.shape_cast %651 : vector<4x32xf32> to vector<1x4x32xf32>
    tpu.vector_store %arg7[%688, %c0_273, %c0_274], %691 {strides = array<i32>} : memref<8x4x64xf32, #tpu.memory_space<vmem>>, vector<1x4x32xf32>,
    %692 = arith.index_cast %615 : i32 to index
    %c0_275 = arith.constant 0 : index
    %c32_276 = arith.constant 32 : index
    %693 = vector.load %arg7[%692, %c0_275, %c32_276] : memref<8x4x64xf32, #tpu.memory_space<vmem>>, vector<1x4x32xf32>
    %694 = vector.shape_cast %693 : vector<1x4x32xf32> to vector<4x32xf32>
    %695 = vector.shape_cast %687 : vector<4x32xf32> to vector<1x4x32xf32>
    tpu.vector_store %arg7[%692, %c0_275, %c32_276], %695 {strides = array<i32>} : memref<8x4x64xf32, #tpu.memory_space<vmem>>, vector<1x4x32xf32>,
    %c7_i32_277 = arith.constant 7 : i32
    %c7_i32_278 = arith.constant 7 : i32
    %696 = arith.subi %c7_i32_278, %c7_i32_277 : i32
    %697 = arith.index_cast %c7_i32_277 : i32 to index
    %c0_279 = arith.constant 0 : index
    %c0_280 = arith.constant 0 : index
    %698 = vector.load %arg9[%697, %c0_279, %c0_280] : memref<8x4x96xf32, #tpu.memory_space<vmem>>, vector<1x4x96xf32>
    %699 = vector.shape_cast %698 : vector<1x4x96xf32> to vector<4x96xf32>
    %cst_281 = arith.constant dense<0.000000e+00> : vector<4x96xf32>
    %700 = tpu.matmul %651, %121, %cst_281 {dimension_numbers = #tpu.dot_dimension_numbers<[1], [0], [0], [1], [0, 0, 1, 1], [], []>, precision = #tpu.contract_precision<fp32>} : vector<4x32xf32>, vector<32x96xf32>, vector<4x96xf32> -> vector<4x96xf32>
    %701 = vector.broadcast %125 : vector<1x96xf32> to vector<4x96xf32>
    %702 = arith.addf %700, %701 : vector<4x96xf32>
    %703 = vector.extract_strided_slice %699 {offsets = [0, 0], sizes = [4, 32], strides = [1, 1]} : vector<4x96xf32> to vector<4x32xf32>
    %704 = vector.extract_strided_slice %702 {offsets = [0, 0], sizes = [4, 32], strides = [1, 1]} : vector<4x96xf32> to vector<4x32xf32>
    %705 = arith.addf %703, %704 : vector<4x32xf32>
    %cst_282 = arith.constant 5.000000e-01 : f32
    %706 = vector.broadcast %cst_282 : f32 to vector<4x32xf32>
    %707 = arith.mulf %706, %705 : vector<4x32xf32>
    %708 = math.tanh %707 : vector<4x32xf32>
    %cst_283 = arith.constant 5.000000e-01 : f32
    %709 = vector.broadcast %cst_283 : f32 to vector<4x32xf32>
    %710 = arith.mulf %709, %708 : vector<4x32xf32>
    %cst_284 = arith.constant 5.000000e-01 : f32
    %711 = vector.broadcast %cst_284 : f32 to vector<4x32xf32>
    %712 = arith.addf %710, %711 : vector<4x32xf32>
    %713 = vector.extract_strided_slice %699 {offsets = [0, 32], sizes = [4, 32], strides = [1, 1]} : vector<4x96xf32> to vector<4x32xf32>
    %714 = vector.extract_strided_slice %702 {offsets = [0, 32], sizes = [4, 32], strides = [1, 1]} : vector<4x96xf32> to vector<4x32xf32>
    %715 = arith.addf %713, %714 : vector<4x32xf32>
    %cst_285 = arith.constant 5.000000e-01 : f32
    %716 = vector.broadcast %cst_285 : f32 to vector<4x32xf32>
    %717 = arith.mulf %716, %715 : vector<4x32xf32>
    %718 = math.tanh %717 : vector<4x32xf32>
    %cst_286 = arith.constant 5.000000e-01 : f32
    %719 = vector.broadcast %cst_286 : f32 to vector<4x32xf32>
    %720 = arith.mulf %719, %718 : vector<4x32xf32>
    %cst_287 = arith.constant 5.000000e-01 : f32
    %721 = vector.broadcast %cst_287 : f32 to vector<4x32xf32>
    %722 = arith.addf %720, %721 : vector<4x32xf32>
    %723 = vector.extract_strided_slice %699 {offsets = [0, 64], sizes = [4, 32], strides = [1, 1]} : vector<4x96xf32> to vector<4x32xf32>
    %724 = vector.extract_strided_slice %702 {offsets = [0, 64], sizes = [4, 32], strides = [1, 1]} : vector<4x96xf32> to vector<4x32xf32>
    %725 = arith.mulf %712, %724 : vector<4x32xf32>
    %726 = arith.addf %723, %725 : vector<4x32xf32>
    %727 = math.tanh %726 : vector<4x32xf32>
    %cst_288 = arith.constant 1.000000e+00 : f32
    %728 = vector.broadcast %cst_288 : f32 to vector<4x32xf32>
    %729 = arith.subf %728, %722 : vector<4x32xf32>
    %730 = arith.mulf %729, %727 : vector<4x32xf32>
    %731 = arith.mulf %722, %651 : vector<4x32xf32>
    %732 = arith.addf %730, %731 : vector<4x32xf32>
    %733 = arith.index_cast %696 : i32 to index
    %c0_289 = arith.constant 0 : index
    %c0_290 = arith.constant 0 : index
    %734 = vector.load %arg10[%733, %c0_289, %c0_290] : memref<8x4x96xf32, #tpu.memory_space<vmem>>, vector<1x4x96xf32>
    %735 = vector.shape_cast %734 : vector<1x4x96xf32> to vector<4x96xf32>
    %cst_291 = arith.constant dense<0.000000e+00> : vector<4x96xf32>
    %736 = tpu.matmul %687, %123, %cst_291 {dimension_numbers = #tpu.dot_dimension_numbers<[1], [0], [0], [1], [0, 0, 1, 1], [], []>, precision = #tpu.contract_precision<fp32>} : vector<4x32xf32>, vector<32x96xf32>, vector<4x96xf32> -> vector<4x96xf32>
    %737 = vector.broadcast %127 : vector<1x96xf32> to vector<4x96xf32>
    %738 = arith.addf %736, %737 : vector<4x96xf32>
    %739 = vector.extract_strided_slice %735 {offsets = [0, 0], sizes = [4, 32], strides = [1, 1]} : vector<4x96xf32> to vector<4x32xf32>
    %740 = vector.extract_strided_slice %738 {offsets = [0, 0], sizes = [4, 32], strides = [1, 1]} : vector<4x96xf32> to vector<4x32xf32>
    %741 = arith.addf %739, %740 : vector<4x32xf32>
    %cst_292 = arith.constant 5.000000e-01 : f32
    %742 = vector.broadcast %cst_292 : f32 to vector<4x32xf32>
    %743 = arith.mulf %742, %741 : vector<4x32xf32>
    %744 = math.tanh %743 : vector<4x32xf32>
    %cst_293 = arith.constant 5.000000e-01 : f32
    %745 = vector.broadcast %cst_293 : f32 to vector<4x32xf32>
    %746 = arith.mulf %745, %744 : vector<4x32xf32>
    %cst_294 = arith.constant 5.000000e-01 : f32
    %747 = vector.broadcast %cst_294 : f32 to vector<4x32xf32>
    %748 = arith.addf %746, %747 : vector<4x32xf32>
    %749 = vector.extract_strided_slice %735 {offsets = [0, 32], sizes = [4, 32], strides = [1, 1]} : vector<4x96xf32> to vector<4x32xf32>
    %750 = vector.extract_strided_slice %738 {offsets = [0, 32], sizes = [4, 32], strides = [1, 1]} : vector<4x96xf32> to vector<4x32xf32>
    %751 = arith.addf %749, %750 : vector<4x32xf32>
    %cst_295 = arith.constant 5.000000e-01 : f32
    %752 = vector.broadcast %cst_295 : f32 to vector<4x32xf32>
    %753 = arith.mulf %752, %751 : vector<4x32xf32>
    %754 = math.tanh %753 : vector<4x32xf32>
    %cst_296 = arith.constant 5.000000e-01 : f32
    %755 = vector.broadcast %cst_296 : f32 to vector<4x32xf32>
    %756 = arith.mulf %755, %754 : vector<4x32xf32>
    %cst_297 = arith.constant 5.000000e-01 : f32
    %757 = vector.broadcast %cst_297 : f32 to vector<4x32xf32>
    %758 = arith.addf %756, %757 : vector<4x32xf32>
    %759 = vector.extract_strided_slice %735 {offsets = [0, 64], sizes = [4, 32], strides = [1, 1]} : vector<4x96xf32> to vector<4x32xf32>
    %760 = vector.extract_strided_slice %738 {offsets = [0, 64], sizes = [4, 32], strides = [1, 1]} : vector<4x96xf32> to vector<4x32xf32>
    %761 = arith.mulf %748, %760 : vector<4x32xf32>
    %762 = arith.addf %759, %761 : vector<4x32xf32>
    %763 = math.tanh %762 : vector<4x32xf32>
    %cst_298 = arith.constant 1.000000e+00 : f32
    %764 = vector.broadcast %cst_298 : f32 to vector<4x32xf32>
    %765 = arith.subf %764, %758 : vector<4x32xf32>
    %766 = arith.mulf %765, %763 : vector<4x32xf32>
    %767 = arith.mulf %758, %687 : vector<4x32xf32>
    %768 = arith.addf %766, %767 : vector<4x32xf32>
    %769 = arith.index_cast %c7_i32_277 : i32 to index
    %c0_299 = arith.constant 0 : index
    %c0_300 = arith.constant 0 : index
    %770 = vector.load %arg7[%769, %c0_299, %c0_300] : memref<8x4x64xf32, #tpu.memory_space<vmem>>, vector<1x4x32xf32>
    %771 = vector.shape_cast %770 : vector<1x4x32xf32> to vector<4x32xf32>
    %772 = vector.shape_cast %732 : vector<4x32xf32> to vector<1x4x32xf32>
    tpu.vector_store %arg7[%769, %c0_299, %c0_300], %772 {strides = array<i32>} : memref<8x4x64xf32, #tpu.memory_space<vmem>>, vector<1x4x32xf32>,
    %773 = arith.index_cast %696 : i32 to index
    %c0_301 = arith.constant 0 : index
    %c32_302 = arith.constant 32 : index
    %774 = vector.load %arg7[%773, %c0_301, %c32_302] : memref<8x4x64xf32, #tpu.memory_space<vmem>>, vector<1x4x32xf32>
    %775 = vector.shape_cast %774 : vector<1x4x32xf32> to vector<4x32xf32>
    %776 = vector.shape_cast %768 : vector<4x32xf32> to vector<1x4x32xf32>
    tpu.vector_store %arg7[%773, %c0_301, %c32_302], %776 {strides = array<i32>} : memref<8x4x64xf32, #tpu.memory_space<vmem>>, vector<1x4x32xf32>,
    %c8_i32 = arith.constant 8 : i32
    %777 = tpu.concatenate %732, %768 in 1 : vector<4x32xf32>, vector<4x32xf32> -> vector<4x64xf32>
    %c0_303 = arith.constant 0 : index
    %c0_304 = arith.constant 0 : index
    %778 = vector.load %arg5[%c0_303, %c0_304] : memref<64x32xf32, #tpu.memory_space<vmem>>, vector<64x32xf32>
    %cst_305 = arith.constant dense<0.000000e+00> : vector<4x32xf32>
    %779 = tpu.matmul %777, %778, %cst_305 {dimension_numbers = #tpu.dot_dimension_numbers<[1], [0], [0], [1], [0, 0, 1, 1], [], []>, precision = #tpu.contract_precision<fp32>} : vector<4x64xf32>, vector<64x32xf32>, vector<4x32xf32> -> vector<4x32xf32>
    %c0_306 = arith.constant 0 : index
    %c0_307 = arith.constant 0 : index
    %780 = vector.load %arg6[%c0_306, %c0_307] : memref<1x32xf32, #tpu.memory_space<vmem>>, vector<1x32xf32>
    %781 = vector.broadcast %780 : vector<1x32xf32> to vector<4x32xf32>
    %782 = arith.addf %779, %781 : vector<4x32xf32>
    %783 = math.tanh %782 : vector<4x32xf32>
    %c0_308 = arith.constant 0 : index
    %c0_309 = arith.constant 0 : index
    %784 = vector.load %arg8[%c0_308, %c0_309] : memref<4x32xf32, #tpu.memory_space<vmem>>, vector<4x32xf32>
    tpu.vector_store %arg8[%c0_308, %c0_309], %783 {strides = array<i32>} : memref<4x32xf32, #tpu.memory_space<vmem>>, vector<4x32xf32>,
    return
  }
}

</mosaic_0001>

<bundles_post_ra>
// kernel: encoder_forward.1
= control target key start
LH: loop header
LB: loop body
LE: loop exit
PB: predicated region body
PF: predicated region fallthrough
CT: control target
= control target key end

     0   :  { %14 = vsyncpa [#allocation5], 0  ;;  %vm46_vm0 = vcmask 261120   ;;  %s8626_s0 = inlined_call_operand.vmem [shape: f32[8,4,32], index: 0, kind: input, shape index: {}]   ;;  %s8627_s1 = inlined_call_operand.vmem [shape: f32[2,32,96], index: 1, kind: input, shape index: {}]   ;;  %s8628_s2 = inlined_call_operand.vmem [shape: f32[2,1,96], index: 2, kind: input, shape index: {}]   ;;  %s8629_s3 = inlined_call_operand.vmem [shape: f32[2,32,96], index: 3, kind: input, shape index: {}]   ;;  %s8630_s4 = inlined_call_operand.vmem [shape: f32[2,1,96], index: 4, kind: input, shape index: {}]   ;;  %s8631_s5 = inlined_call_operand.vmem [shape: f32[64,32], index: 5, kind: input, shape index: {}]   ;;  %s8632_s6 = inlined_call_operand.vmem [shape: f32[1,32], index: 6, kind: input, shape index: {}]   ;;  %s8633_s7 = inlined_call_operand.hbm [shape: f32[8,4,64], index: 7, kind: output, shape index: {0}]   ;;  %s8634_s8 = inlined_call_operand.hbm [shape: f32[4,32], index: 8, kind: output, shape index: {1}]  }
   0x1   :  { %v33_v0 = vld [vmem:[%s8627_s1 + $0x18] sm:$0xff]  ;;  %v32_v1 = vld [vmem:[%s8627_s1 + $0x10] sm:$0xff]  ;;  %v31_v2 = vld [vmem:[%s8627_s1 + $0x8] sm:$0xff] }
   0x2   :  { %v7066_v3 = vand.u32 4294901760, %v33_v0  ;;  %v7068_v4 = vand.u32 4294901760, %v32_v1  ;;  %v7070_v5 = vand.u32 4294901760, %v31_v2  ;;  %v30_v6 = vld [vmem:[%s8627_s1] sm:$0xff]  ;;  %v6859_v14 = vld [vmem:[%s8627_s1 + $0x38] sm:$0xff]  ;;  %v6858_v20 = vld [vmem:[%s8627_s1 + $0x30] sm:$0xff] }
   0x3   :  { %v42_v7 = vld [vmem:[%s8626_s0] sm:$0xf]  ;;  %v7078_v8 = vand.u32 4294901760, %v30_v6  ;;  %v7120_v22 = vand.u32 4294901760, %v6859_v14 }
   0x4   :  { %v48_v9 = vsel %vm46_vm0, %v42_v7, 0  ;;  %63 = vmatpush.msra.mxu2 %v7066_v3  ;;  %v7083_v10 = vsub.f32 %v33_v0, %v7066_v3  ;;  %v7088_v12 = vsub.f32 %v32_v1, %v7068_v4  ;;  %v7091_v13 = vsub.f32 %v31_v2, %v7070_v5  ;;  %223 = vmatpush.msra.mxu1 %v7066_v3 }
   0x5   :  { %v7085_v11 = vand.u32 4294901760, %v48_v9  ;;  %v7098_v15 = vsub.f32 %v30_v6, %v7078_v8 }
   0x6   :  { %65 = vmatpush.msra.mxu2 %v7068_v4  ;;  %v7102_v16 = vand.u32 4294901760, %v7083_v10  ;;  %v7108_v18 = vand.u32 4294901760, %v7088_v12  ;;  %v7111_v19 = vand.u32 4294901760, %v7091_v13  ;;  %225 = vmatpush.msra.mxu1 %v7068_v4 }
   0x7   :  { %v7105_v17 = vsub.f32 %v48_v9, %v7085_v11  ;;  %v7118_v21 = vand.u32 4294901760, %v7098_v15 }
   0x8   :  { %15 = vsyncpa [#allocation7], 0  ;;  %67 = vmatpush.msra.mxu2 %v7070_v5  ;;  %v94_v23 = vsub.f32 %v7083_v10, %v7102_v16  ;;  %v100_v25 = vsub.f32 %v7088_v12, %v7108_v18  ;;  %v106_v26 = vsub.f32 %v7091_v13, %v7111_v19  ;;  %192 = vmatpush.msra.mxu0 %v7102_v16  ;;  %v7133_v27 = vand.u32 4294901760, %v6858_v20  ;;  %v6857_v28 = vld [vmem:[%s8627_s1 + $0x28] sm:$0xff]  ;;  %v6856_v33 = vld [vmem:[%s8627_s1 + $0x20] sm:$0xff]  ;;  %s7007_s16 = smov 64  }
   0x9   :  { %v7126_v24 = vand.u32 4294901760, %v7105_v17  ;;  %227 = vmatpush.msra.mxu1 %v7070_v5  ;;  %v112_v32 = vsub.f32 %v7098_v15, %v7118_v21  ;;  %v7158_v36 = vsub.f32 %v6859_v14, %v7120_v22  ;;  %v7160_v37 = vand.u32 4294901760, %v6857_v28  ;;  %v6861_v41 = vld [vmem:[%s8626_s0 + $0x4] sm:$0xf]  ;;  %v6862_v62 = vld [vmem:[%s8626_s0 + $0x8] sm:$0xf] }
   0xa   :  { %69 = vmatpush.msra.mxu2 %v7078_v8  ;;  %v7140_v29 = vand.u32 4294901760, %v94_v23  ;;  %v7144_v31 = vand.u32 4294901760, %v100_v25  ;;  %196 = vmatpush.msra.mxu0 %v7108_v18  ;;  %v7155_v35 = vand.u32 4294901760, %v106_v26  ;;  %v7169_v39 = vsub.f32 %v6858_v20, %v7133_v27  ;;  %v6863_v9 = vld [vmem:[%s8626_s0 + $0xc] sm:$0xf]  ;;  %s7008_s17 = smov 96  }
   0xb   :  { %v73_v30 = vsub.f32 %v7105_v17, %v7126_v24  ;;  %229 = vmatpush.msra.mxu1 %v7078_v8  ;;  %v7166_v38 = vand.u32 4294901760, %v112_v32  ;;  %v7171_v40 = vand.u32 4294901760, %v6856_v33  ;;  %v7180_v42 = vand.u32 4294901760, %v7158_v36  ;;  %v6864_v25 = vld [vmem:[%s8626_s0 + $0x10] sm:$0xf]  ;;  %s7010_s15 = smov 4  }
   0xc   :  { %134 = vmatpush.msrb.mxu2 %v7083_v10  ;;  %96 = vmatpush.msra.mxu3 %v7140_v29  ;;  %v7183_v43 = vsub.f32 %v6857_v28, %v7160_v37  ;;  %v429_v44 = vsel %vm46_vm0, %v6861_v41, 0  ;;  %v7192_v45 = vand.u32 4294901760, %v7169_v39  ;;  %v808_v63 = vsel %vm46_vm0, %v6862_v62, 0  ;;  %v6865_v41 = vld [vmem:[%s8626_s0 + $0x14] sm:$0xf]  ;;  %s6842_s20 = sshll.u32 %s8634_s8, 4  ;;  %s6843_s20 = int_to_ptr.hbm [resolvable:$true] %s6842_s20 }
   0xd   :  { %v74_v34 = vand.u32 4294901760, %v73_v30  ;;  %200 = vmatpush.msra.mxu0 %v7111_v19  ;;  %231 = vmatmul.f32.vlgmr.msra.gmra.mxu1 %v7085_v11  ;;  %v7195_v46 = vsub.f32 %v6856_v33, %v7171_v40  ;;  %v284_v47 = vsub.f32 %v7158_v36, %v7180_v42  ;;  %v7206_v49 = vand.u32 4294901760, %v429_v44 }
   0xe   :  { %137 = vmatpush.msrb.mxu2 %v7088_v12  ;;  %102 = vmatpush.msra.mxu3 %v7144_v31  ;;  %v7204_v48 = vand.u32 4294901760, %v7183_v43  ;;  %v290_v50 = vsub.f32 %v7169_v39, %v7192_v45  ;;  %v7304_v0 = vand.u32 4294901760, %v808_v63  ;;  %v1566_v26 = vsel %vm46_vm0, %v6864_v25, 0 }
   0xf   :  { %75 = vmatmul.f32.vlgmr.msra.gmra.mxu2 %v74_v34  ;;  %204 = vmatpush.msra.mxu0 %v7118_v21  ;;  %v7215_v51 = vand.u32 4294901760, %v7195_v46  ;;  %v7220_v52 = vand.u32 4294901760, %v284_v47  ;;  %v7226_v54 = vsub.f32 %v429_v44, %v7206_v49  ;;  %v7448_v28 = vand.u32 4294901760, %v1566_v26  ;;  %v7523_v47 = vld [vmem:[%s8628_s2] ss:$0 sm:$0xff] }
  0x10   :  { %140 = vmatpush.msrb.mxu2 %v7091_v13  ;;  %108 = vmatpush.msra.mxu3 %v7155_v35  ;;  %v296_v53 = vsub.f32 %v7183_v43, %v7204_v48  ;;  %v7231_v55 = vand.u32 4294901760, %v290_v50  ;;  %v7315_v1 = vsub.f32 %v808_v63, %v7304_v0  ;;  %v1945_v44 = vsel %vm46_vm0, %v6865_v41, 0 }
  0x11   :  { %206 = vmatmul.f32.vlgmr.msra.gmra.mxu0 %v7085_v11  ;;  %353 = vmatpush.msrb.mxu1 %v7120_v22  ;;  %v302_v56 = vsub.f32 %v7195_v46, %v7215_v51  ;;  %v7243_v58 = vand.u32 4294901760, %v7226_v54  ;;  %v7459_v30 = vsub.f32 %v1566_v26, %v7448_v28  ;;  %v7525_v50 = vand.u32 4294901760, %v1945_v44 }
  0x12   :  { %143 = vmatpush.msrb.mxu2 %v7098_v15  ;;  %324 = vmatpush.msrb.mxu0 %v7158_v36  ;;  %v7239_v57 = vand.u32 4294901760, %v296_v53  ;;  %v7326_v2 = vand.u32 4294901760, %v7315_v1  ;;  %vm235_vm1 = vcmask 781312   ;;  %vm3527_vm2 = vcmask 519424  }
  0x13   :  { %114 = vmatpush.msra.mxu3 %v7166_v38  ;;  %355 = vmatpush.msrb.mxu1 %v7133_v27  ;;  %v7248_v59 = vand.u32 4294901760, %v302_v56  ;;  %v454_v60 = vsub.f32 %v7226_v54, %v7243_v58  ;;  %v7470_v32 = vand.u32 4294901760, %v7459_v30  ;;  %vm3524_vm3 = vcmask 257024  }
  0x14   :  { %253 = vmatpush.msra.mxu2 %v7120_v22  ;;  %116 = vmatmul.f32.vlgmr.msra.gmra.mxu3 %v7085_v11  ;;  %v833_v6 = vsub.f32 %v7315_v1, %v7326_v2  ;;  %vm6579_vm4 = vcmask 523264  }
  0x15   :  { %327 = vmatpush.msrb.mxu0 %v7169_v39  ;;  %163 = vmatpush.msrb.mxu3 %v7066_v3  ;;  %v455_v61 = vand.u32 4294901760, %v454_v60  ;;  %v1591_v33 = vsub.f32 %v7459_v30, %v7470_v32 }
  0x16   :  { %255 = vmatpush.msra.mxu2 %v7133_v27  ;;  %357 = vmatpush.msrb.mxu1 %v7160_v37  ;;  %v834_v7 = vand.u32 4294901760, %v833_v6 }
  0x17   :  { %330 = vmatpush.msrb.mxu0 %v7183_v43  ;;  %146 = vmatmul.f32.vlgmr.msrb.gmra.mxu2 %v7105_v17 }
  0x18   :  { %165 = vmatpush.msrb.mxu3 %v7068_v4  ;;  %257 = vmatpush.msra.mxu2 %v7160_v37 }
  0x19   :  { %333 = vmatpush.msrb.mxu0 %v7195_v46  ;;  %359 = vmatpush.msrb.mxu1 %v7171_v40 }
  0x1a   :  { %167 = vmatpush.msrb.mxu3 %v7070_v5  ;;  %259 = vmatpush.msra.mxu2 %v7171_v40 }
  0x1b   :  { %336 = vmatmul.f32.vlgmr.msrb.gmra.mxu0 %v7105_v17  ;;  %363 = vmatmul.f32.vlgmr.msrb.gmra.mxu1 %v7126_v24 }
  0x1c   :  { %169 = vmatpush.msrb.mxu3 %v7078_v8  ;;  %382 = vmatpush.msrb.mxu2 %v7180_v42 }
  0x1d   :  { %173 = vmatmul.f32.vlgmr.msrb.gmra.mxu3 %v7126_v24  ;;  %444 = vmatpush.msra.mxu0 %v7066_v3 }
  0x1e   :  { %286 = vmatpush.msra.mxu3 %v7220_v52  ;;  %386 = vmatpush.msrb.mxu2 %v7192_v45 }
  0x1f   :  { %265 = vmatmul.f32.vlgmr.msra.gmra.mxu2 %v74_v34  ;;  %446 = vmatpush.msra.mxu0 %v7068_v4  ;;  %v1592_v34 = vand.u32 4294901760, %v1591_v33 }
  0x20   :  { %292 = vmatpush.msra.mxu3 %v7231_v55  ;;  %390 = vmatpush.msrb.mxu2 %v7204_v48 }
  0x21   :  { %477 = vmatpush.msra.mxu1 %v7140_v29  ;;  %448 = vmatpush.msra.mxu0 %v7070_v5 }
  0x22   :  { %298 = vmatpush.msra.mxu3 %v7239_v57  ;;  %394 = vmatpush.msrb.mxu2 %v7215_v51 }
  0x23   :  { %483 = vmatpush.msra.mxu1 %v7144_v31  ;;  %450 = vmatpush.msra.mxu0 %v7078_v8 }
  0x24   :  { %304 = vmatpush.msra.mxu3 %v7248_v59  ;;  %515 = vmatpush.msra.mxu2 %v7083_v10 }
  0x25   :  { %306 = vmatmul.f32.vlgmr.msra.gmra.mxu3 %v7085_v11  ;;  %489 = vmatpush.msra.mxu1 %v7155_v35 }
  0x26   :  { %413 = vmatpush.msrb.mxu3 %v7120_v22  ;;  %518 = vmatpush.msra.mxu2 %v7088_v12 }
  0x27   :  { %396 = vmatmul.f32.vlgmr.msrb.gmra.mxu2 %v7085_v11  ;;  %456 = vmatmul.f32.vlgmr.msra.gmra.mxu0 %v455_v61 }
  0x28   :  { %415 = vmatpush.msrb.mxu3 %v7133_v27  ;;  %521 = vmatpush.msra.mxu2 %v7091_v13 }
  0x29   :  { %495 = vmatpush.msra.mxu1 %v7166_v38  ;;  %573 = vmatpush.msrb.mxu0 %v7102_v16 }
  0x2a   :  { %417 = vmatpush.msrb.mxu3 %v7160_v37  ;;  %524 = vmatpush.msra.mxu2 %v7098_v15 }
  0x2b   :  { %497 = vmatmul.f32.vlgmr.msra.gmra.mxu1 %v7206_v49  ;;  %577 = vmatpush.msrb.mxu0 %v7108_v18 }
  0x2c   :  { %419 = vmatpush.msrb.mxu3 %v7171_v40  ;;  %631 = vmatpush.msrb.mxu2 %v7120_v22 }
  0x2d   :  { %421 = vmatmul.f32.vlgmr.msrb.gmra.mxu3 %v7085_v11  ;;  %604 = vmatpush.msrb.mxu1 %v7066_v3  ;;  %v1187_v11 = vsel %vm46_vm0, %v6863_v9, 0 }
  0x2e   :  { %544 = vmatpush.msra.mxu3 %v7066_v3  ;;  %633 = vmatpush.msrb.mxu2 %v7133_v27  ;;  %v7376_v14 = vand.u32 4294901760, %v1187_v11 }
  0x2f   :  { %527 = vmatmul.f32.vlgmr.msra.gmra.mxu2 %v7226_v54  ;;  %581 = vmatpush.msrb.mxu0 %v7111_v19 }
  0x30   :  { %546 = vmatpush.msra.mxu3 %v7068_v4  ;;  %635 = vmatpush.msrb.mxu2 %v7160_v37  ;;  %v7387_v17 = vsub.f32 %v1187_v11, %v7376_v14 }
  0x31   :  { %606 = vmatpush.msrb.mxu1 %v7068_v4  ;;  %585 = vmatpush.msrb.mxu0 %v7118_v21 }
  0x32   :  { %548 = vmatpush.msra.mxu3 %v7070_v5  ;;  %637 = vmatpush.msrb.mxu2 %v7171_v40  ;;  %v7398_v20 = vand.u32 4294901760, %v7387_v17 }
  0x33   :  { %608 = vmatpush.msrb.mxu1 %v7070_v5  ;;  %587 = vmatmul.f32.vlgmr.msrb.gmra.mxu0 %v7206_v49 }
  0x34   :  { %550 = vmatpush.msra.mxu3 %v7078_v8  ;;  %760 = vmatpush.msra.mxu2 %v7180_v42  ;;  %v1212_v23 = vsub.f32 %v7387_v17, %v7398_v20 }
  0x35   :  { %554 = vmatmul.f32.vlgmr.msra.gmra.mxu3 %v7243_v58  ;;  %610 = vmatpush.msrb.mxu1 %v7078_v8 }
  0x36   :  { %664 = vmatpush.msrb.mxu3 %v7220_v52  ;;  %702 = vmatpush.msra.mxu0 %v7158_v36  ;;  %v1213_v24 = vand.u32 4294901760, %v1212_v23 }
  0x37   :  { %643 = vmatmul.f32.vlgmr.msrb.gmra.mxu2 %v455_v61  ;;  %612 = vmatmul.f32.vlgmr.msrb.gmra.mxu1 %v7206_v49 }
  0x38   :  { %670 = vmatpush.msrb.mxu3 %v7231_v55  ;;  %764 = vmatpush.msra.mxu2 %v7192_v45 }
  0x39   :  { %705 = vmatpush.msra.mxu0 %v7169_v39  ;;  %731 = vmatpush.msra.mxu1 %v7120_v22 }
  0x3a   :  { %676 = vmatpush.msrb.mxu3 %v7239_v57  ;;  %768 = vmatpush.msra.mxu2 %v7204_v48 }
  0x3b   :  { %708 = vmatpush.msra.mxu0 %v7183_v43  ;;  %733 = vmatpush.msra.mxu1 %v7133_v27 }
  0x3c   :  { %682 = vmatpush.msrb.mxu3 %v7248_v59  ;;  %772 = vmatpush.msra.mxu2 %v7215_v51 }
  0x3d   :  { %684 = vmatmul.f32.vlgmr.msrb.gmra.mxu3 %v7206_v49  ;;  %711 = vmatpush.msra.mxu0 %v7195_v46 }
  0x3e   :  { %791 = vmatpush.msra.mxu3 %v7120_v22  ;;  %735 = vmatpush.msra.mxu1 %v7160_v37 }
  0x3f   :  { %774 = vmatmul.f32.vlgmr.msra.gmra.mxu2 %v7206_v49  ;;  %714 = vmatmul.f32.vlgmr.msra.gmra.mxu0 %v7226_v54  ;;  %v7537_v54 = vsub.f32 %v1945_v44, %v7525_v50 }
  0x40   :  { %793 = vmatpush.msra.mxu3 %v7133_v27  ;;  %894 = vmatpush.msrb.mxu2 %v7083_v10 }
  0x41   :  { %737 = vmatpush.msra.mxu1 %v7171_v40  ;;  %823 = vmatpush.msrb.mxu0 %v7066_v3  ;;  %v7548_v61 = vand.u32 4294901760, %v7537_v54 }
  0x42   :  { %795 = vmatpush.msra.mxu3 %v7160_v37  ;;  %897 = vmatpush.msrb.mxu2 %v7088_v12 }
  0x43   :  { %741 = vmatmul.f32.vlgmr.msra.gmra.mxu1 %v7243_v58  ;;  %825 = vmatpush.msrb.mxu0 %v7068_v4 }
  0x44   :  { %797 = vmatpush.msra.mxu3 %v7171_v40  ;;  %856 = vmatpush.msrb.mxu1 %v7140_v29 }
  0x45   :  { %799 = vmatmul.f32.vlgmr.msra.gmra.mxu3 %v7206_v49  ;;  %900 = vmatpush.msrb.mxu2 %v7091_v13 }
  0x46   :  { %923 = vmatpush.msrb.mxu3 %v7066_v3  ;;  %827 = vmatpush.msrb.mxu0 %v7070_v5 }
  0x47   :  { %862 = vmatpush.msrb.mxu1 %v7144_v31  ;;  %903 = vmatpush.msrb.mxu2 %v7098_v15 }
  0x48   :  { %925 = vmatpush.msrb.mxu3 %v7068_v4  ;;  %829 = vmatpush.msrb.mxu0 %v7078_v8 }
  0x49   :  { %868 = vmatpush.msrb.mxu1 %v7155_v35  ;;  %906 = vmatmul.f32.vlgmr.msrb.gmra.mxu2 %v7315_v1 }
  0x4a   :  { %927 = vmatpush.msrb.mxu3 %v7070_v5  ;;  %1010 = vmatpush.msra.mxu2 %v7120_v22 }
  0x4b   :  { %835 = vmatmul.f32.vlgmr.msrb.gmra.mxu0 %v834_v7  ;;  %874 = vmatpush.msrb.mxu1 %v7166_v38 }
  0x4c   :  { %929 = vmatpush.msrb.mxu3 %v7078_v8  ;;  %952 = vmatpush.msra.mxu0 %v7102_v16 }
  0x4d   :  { %933 = vmatmul.f32.vlgmr.msrb.gmra.mxu3 %v7326_v2  ;;  %1012 = vmatpush.msra.mxu2 %v7133_v27 }
  0x4e   :  { %1043 = vmatpush.msra.mxu3 %v7220_v52  ;;  %876 = vmatmul.f32.vlgmr.msrb.gmra.mxu1 %v7304_v0 }
  0x4f   :  { %956 = vmatpush.msra.mxu0 %v7108_v18  ;;  %983 = vmatpush.msra.mxu1 %v7066_v3 }
  0x50   :  { %1014 = vmatpush.msra.mxu2 %v7160_v37  ;;  %1049 = vmatpush.msra.mxu3 %v7231_v55 }
  0x51   :  { %960 = vmatpush.msra.mxu0 %v7111_v19  ;;  %985 = vmatpush.msra.mxu1 %v7068_v4 }
  0x52   :  { %1016 = vmatpush.msra.mxu2 %v7171_v40  ;;  %1055 = vmatpush.msra.mxu3 %v7239_v57 }
  0x53   :  { %964 = vmatpush.msra.mxu0 %v7118_v21  ;;  %987 = vmatpush.msra.mxu1 %v7070_v5 }
  0x54   :  { %1022 = vmatmul.f32.vlgmr.msra.gmra.mxu2 %v834_v7  ;;  %1061 = vmatpush.msra.mxu3 %v7248_v59  ;;  %v7567_v7 = vld [vmem:[%s8628_s2 + $0x1] ss:$0 sm:$0xff] }
  0x55   :  { %1139 = vmatpush.msrb.mxu2 %v7180_v42  ;;  %966 = vmatmul.f32.vlgmr.msra.gmra.mxu0 %v7304_v0 }
  0x56   :  { %989 = vmatpush.msra.mxu1 %v7078_v8  ;;  %1063 = vmatmul.f32.vlgmr.msra.gmra.mxu3 %v7304_v0 }
  0x57   :  { %1081 = vmatpush.msrb.mxu0 %v7158_v36  ;;  %1143 = vmatpush.msrb.mxu2 %v7192_v45 }
  0x58   :  { %1170 = vmatpush.msrb.mxu3 %v7120_v22  ;;  %991 = vmatmul.f32.vlgmr.msra.gmra.mxu1 %v7304_v0 }
  0x59   :  { %1084 = vmatpush.msrb.mxu0 %v7169_v39  ;;  %1110 = vmatpush.msrb.mxu1 %v7120_v22 }
  0x5a   :  { %1147 = vmatpush.msrb.mxu2 %v7204_v48  ;;  %1172 = vmatpush.msrb.mxu3 %v7133_v27 }
  0x5b   :  { %1087 = vmatpush.msrb.mxu0 %v7183_v43  ;;  %1112 = vmatpush.msrb.mxu1 %v7133_v27 }
  0x5c   :  { %1151 = vmatpush.msrb.mxu2 %v7215_v51  ;;  %1174 = vmatpush.msrb.mxu3 %v7160_v37 }
  0x5d   :  { %1090 = vmatpush.msrb.mxu0 %v7195_v46  ;;  %1114 = vmatpush.msrb.mxu1 %v7160_v37 }
  0x5e   :  { %1153 = vmatmul.f32.vlgmr.msrb.gmra.mxu2 %v7304_v0  ;;  %1176 = vmatpush.msrb.mxu3 %v7171_v40 }
  0x5f   :  { %1273 = vmatpush.msra.mxu2 %v7083_v10  ;;  %1093 = vmatmul.f32.vlgmr.msrb.gmra.mxu0 %v7315_v1 }
  0x60   :  { %1116 = vmatpush.msrb.mxu1 %v7171_v40  ;;  %1178 = vmatmul.f32.vlgmr.msrb.gmra.mxu3 %v7304_v0  ;;  %v1970_v0 = vsub.f32 %v7537_v54, %v7548_v61 }
  0x61   :  { %1202 = vmatpush.msra.mxu0 %v7066_v3  ;;  %1276 = vmatpush.msra.mxu2 %v7088_v12 }
  0x62   :  { %1302 = vmatpush.msra.mxu3 %v7066_v3  ;;  %1120 = vmatmul.f32.vlgmr.msrb.gmra.mxu1 %v7326_v2  ;;  %v1971_v11 = vand.u32 4294901760, %v1970_v0 }
  0x63   :  { %1204 = vmatpush.msra.mxu0 %v7068_v4  ;;  %1235 = vmatpush.msra.mxu1 %v7140_v29 }
  0x64   :  { %1279 = vmatpush.msra.mxu2 %v7091_v13  ;;  %1304 = vmatpush.msra.mxu3 %v7068_v4 }
  0x65   :  { %1206 = vmatpush.msra.mxu0 %v7070_v5  ;;  %1241 = vmatpush.msra.mxu1 %v7144_v31 }
  0x66   :  { %1282 = vmatpush.msra.mxu2 %v7098_v15  ;;  %1306 = vmatpush.msra.mxu3 %v7070_v5 }
  0x67   :  { %1208 = vmatpush.msra.mxu0 %v7078_v8  ;;  %1247 = vmatpush.msra.mxu1 %v7155_v35 }
  0x68   :  { %1285 = vmatmul.f32.vlgmr.msra.gmra.mxu2 %v7387_v17  ;;  %1308 = vmatpush.msra.mxu3 %v7078_v8 }
  0x69   :  { %1389 = vmatpush.msrb.mxu2 %v7120_v22  ;;  %1214 = vmatmul.f32.vlgmr.msra.gmra.mxu0 %v1213_v24 }
  0x6a   :  { %1253 = vmatpush.msra.mxu1 %v7166_v38  ;;  %1312 = vmatmul.f32.vlgmr.msra.gmra.mxu3 %v7398_v20 }
  0x6b   :  { %1331 = vmatpush.msrb.mxu0 %v7102_v16  ;;  %1391 = vmatpush.msrb.mxu2 %v7133_v27 }
  0x6c   :  { %1422 = vmatpush.msrb.mxu3 %v7220_v52  ;;  %1255 = vmatmul.f32.vlgmr.msra.gmra.mxu1 %v7376_v14 }
  0x6d   :  { %1335 = vmatpush.msrb.mxu0 %v7108_v18  ;;  %1362 = vmatpush.msrb.mxu1 %v7066_v3 }
  0x6e   :  { %1393 = vmatpush.msrb.mxu2 %v7160_v37  ;;  %1428 = vmatpush.msrb.mxu3 %v7231_v55 }
  0x6f   :  { %1339 = vmatpush.msrb.mxu0 %v7111_v19  ;;  %1364 = vmatpush.msrb.mxu1 %v7068_v4 }
  0x70   :  { %1395 = vmatpush.msrb.mxu2 %v7171_v40  ;;  %1434 = vmatpush.msrb.mxu3 %v7239_v57 }
  0x71   :  { %1343 = vmatpush.msrb.mxu0 %v7118_v21  ;;  %1366 = vmatpush.msrb.mxu1 %v7070_v5 }
  0x72   :  { %1401 = vmatmul.f32.vlgmr.msrb.gmra.mxu2 %v1213_v24  ;;  %1440 = vmatpush.msrb.mxu3 %v7248_v59 }
  0x73   :  { %1518 = vmatpush.msra.mxu2 %v7180_v42  ;;  %1345 = vmatmul.f32.vlgmr.msrb.gmra.mxu0 %v7376_v14 }
  0x74   :  { %1368 = vmatpush.msrb.mxu1 %v7078_v8  ;;  %1442 = vmatmul.f32.vlgmr.msrb.gmra.mxu3 %v7376_v14 }
  0x75   :  { %1460 = vmatpush.msra.mxu0 %v7158_v36  ;;  %1522 = vmatpush.msra.mxu2 %v7192_v45 }
  0x76   :  { %1549 = vmatpush.msra.mxu3 %v7120_v22  ;;  %1370 = vmatmul.f32.vlgmr.msrb.gmra.mxu1 %v7376_v14 }
  0x77   :  { %1463 = vmatpush.msra.mxu0 %v7169_v39  ;;  %1489 = vmatpush.msra.mxu1 %v7120_v22 }
  0x78   :  { %1526 = vmatpush.msra.mxu2 %v7204_v48  ;;  %1551 = vmatpush.msra.mxu3 %v7133_v27 }
  0x79   :  { %1466 = vmatpush.msra.mxu0 %v7183_v43  ;;  %1491 = vmatpush.msra.mxu1 %v7133_v27 }
  0x7a   :  { %1530 = vmatpush.msra.mxu2 %v7215_v51  ;;  %1553 = vmatpush.msra.mxu3 %v7160_v37 }
  0x7b   :  { %1469 = vmatpush.msra.mxu0 %v7195_v46  ;;  %1493 = vmatpush.msra.mxu1 %v7160_v37 }
  0x7c   :  { %1532 = vmatmul.f32.vlgmr.msra.gmra.mxu2 %v7376_v14  ;;  %1555 = vmatpush.msra.mxu3 %v7171_v40 }
  0x7d   :  { %1652 = vmatpush.msrb.mxu2 %v7083_v10  ;;  %1472 = vmatmul.f32.vlgmr.msra.gmra.mxu0 %v7387_v17 }
  0x7e   :  { %1495 = vmatpush.msra.mxu1 %v7171_v40  ;;  %1557 = vmatmul.f32.vlgmr.msra.gmra.mxu3 %v7376_v14 }
  0x7f   :  { %1581 = vmatpush.msrb.mxu0 %v7066_v3  ;;  %1655 = vmatpush.msrb.mxu2 %v7088_v12 }
  0x80   :  { %1681 = vmatpush.msrb.mxu3 %v7066_v3  ;;  %1499 = vmatmul.f32.vlgmr.msra.gmra.mxu1 %v7398_v20 }
  0x81   :  { %1583 = vmatpush.msrb.mxu0 %v7068_v4  ;;  %1614 = vmatpush.msrb.mxu1 %v7140_v29 }
  0x82   :  { %1658 = vmatpush.msrb.mxu2 %v7091_v13  ;;  %1683 = vmatpush.msrb.mxu3 %v7068_v4 }
  0x83   :  { %1585 = vmatpush.msrb.mxu0 %v7070_v5  ;;  %1620 = vmatpush.msrb.mxu1 %v7144_v31 }
  0x84   :  { %1661 = vmatpush.msrb.mxu2 %v7098_v15  ;;  %1685 = vmatpush.msrb.mxu3 %v7070_v5 }
  0x85   :  { %1587 = vmatpush.msrb.mxu0 %v7078_v8  ;;  %1626 = vmatpush.msrb.mxu1 %v7155_v35 }
  0x86   :  { %1664 = vmatmul.f32.vlgmr.msrb.gmra.mxu2 %v7459_v30  ;;  %1687 = vmatpush.msrb.mxu3 %v7078_v8 }
  0x87   :  { %1768 = vmatpush.msra.mxu2 %v7120_v22  ;;  %1593 = vmatmul.f32.vlgmr.msrb.gmra.mxu0 %v1592_v34 }
  0x88   :  { %1632 = vmatpush.msrb.mxu1 %v7166_v38  ;;  %1691 = vmatmul.f32.vlgmr.msrb.gmra.mxu3 %v7470_v32 }
  0x89   :  { %1710 = vmatpush.msra.mxu0 %v7102_v16  ;;  %1770 = vmatpush.msra.mxu2 %v7133_v27 }
  0x8a   :  { %1801 = vmatpush.msra.mxu3 %v7220_v52  ;;  %1634 = vmatmul.f32.vlgmr.msrb.gmra.mxu1 %v7448_v28  ;;  %v232_v60 = vpop.f32.mrf.mxu1 }
  0x8b   :  { %1714 = vmatpush.msra.mxu0 %v7108_v18  ;;  %1741 = vmatpush.msra.mxu1 %v7066_v3 }
  0x8c   :  { %1772 = vmatpush.msra.mxu2 %v7160_v37  ;;  %1807 = vmatpush.msra.mxu3 %v7231_v55 }
  0x8d   :  { %1718 = vmatpush.msra.mxu0 %v7111_v19  ;;  %1743 = vmatpush.msra.mxu1 %v7068_v4 }
  0x8e   :  { %1774 = vmatpush.msra.mxu2 %v7171_v40  ;;  %1813 = vmatpush.msra.mxu3 %v7239_v57  ;;  %v207_v58 = vpop.f32.mrf.mxu0 }
  0x8f   :  { %1722 = vmatpush.msra.mxu0 %v7118_v21  ;;  %1745 = vmatpush.msra.mxu1 %v7070_v5 }
  0x90   :  { %1780 = vmatmul.f32.vlgmr.msra.gmra.mxu2 %v1592_v34  ;;  %1819 = vmatpush.msra.mxu3 %v7248_v59 }
  0x91   :  { %1897 = vmatpush.msrb.mxu2 %v7180_v42  ;;  %1724 = vmatmul.f32.vlgmr.msra.gmra.mxu0 %v7448_v28 }
  0x92   :  { %1747 = vmatpush.msra.mxu1 %v7078_v8  ;;  %v76_v49 = vpop.f32.mrf.mxu2  ;;  %1821 = vmatmul.f32.vlgmr.msra.gmra.mxu3 %v7448_v28 }
  0x93   :  { %1839 = vmatpush.msrb.mxu0 %v7158_v36  ;;  %1901 = vmatpush.msrb.mxu2 %v7192_v45  ;;  %v77_v53 = vadd.f32 %v7523_v47, %v76_v49 }
  0x94   :  { %1928 = vmatpush.msrb.mxu3 %v7120_v22  ;;  %1749 = vmatmul.f32.vlgmr.msra.gmra.mxu1 %v7448_v28 }
  0x95   :  { %1842 = vmatpush.msrb.mxu0 %v7169_v39  ;;  %1868 = vmatpush.msrb.mxu1 %v7120_v22 }
  0x96   :  { %1905 = vmatpush.msrb.mxu2 %v7204_v48  ;;  %1930 = vmatpush.msrb.mxu3 %v7133_v27 }
  0x97   :  { %1845 = vmatpush.msrb.mxu0 %v7183_v43  ;;  %v117_v56 = vpop.f32.mrf.mxu3  ;;  %1870 = vmatpush.msrb.mxu1 %v7133_v27 }
  0x98   :  { %1909 = vmatpush.msrb.mxu2 %v7215_v51  ;;  %1932 = vmatpush.msrb.mxu3 %v7160_v37  ;;  %v118_v62 = vadd.f32 %v117_v56, %v77_v53  ;;  %v337_v9 = vpop.f32.mrf.mxu0  ;;  %v364_v20 = vpop.f32.mrf.mxu1 }
  0x99   :  { %1848 = vmatpush.msrb.mxu0 %v7195_v46  ;;  %1872 = vmatpush.msrb.mxu1 %v7160_v37 }
  0x9a   :  { %1911 = vmatmul.f32.vlgmr.msrb.gmra.mxu2 %v7448_v28  ;;  %v147_v63 = vpop.f32.mrf.mxu2  ;;  %1934 = vmatpush.msrb.mxu3 %v7171_v40 }
  0x9b   :  { %2031 = vmatpush.msra.mxu2 %v7083_v10  ;;  %1851 = vmatmul.f32.vlgmr.msrb.gmra.mxu0 %v7459_v30  ;;  %v148_v1 = vadd.f32 %v147_v63, %v118_v62  ;;  %v6866_v30 = vld [vmem:[%s8626_s0 + $0x18] sm:$0xf] }
  0x9c   :  { %1874 = vmatpush.msrb.mxu1 %v7171_v40  ;;  %1936 = vmatmul.f32.vlgmr.msrb.gmra.mxu3 %v7448_v28  ;;  %v2324_v44 = vsel %vm46_vm0, %v6866_v30, 0 }
  0x9d   :  { %1960 = vmatpush.msra.mxu0 %v7066_v3  ;;  %2034 = vmatpush.msra.mxu2 %v7088_v12 }
  0x9e   :  { %2060 = vmatpush.msra.mxu3 %v7066_v3  ;;  %1878 = vmatmul.f32.vlgmr.msrb.gmra.mxu1 %v7470_v32 }
  0x9f   :  { %1962 = vmatpush.msra.mxu0 %v7068_v4  ;;  %1993 = vmatpush.msra.mxu1 %v7140_v29 }
  0xa0   :  { %v174_v2 = vpop.f32.mrf.mxu3  ;;  %2037 = vmatpush.msra.mxu2 %v7091_v13  ;;  %2062 = vmatpush.msra.mxu3 %v7068_v4 }
  0xa1   :  { %v175_v6 = vadd.f32 %v174_v2, %v148_v1  ;;  %1964 = vmatpush.msra.mxu0 %v7070_v5  ;;  %1999 = vmatpush.msra.mxu1 %v7144_v31 }
  0xa2   :  { %2040 = vmatpush.msra.mxu2 %v7098_v15  ;;  %v266_v17 = vpop.f32.mrf.mxu2  ;;  %2064 = vmatpush.msra.mxu3 %v7070_v5 }
  0xa3   :  { %v208_v14 = vadd.f32 %v207_v58, %v175_v6  ;;  %1966 = vmatpush.msra.mxu0 %v7078_v8  ;;  %2005 = vmatpush.msra.mxu1 %v7155_v35  ;;  %v267_v24 = vadd.f32 %v7567_v7, %v266_v17  ;;  %v7606_v58 = vand.u32 4294901760, %v2324_v44 }
  0xa4   :  { %2043 = vmatmul.f32.vlgmr.msra.gmra.mxu2 %v7537_v54  ;;  %2066 = vmatpush.msra.mxu3 %v7078_v8  ;;  %v457_v33 = vpop.f32.mrf.mxu0 }
  0xa5   :  { %v233_v23 = vadd.f32 %v232_v60, %v208_v14  ;;  %2147 = vmatpush.msrb.mxu2 %v7120_v22  ;;  %1972 = vmatmul.f32.vlgmr.msra.gmra.mxu0 %v1971_v11  ;;  %v458_v41 = vadd.f32 %v7523_v47, %v457_v33  ;;  %v7618_v0 = vsub.f32 %v2324_v44, %v7606_v58  ;;  %v6867_v44 = vld [vmem:[%s8626_s0 + $0x1c] sm:$0xf] }
  0xa6   :  { %2011 = vmatpush.msra.mxu1 %v7166_v38  ;;  %2070 = vmatmul.f32.vlgmr.msra.gmra.mxu3 %v7548_v61 }
  0xa7   :  { %236 = vst.msk [vmem:[#allocation2] sm:$0xf] %vm235_vm1, %v233_v23  ;;  %2089 = vmatpush.msrb.mxu0 %v7102_v16  ;;  %2149 = vmatpush.msrb.mxu2 %v7133_v27 }
  0xa8   :  { %v307_v25 = vpop.f32.mrf.mxu3  ;;  %2180 = vmatpush.msrb.mxu3 %v7220_v52  ;;  %2013 = vmatmul.f32.vlgmr.msra.gmra.mxu1 %v7525_v50  ;;  %v498_v49 = vpop.f32.mrf.mxu1 }
  0xa9   :  { %v308_v26 = vadd.f32 %v307_v25, %v267_v24  ;;  %2093 = vmatpush.msrb.mxu0 %v7108_v18  ;;  %2120 = vmatpush.msrb.mxu1 %v7066_v3  ;;  %v499_v62 = vadd.f32 %v498_v49, %v458_v41 }
  0xaa   :  { %2151 = vmatpush.msrb.mxu2 %v7160_v37  ;;  %v397_v32 = vpop.f32.mrf.mxu2  ;;  %2186 = vmatpush.msrb.mxu3 %v7231_v55 }
  0xab   :  { %v338_v28 = vadd.f32 %v337_v9, %v308_v26  ;;  %2097 = vmatpush.msrb.mxu0 %v7111_v19  ;;  %2122 = vmatpush.msrb.mxu1 %v7068_v4 }
  0xac   :  { %2153 = vmatpush.msrb.mxu2 %v7171_v40  ;;  %2192 = vmatpush.msrb.mxu3 %v7239_v57 }
  0xad   :  { %v365_v34 = vadd.f32 %v364_v20, %v338_v28  ;;  %2101 = vmatpush.msrb.mxu0 %v7118_v21  ;;  %2124 = vmatpush.msrb.mxu1 %v7070_v5 }
  0xae   :  { %2159 = vmatmul.f32.vlgmr.msrb.gmra.mxu2 %v1971_v11  ;;  %2198 = vmatpush.msrb.mxu3 %v7248_v59  ;;  %v7629_v11 = vand.u32 4294901760, %v7618_v0 }
  0xaf   :  { %v398_v53 = vadd.f32 %v397_v32, %v365_v34  ;;  %2276 = vmatpush.msra.mxu2 %v7180_v42  ;;  %2103 = vmatmul.f32.vlgmr.msrb.gmra.mxu0 %v7525_v50 }
  0xb0   :  { %v422_v56 = vpop.f32.mrf.mxu3  ;;  %2126 = vmatpush.msrb.mxu1 %v7078_v8  ;;  %2200 = vmatmul.f32.vlgmr.msrb.gmra.mxu3 %v7525_v50  ;;  %v588_v2 = vpop.f32.mrf.mxu0  ;;  %v2349_v23 = vsub.f32 %v7618_v0, %v7629_v11 }
  0xb1   :  { %v423_v60 = vadd.f32 %v422_v56, %v398_v53  ;;  %2218 = vmatpush.msra.mxu0 %v7158_v36  ;;  %2280 = vmatpush.msra.mxu2 %v7192_v45 }
  0xb2   :  { %2307 = vmatpush.msra.mxu3 %v7120_v22  ;;  %v528_v63 = vpop.f32.mrf.mxu2  ;;  %2128 = vmatmul.f32.vlgmr.msrb.gmra.mxu1 %v7525_v50  ;;  %v2350_v26 = vand.u32 4294901760, %v2349_v23 }
  0xb3   :  { %425 = vst.msk [vmem:[#allocation3] sm:$0xf] %vm235_vm1, %v423_v60  ;;  %2221 = vmatpush.msra.mxu0 %v7169_v39  ;;  %2247 = vmatpush.msra.mxu1 %v7120_v22  ;;  %v529_v1 = vadd.f32 %v528_v63, %v499_v62  ;;  %v2703_v60 = vsel %vm46_vm0, %v6867_v44, 0 }
  0xb4   :  { %2284 = vmatpush.msra.mxu2 %v7204_v48  ;;  %2309 = vmatpush.msra.mxu3 %v7133_v27  ;;  %v613_v9 = vpop.f32.mrf.mxu1 }
  0xb5   :  { %2224 = vmatpush.msra.mxu0 %v7183_v43  ;;  %2249 = vmatpush.msra.mxu1 %v7133_v27 }
  0xb6   :  { %2288 = vmatpush.msra.mxu2 %v7215_v51  ;;  %2311 = vmatpush.msra.mxu3 %v7160_v37 }
  0xb7   :  { %2227 = vmatpush.msra.mxu0 %v7195_v46  ;;  %2251 = vmatpush.msra.mxu1 %v7160_v37 }
  0xb8   :  { %v555_v6 = vpop.f32.mrf.mxu3  ;;  %2290 = vmatmul.f32.vlgmr.msra.gmra.mxu2 %v7525_v50  ;;  %2313 = vmatpush.msra.mxu3 %v7171_v40 }
  0xb9   :  { %v556_v14 = vadd.f32 %v555_v6, %v529_v1  ;;  %2410 = vmatpush.msrb.mxu2 %v7083_v10  ;;  %2230 = vmatmul.f32.vlgmr.msra.gmra.mxu0 %v7537_v54  ;;  %v7683_v1 = vand.u32 4294901760, %v2703_v60 }
  0xba   :  { %2253 = vmatpush.msra.mxu1 %v7171_v40  ;;  %v644_v20 = vpop.f32.mrf.mxu2  ;;  %2315 = vmatmul.f32.vlgmr.msra.gmra.mxu3 %v7525_v50 }
  0xbb   :  { %v589_v17 = vadd.f32 %v588_v2, %v556_v14  ;;  %2339 = vmatpush.msrb.mxu0 %v7066_v3  ;;  %2413 = vmatpush.msrb.mxu2 %v7088_v12  ;;  %v645_v25 = vadd.f32 %v7567_v7, %v644_v20  ;;  %v7694_v14 = vsub.f32 %v2703_v60, %v7683_v1  ;;  %v6869_v60 = vld [vmem:[%s8629_s3 + $0x28] sm:$0xff] }
  0xbc   :  { %2439 = vmatpush.msrb.mxu3 %v7066_v3  ;;  %2257 = vmatmul.f32.vlgmr.msra.gmra.mxu1 %v7548_v61  ;;  %v715_v54 = vpop.f32.mrf.mxu0 }
  0xbd   :  { %v614_v24 = vadd.f32 %v613_v9, %v589_v17  ;;  %2341 = vmatpush.msrb.mxu0 %v7068_v4  ;;  %2372 = vmatpush.msrb.mxu1 %v7140_v29 }
  0xbe   :  { %2416 = vmatpush.msrb.mxu2 %v7091_v13  ;;  %2441 = vmatpush.msrb.mxu3 %v7068_v4 }
  0xbf   :  { %617 = vst.msk [vmem:[#allocation2 + $0x4] sm:$0xf] %vm235_vm1, %v614_v24  ;;  %2343 = vmatpush.msrb.mxu0 %v7070_v5  ;;  %2378 = vmatpush.msrb.mxu1 %v7144_v31  ;;  %v7705_v24 = vand.u32 4294901760, %v7694_v14 }
  0xc0   :  { %v685_v50 = vpop.f32.mrf.mxu3  ;;  %2419 = vmatpush.msrb.mxu2 %v7098_v15  ;;  %2443 = vmatpush.msrb.mxu3 %v7070_v5  ;;  %v742_v28 = vpop.f32.mrf.mxu1 }
  0xc1   :  { %v686_v61 = vadd.f32 %v685_v50, %v645_v25  ;;  %2345 = vmatpush.msrb.mxu0 %v7078_v8  ;;  %2384 = vmatpush.msrb.mxu1 %v7155_v35 }
  0xc2   :  { %2422 = vmatmul.f32.vlgmr.msrb.gmra.mxu2 %v7618_v0  ;;  %2445 = vmatpush.msrb.mxu3 %v7078_v8  ;;  %v775_v33 = vpop.f32.mrf.mxu2 }
  0xc3   :  { %v716_v30 = vadd.f32 %v715_v54, %v686_v61  ;;  %2526 = vmatpush.msra.mxu2 %v7120_v22  ;;  %2351 = vmatmul.f32.vlgmr.msrb.gmra.mxu0 %v2350_v26 }
  0xc4   :  { %2390 = vmatpush.msrb.mxu1 %v7166_v38  ;;  %2449 = vmatmul.f32.vlgmr.msrb.gmra.mxu3 %v7629_v11 }
  0xc5   :  { %v743_v32 = vadd.f32 %v742_v28, %v716_v30  ;;  %2468 = vmatpush.msra.mxu0 %v7102_v16  ;;  %2528 = vmatpush.msra.mxu2 %v7133_v27 }
  0xc6   :  { %2559 = vmatpush.msra.mxu3 %v7220_v52  ;;  %2392 = vmatmul.f32.vlgmr.msrb.gmra.mxu1 %v7606_v58 }
  0xc7   :  { %v776_v34 = vadd.f32 %v775_v33, %v743_v32  ;;  %2472 = vmatpush.msra.mxu0 %v7108_v18  ;;  %2499 = vmatpush.msra.mxu1 %v7066_v3 }
  0xc8   :  { %v800_v41 = vpop.f32.mrf.mxu3  ;;  %2530 = vmatpush.msra.mxu2 %v7160_v37  ;;  %2565 = vmatpush.msra.mxu3 %v7231_v55  ;;  %v836_v53 = vpop.f32.mrf.mxu0 }
  0xc9   :  { %v801_v49 = vadd.f32 %v800_v41, %v776_v34  ;;  %2476 = vmatpush.msra.mxu0 %v7111_v19  ;;  %2501 = vmatpush.msra.mxu1 %v7068_v4  ;;  %v837_v56 = vadd.f32 %v7523_v47, %v836_v53 }
  0xca   :  { %2532 = vmatpush.msra.mxu2 %v7171_v40  ;;  %2571 = vmatpush.msra.mxu3 %v7239_v57 }
  0xcb   :  { %804 = vst.msk [vmem:[#allocation3 + $0x4] sm:$0xf] %vm235_vm1, %v801_v49  ;;  %2480 = vmatpush.msra.mxu0 %v7118_v21  ;;  %2503 = vmatpush.msra.mxu1 %v7070_v5  ;;  %v877_v62 = vpop.f32.mrf.mxu1  ;;  %v6870_v49 = vld [vmem:[%s8629_s3 + $0x30] sm:$0xff] }
  0xcc   :  { %2538 = vmatmul.f32.vlgmr.msra.gmra.mxu2 %v2350_v26  ;;  %2577 = vmatpush.msra.mxu3 %v7248_v59  ;;  %v878_v63 = vadd.f32 %v877_v62, %v837_v56  ;;  %v907_v2 = vpop.f32.mrf.mxu2 }
  0xcd   :  { %2655 = vmatpush.msrb.mxu2 %v7180_v42  ;;  %2482 = vmatmul.f32.vlgmr.msra.gmra.mxu0 %v7606_v58 }
  0xce   :  { %2505 = vmatpush.msra.mxu1 %v7078_v8  ;;  %2579 = vmatmul.f32.vlgmr.msra.gmra.mxu3 %v7606_v58  ;;  %v908_v6 = vadd.f32 %v907_v2, %v878_v63 }
  0xcf   :  { %2597 = vmatpush.msrb.mxu0 %v7158_v36  ;;  %2659 = vmatpush.msrb.mxu2 %v7192_v45 }
  0xd0   :  { %2686 = vmatpush.msrb.mxu3 %v7120_v22  ;;  %2507 = vmatmul.f32.vlgmr.msra.gmra.mxu1 %v7606_v58  ;;  %v934_v9 = vpop.f32.mrf.mxu3 }
  0xd1   :  { %2600 = vmatpush.msrb.mxu0 %v7169_v39  ;;  %2626 = vmatpush.msrb.mxu1 %v7120_v22  ;;  %v935_v17 = vadd.f32 %v934_v9, %v908_v6 }
  0xd2   :  { %2663 = vmatpush.msrb.mxu2 %v7204_v48  ;;  %2688 = vmatpush.msrb.mxu3 %v7133_v27  ;;  %v967_v20 = vpop.f32.mrf.mxu0 }
  0xd3   :  { %2603 = vmatpush.msrb.mxu0 %v7183_v43  ;;  %2628 = vmatpush.msrb.mxu1 %v7133_v27  ;;  %v968_v23 = vadd.f32 %v967_v20, %v935_v17 }
  0xd4   :  { %2667 = vmatpush.msrb.mxu2 %v7215_v51  ;;  %2690 = vmatpush.msrb.mxu3 %v7160_v37 }
  0xd5   :  { %2606 = vmatpush.msrb.mxu0 %v7195_v46  ;;  %2630 = vmatpush.msrb.mxu1 %v7160_v37  ;;  %v992_v25 = vpop.f32.mrf.mxu1 }
  0xd6   :  { %2669 = vmatmul.f32.vlgmr.msrb.gmra.mxu2 %v7606_v58  ;;  %2692 = vmatpush.msrb.mxu3 %v7171_v40  ;;  %v993_v50 = vadd.f32 %v992_v25, %v968_v23 }
  0xd7   :  { %2789 = vmatpush.msra.mxu2 %v7083_v10  ;;  %2609 = vmatmul.f32.vlgmr.msrb.gmra.mxu0 %v7618_v0  ;;  %v1023_v54 = vpop.f32.mrf.mxu2  ;;  %v2728_v10 = vsub.f32 %v7694_v14, %v7705_v24 }
  0xd8   :  { %2632 = vmatpush.msrb.mxu1 %v7171_v40  ;;  %2694 = vmatmul.f32.vlgmr.msrb.gmra.mxu3 %v7606_v58  ;;  %996 = vst.msk [vmem:[#allocation2 + $0x8] sm:$0xf] %vm235_vm1, %v993_v50  ;;  %v1024_v26 = vadd.f32 %v7567_v7, %v1023_v54 }
  0xd9   :  { %2718 = vmatpush.msra.mxu0 %v7066_v3  ;;  %2792 = vmatpush.msra.mxu2 %v7088_v12  ;;  %v1064_v0 = vpop.f32.mrf.mxu3  ;;  %v2729_v61 = vand.u32 4294901760, %v2728_v10 }
  0xda   :  { %2818 = vmatpush.msra.mxu3 %v7066_v3  ;;  %2636 = vmatmul.f32.vlgmr.msrb.gmra.mxu1 %v7629_v11  ;;  %v1065_v58 = vadd.f32 %v1064_v0, %v1024_v26 }
  0xdb   :  { %2720 = vmatpush.msra.mxu0 %v7068_v4  ;;  %2751 = vmatpush.msra.mxu1 %v7140_v29 }
  0xdc   :  { %2795 = vmatpush.msra.mxu2 %v7091_v13  ;;  %2820 = vmatpush.msra.mxu3 %v7068_v4  ;;  %v1094_v12 = vpop.f32.mrf.mxu0 }
  0xdd   :  { %2722 = vmatpush.msra.mxu0 %v7070_v5  ;;  %2757 = vmatpush.msra.mxu1 %v7144_v31  ;;  %v1095_v28 = vadd.f32 %v1094_v12, %v1065_v58 }
  0xde   :  { %2798 = vmatpush.msra.mxu2 %v7098_v15  ;;  %2822 = vmatpush.msra.mxu3 %v7070_v5  ;;  %v3082_v15 = vld [vmem:[%s8629_s3 + $0x18] sm:$0xff] }
  0xdf   :  { %2724 = vmatpush.msra.mxu0 %v7078_v8  ;;  %2763 = vmatpush.msra.mxu1 %v7155_v35  ;;  %v1121_v13 = vpop.f32.mrf.mxu1 }
  0xe0   :  { %2801 = vmatmul.f32.vlgmr.msra.gmra.mxu2 %v7694_v14  ;;  %2824 = vmatpush.msra.mxu3 %v7078_v8  ;;  %v1122_v29 = vadd.f32 %v1121_v13, %v1095_v28 }
  0xe1   :  { %2905 = vmatpush.msrb.mxu2 %v7120_v22  ;;  %v1154_v11 = vpop.f32.mrf.mxu2  ;;  %2730 = vmatmul.f32.vlgmr.msra.gmra.mxu0 %v2729_v61 }
  0xe2   :  { %2769 = vmatpush.msra.mxu1 %v7166_v38  ;;  %2828 = vmatmul.f32.vlgmr.msra.gmra.mxu3 %v7705_v24  ;;  %v1155_v31 = vadd.f32 %v1154_v11, %v1122_v29  ;;  %v3081_v38 = vld [vmem:[%s8629_s3 + $0x10] sm:$0xff] }
  0xe3   :  { %2847 = vmatpush.msrb.mxu0 %v7102_v16  ;;  %2907 = vmatpush.msrb.mxu2 %v7133_v27  ;;  %v1179_v35 = vpop.f32.mrf.mxu3  ;;  %v7748_v16 = vand.u32 4294901760, %v3082_v15 }
  0xe4   :  { %2938 = vmatpush.msrb.mxu3 %v7220_v52  ;;  %2771 = vmatmul.f32.vlgmr.msra.gmra.mxu1 %v7683_v1  ;;  %v1180_v30 = vadd.f32 %v1179_v35, %v1155_v31  ;;  %v3080_v52 = vld [vmem:[%s8629_s3 + $0x8] sm:$0xff]  ;;  %v7006_v31 = vmov 0.0  }
  0xe5   :  { %2851 = vmatpush.msrb.mxu0 %v7108_v18  ;;  %2878 = vmatpush.msrb.mxu1 %v7066_v3  ;;  %v7758_v3 = vand.u32 4294901760, %v3081_v38 }
  0xe6   :  { %2909 = vmatpush.msrb.mxu2 %v7160_v37  ;;  %2944 = vmatpush.msrb.mxu3 %v7231_v55  ;;  %1183 = vst.msk [vmem:[#allocation3 + $0x8] sm:$0xf] %vm235_vm1, %v1180_v30  ;;  %v1215_v18 = vpop.f32.mrf.mxu0  ;;  %v7768_v55 = vsub.f32 %v3082_v15, %v7748_v16 }
  0xe7   :  { %2855 = vmatpush.msrb.mxu0 %v7111_v19  ;;  %2880 = vmatpush.msrb.mxu1 %v7068_v4  ;;  %v1216_v32 = vadd.f32 %v7523_v47, %v1215_v18  ;;  %v3079_v19 = vld [vmem:[%s8629_s3] sm:$0xff]  ;;  %v7770_v4 = vand.u32 4294901760, %v3080_v52 }
  0xe8   :  { %2911 = vmatpush.msrb.mxu2 %v7171_v40  ;;  %2950 = vmatpush.msrb.mxu3 %v7239_v57  ;;  %v7782_v41 = vand.u32 4294901760, %v3079_v19 }
  0xe9   :  { %2859 = vmatpush.msrb.mxu0 %v7118_v21  ;;  %2882 = vmatpush.msrb.mxu1 %v7070_v5  ;;  %v1256_v33 = vpop.f32.mrf.mxu1  ;;  %v6871_v21 = vld [vmem:[%s8629_s3 + $0x38] sm:$0xff]  ;;  %v7780_v5 = vsub.f32 %v3081_v38, %v7758_v3  ;;  %v7792_v44 = vsub.f32 %v3080_v52, %v7770_v4 }
  0xea   :  { %2917 = vmatmul.f32.vlgmr.msrb.gmra.mxu2 %v2729_v61  ;;  %2956 = vmatpush.msrb.mxu3 %v7248_v59  ;;  %v1257_v57 = vadd.f32 %v1256_v33, %v1216_v32  ;;  %v7789_v59 = vand.u32 4294901760, %v7768_v55  ;;  %v7807_v56 = vsub.f32 %v3079_v19, %v7782_v41 }
  0xeb   :  { %3034 = vmatpush.msra.mxu2 %v7180_v42  ;;  %v1286_v34 = vpop.f32.mrf.mxu2  ;;  %2861 = vmatmul.f32.vlgmr.msrb.gmra.mxu0 %v7683_v1 }
  0xec   :  { %2884 = vmatpush.msrb.mxu1 %v7078_v8  ;;  %2958 = vmatmul.f32.vlgmr.msrb.gmra.mxu3 %v7683_v1  ;;  %v1287_v42 = vadd.f32 %v1286_v34, %v1257_v57  ;;  %v7794_v8 = vand.u32 4294901760, %v6871_v21  ;;  %v7838_v6 = vand.u32 4294901760, %v7807_v56 }
  0xed   :  { %2976 = vmatpush.msra.mxu0 %v7158_v36  ;;  %3038 = vmatpush.msra.mxu2 %v7192_v45  ;;  %v1313_v53 = vpop.f32.mrf.mxu3  ;;  %v7804_v45 = vand.u32 4294901760, %v7780_v5 }
  0xee   :  { %3065 = vmatpush.msra.mxu3 %v7120_v22  ;;  %2886 = vmatmul.f32.vlgmr.msrb.gmra.mxu1 %v7683_v1  ;;  %v1314_v36 = vadd.f32 %v1313_v53, %v1287_v42  ;;  %v7824_v63 = vsub.f32 %v6871_v21, %v7794_v8 }
  0xef   :  { %2979 = vmatpush.msra.mxu0 %v7169_v39  ;;  %3005 = vmatpush.msra.mxu1 %v7120_v22  ;;  %v7814_v39 = vand.u32 4294901760, %v6870_v49  ;;  %v3142_v22 = vsub.f32 %v7768_v55, %v7789_v59 }
  0xf0   :  { %3042 = vmatpush.msra.mxu2 %v7204_v48  ;;  %3067 = vmatpush.msra.mxu3 %v7133_v27  ;;  %v1346_v62 = vpop.f32.mrf.mxu0  ;;  %v7821_v48 = vand.u32 4294901760, %v7792_v44  ;;  %v7854_v50 = vand.u32 4294901760, %v7824_v63 }
  0xf1   :  { %2982 = vmatpush.msra.mxu0 %v7183_v43  ;;  %3007 = vmatpush.msra.mxu1 %v7133_v27  ;;  %v6868_v43 = vld [vmem:[%s8629_s3 + $0x20] sm:$0xff]  ;;  %v1347_v2 = vadd.f32 %v1346_v62, %v1314_v36  ;;  %v7831_v27 = vand.u32 4294901760, %v6869_v60  ;;  %v7843_v17 = vsub.f32 %v6870_v49, %v7814_v39  ;;  %v7849_v23 = vand.u32 4294901760, %v3142_v22 }
  0xf2   :  { %3046 = vmatpush.msra.mxu2 %v7215_v51  ;;  %3069 = vmatpush.msra.mxu3 %v7160_v37  ;;  %v3148_v51 = vsub.f32 %v7780_v5, %v7804_v45  ;;  %v3154_v25 = vsub.f32 %v7792_v44, %v7821_v48  ;;  %v3355_v61 = vsub.f32 %v7824_v63, %v7854_v50 }
  0xf3   :  { %2985 = vmatpush.msra.mxu0 %v7195_v46  ;;  %3009 = vmatpush.msra.mxu1 %v7160_v37  ;;  %v1371_v9 = vpop.f32.mrf.mxu1  ;;  %v7845_v46 = vand.u32 4294901760, %v6868_v43  ;;  %v7860_v26 = vsub.f32 %v6869_v60, %v7831_v27 }
  0xf4   :  { %3048 = vmatmul.f32.vlgmr.msra.gmra.mxu2 %v7683_v1  ;;  %3071 = vmatpush.msra.mxu3 %v7171_v40  ;;  %v1372_v20 = vadd.f32 %v1371_v9, %v1347_v2  ;;  %v7879_v12 = vand.u32 4294901760, %v3154_v25  ;;  %v7901_v35 = vand.u32 4294901760, %v3355_v61 }
  0xf5   :  { %3182 = vmatpush.msrb.mxu2 %v7768_v55  ;;  %v1402_v37 = vpop.f32.mrf.mxu2  ;;  %2988 = vmatmul.f32.vlgmr.msra.gmra.mxu0 %v7694_v14  ;;  %v3160_v14 = vsub.f32 %v7807_v56, %v7838_v6  ;;  %v7875_v0 = vsub.f32 %v6868_v43, %v7845_v46 }
  0xf6   :  { %3011 = vmatpush.msra.mxu1 %v7171_v40  ;;  %v1403_v54 = vadd.f32 %v7567_v7, %v1402_v37  ;;  %3073 = vmatmul.f32.vlgmr.msra.gmra.mxu3 %v7683_v1  ;;  %1375 = vst.msk [vmem:[#allocation2 + $0xc] sm:$0xf] %vm235_vm1, %v1372_v20  ;;  %v7865_v40 = vand.u32 4294901760, %v3148_v51  ;;  %v7872_v1 = vand.u32 4294901760, %v7843_v17 }
  0xf7   :  { %3111 = vmatpush.msrb.mxu0 %v7748_v16  ;;  %3185 = vmatpush.msrb.mxu2 %v7780_v5  ;;  %v1443_v10 = vpop.f32.mrf.mxu3  ;;  %v7890_v13 = vand.u32 4294901760, %v3160_v14  ;;  %v7897_v15 = vand.u32 4294901760, %v7875_v0 }
  0xf8   :  { %3211 = vmatpush.msrb.mxu3 %v7748_v16  ;;  %3015 = vmatmul.f32.vlgmr.msra.gmra.mxu1 %v7705_v24  ;;  %v1444_v58 = vadd.f32 %v1443_v10, %v1403_v54  ;;  %v7886_v24 = vand.u32 4294901760, %v7860_v26  ;;  %v3361_v11 = vsub.f32 %v7843_v17, %v7872_v1 }
  0xf9   :  { %3113 = vmatpush.msrb.mxu0 %v7758_v3  ;;  %3144 = vmatpush.msrb.mxu1 %v7849_v23  ;;  %v3373_v19 = vsub.f32 %v7875_v0, %v7897_v15 }
  0xfa   :  { %3188 = vmatpush.msrb.mxu2 %v7792_v44  ;;  %3213 = vmatpush.msrb.mxu3 %v7758_v3  ;;  %v1473_v28 = vpop.f32.mrf.mxu0  ;;  %v3367_v30 = vsub.f32 %v7860_v26, %v7886_v24  ;;  %v7911_v32 = vand.u32 4294901760, %v3361_v11 }
  0xfb   :  { %3115 = vmatpush.msrb.mxu0 %v7770_v4  ;;  %3150 = vmatpush.msrb.mxu1 %v7865_v40  ;;  %v1474_v29 = vadd.f32 %v1473_v28, %v1444_v58  ;;  %v7925_v42 = vand.u32 4294901760, %v3373_v19 }
  0xfc   :  { %3191 = vmatpush.msrb.mxu2 %v7807_v56  ;;  %3215 = vmatpush.msrb.mxu3 %v7770_v4  ;;  %v7919_v57 = vand.u32 4294901760, %v3367_v30 }
  0xfd   :  { %3117 = vmatpush.msrb.mxu0 %v7782_v41  ;;  %3156 = vmatpush.msrb.mxu1 %v7879_v12  ;;  %v1500_v38 = vpop.f32.mrf.mxu1 }
  0xfe   :  { %3194 = vmatmul.f32.vlgmr.msrb.gmra.mxu2 %v7006_v31  ;;  %3217 = vmatpush.msrb.mxu3 %v7782_v41  ;;  %v1501_v52 = vadd.f32 %v1500_v38, %v1474_v29 }
  0xff   :  { %3324 = vmatpush.msra.mxu2 %v7794_v8  ;;  %v1533_v18 = vpop.f32.mrf.mxu2  ;;  %3123 = vmatmul.f32.vlgmr.msrb.gmra.mxu0 %v7006_v31 }
 0x100   :  { %3162 = vmatpush.msrb.mxu1 %v7890_v13  ;;  %3221 = vmatmul.f32.vlgmr.msrb.gmra.mxu3 %v7006_v31  ;;  %v1534_v33 = vadd.f32 %v1533_v18, %v1501_v52 }
 0x101   :  { %3240 = vmatpush.msra.mxu0 %v7789_v59  ;;  %3326 = vmatpush.msra.mxu2 %v7814_v39  ;;  %v1558_v21 = vpop.f32.mrf.mxu3 }
 0x102   :  { %3357 = vmatpush.msra.mxu3 %v7901_v35  ;;  %3164 = vmatmul.f32.vlgmr.msrb.gmra.mxu1 %v7006_v31  ;;  %v1559_v34 = vadd.f32 %v1558_v21, %v1534_v33 }
 0x103   :  { %3244 = vmatpush.msra.mxu0 %v7804_v45  ;;  %3271 = vmatpush.msra.mxu1 %v7748_v16 }
 0x104   :  { %3328 = vmatpush.msra.mxu2 %v7831_v27  ;;  %3363 = vmatpush.msra.mxu3 %v7911_v32  ;;  %1562 = vst.msk [vmem:[#allocation3 + $0xc] sm:$0xf] %vm235_vm1, %v1559_v34  ;;  %v1594_v49 = vpop.f32.mrf.mxu0 }
 0x105   :  { %3248 = vmatpush.msra.mxu0 %v7821_v48  ;;  %3273 = vmatpush.msra.mxu1 %v7758_v3  ;;  %v1595_v53 = vadd.f32 %v7523_v47, %v1594_v49 }
 0x106   :  { %3330 = vmatpush.msra.mxu2 %v7845_v46  ;;  %3369 = vmatpush.msra.mxu3 %v7919_v57 }
 0x107   :  { %3252 = vmatpush.msra.mxu0 %v7838_v6  ;;  %3275 = vmatpush.msra.mxu1 %v7770_v4  ;;  %v1635_v36 = vpop.f32.mrf.mxu1 }
 0x108   :  { %3336 = vmatmul.f32.vlgmr.msra.gmra.mxu2 %v7006_v31  ;;  %3375 = vmatpush.msra.mxu3 %v7925_v42  ;;  %v1636_v60 = vadd.f32 %v1635_v36, %v1595_v53 }
 0x109   :  { %3453 = vmatpush.msrb.mxu2 %v7854_v50  ;;  %v1665_v62 = vpop.f32.mrf.mxu2  ;;  %3254 = vmatmul.f32.vlgmr.msra.gmra.mxu0 %v7006_v31 }
 0x10a   :  { %3277 = vmatpush.msra.mxu1 %v7782_v41  ;;  %3377 = vmatmul.f32.vlgmr.msra.gmra.mxu3 %v7006_v31  ;;  %v1666_v22 = vadd.f32 %v1665_v62, %v1636_v60 }
 0x10b   :  { %3395 = vmatpush.msrb.mxu0 %v7824_v63  ;;  %3457 = vmatpush.msrb.mxu2 %v7872_v1  ;;  %v1692_v43 = vpop.f32.mrf.mxu3 }
 0x10c   :  { %3484 = vmatpush.msrb.mxu3 %v7794_v8  ;;  %3279 = vmatmul.f32.vlgmr.msra.gmra.mxu1 %v7006_v31  ;;  %v1693_v2 = vadd.f32 %v1692_v43, %v1666_v22 }
 0x10d   :  { %3398 = vmatpush.msrb.mxu0 %v7843_v17  ;;  %3424 = vmatpush.msrb.mxu1 %v7794_v8 }
 0x10e   :  { %3461 = vmatpush.msrb.mxu2 %v7886_v24  ;;  %3486 = vmatpush.msrb.mxu3 %v7814_v39  ;;  %v1725_v51 = vpop.f32.mrf.mxu0 }
 0x10f   :  { %3401 = vmatpush.msrb.mxu0 %v7860_v26  ;;  %3426 = vmatpush.msrb.mxu1 %v7814_v39  ;;  %v1726_v9 = vadd.f32 %v1725_v51, %v1693_v2 }
 0x110   :  { %3465 = vmatpush.msrb.mxu2 %v7897_v15  ;;  %3488 = vmatpush.msrb.mxu3 %v7831_v27 }
 0x111   :  { %3467 = vmatmul.f32.vlgmr.msrb.gmra.mxu2 %v7006_v31  ;;  %3404 = vmatpush.msrb.mxu0 %v7875_v0  ;;  %v1750_v20 = vpop.f32.mrf.mxu1 }
 0x112   :  { %3428 = vmatpush.msrb.mxu1 %v7831_v27  ;;  %3490 = vmatpush.msrb.mxu3 %v7845_v46  ;;  %v1751_v37 = vadd.f32 %v1750_v20, %v1726_v9 }
 0x113   :  { %3407 = vmatmul.f32.vlgmr.msrb.gmra.mxu0 %v7006_v31  ;;  %v1781_v25 = vpop.f32.mrf.mxu2  ;;  %3492 = vmatmul.f32.vlgmr.msrb.gmra.mxu3 %v7006_v31 }
 0x114   :  { %3430 = vmatpush.msrb.mxu1 %v7845_v46  ;;  %v1782_v54 = vadd.f32 %v7567_v7, %v1781_v25  ;;  %1754 = vst.msk [vmem:[#allocation2 + $0x10] sm:$0xf] %vm235_vm1, %v1751_v37  ;;  %3616 = vmatpush.msra.mxu2 %v7768_v55 }
 0x115   :  { %3434 = vmatmul.f32.vlgmr.msrb.gmra.mxu1 %v7006_v31  ;;  %v1822_v14 = vpop.f32.mrf.mxu3  ;;  %3645 = vmatpush.msra.mxu3 %v7748_v16 }
 0x116   :  { %3578 = vmatpush.msra.mxu1 %v7849_v23  ;;  %v1823_v10 = vadd.f32 %v1822_v14, %v1782_v54  ;;  %3619 = vmatpush.msra.mxu2 %v7780_v5 }
 0x117   :  { %3545 = vmatpush.msra.mxu0 %v7748_v16  ;;  %3647 = vmatpush.msra.mxu3 %v7758_v3 }
 0x118   :  { %3584 = vmatpush.msra.mxu1 %v7865_v40  ;;  %v1852_v58 = vpop.f32.mrf.mxu0  ;;  %3622 = vmatpush.msra.mxu2 %v7792_v44 }
 0x119   :  { %3547 = vmatpush.msra.mxu0 %v7758_v3  ;;  %v1853_v61 = vadd.f32 %v1852_v58, %v1823_v10  ;;  %3649 = vmatpush.msra.mxu3 %v7770_v4 }
 0x11a   :  { %3590 = vmatpush.msra.mxu1 %v7879_v12  ;;  %3625 = vmatpush.msra.mxu2 %v7807_v56 }
 0x11b   :  { %3549 = vmatpush.msra.mxu0 %v7770_v4  ;;  %v1879_v28 = vpop.f32.mrf.mxu1  ;;  %3651 = vmatpush.msra.mxu3 %v7782_v41 }
 0x11c   :  { %3596 = vmatpush.msra.mxu1 %v7890_v13  ;;  %v1880_v29 = vadd.f32 %v1879_v28, %v1853_v61  ;;  %3760 = vmatpush.msrb.mxu2 %v7794_v8  ;;  %v6950_v28 = vld [vmem:[%s8628_s2] ss:$0 sm:$0xff] }
 0x11d   :  { %v1912_v11 = vpop.f32.mrf.mxu2  ;;  %3793 = vmatpush.msrb.mxu3 %v7901_v35  ;;  %3551 = vmatpush.msra.mxu0 %v7782_v41 }
 0x11e   :  { %3705 = vmatpush.msrb.mxu1 %v7748_v16  ;;  %v1913_v31 = vadd.f32 %v1912_v11, %v1880_v29  ;;  %3762 = vmatpush.msrb.mxu2 %v7814_v39 }
 0x11f   :  { %3799 = vmatpush.msrb.mxu3 %v7911_v32  ;;  %v1937_v38 = vpop.f32.mrf.mxu3  ;;  %3674 = vmatpush.msrb.mxu0 %v7789_v59 }
 0x120   :  { %3707 = vmatpush.msrb.mxu1 %v7758_v3  ;;  %v1938_v30 = vadd.f32 %v1937_v38, %v1913_v31  ;;  %3764 = vmatpush.msrb.mxu2 %v7831_v27 }
 0x121   :  { %3805 = vmatpush.msrb.mxu3 %v7919_v57  ;;  %3678 = vmatpush.msrb.mxu0 %v7804_v45 }
 0x122   :  { %3709 = vmatpush.msrb.mxu1 %v7770_v4  ;;  %1941 = vst.msk [vmem:[#allocation3 + $0x10] sm:$0xf] %vm235_vm1, %v1938_v30  ;;  %v1973_v52 = vpop.f32.mrf.mxu0  ;;  %3766 = vmatpush.msrb.mxu2 %v7845_v46 }
 0x123   :  { %3811 = vmatpush.msrb.mxu3 %v7925_v42  ;;  %v1974_v18 = vadd.f32 %v7523_v47, %v1973_v52  ;;  %3682 = vmatpush.msrb.mxu0 %v7821_v48 }
 0x124   :  { %3711 = vmatpush.msrb.mxu1 %v7782_v41 }
 0x125   :  { %v2014_v19 = vpop.f32.mrf.mxu1  ;;  %3686 = vmatpush.msrb.mxu0 %v7838_v6 }
 0x126   :  { %v2015_v33 = vadd.f32 %v2014_v19, %v1974_v18 }
 0x127   :  { %v2044_v21 = vpop.f32.mrf.mxu2 }
 0x128   :  { %v2045_v34 = vadd.f32 %v2044_v21, %v2015_v33 }
 0x129   :  { %v2071_v49 = vpop.f32.mrf.mxu3 }
 0x12a   :  { %v2072_v53 = vadd.f32 %v2071_v49, %v2045_v34 }
 0x12c   :  { %v2104_v36 = vpop.f32.mrf.mxu0 }
 0x12d   :  { %v2105_v60 = vadd.f32 %v2104_v36, %v2072_v53 }
 0x12f   :  { %v2129_v62 = vpop.f32.mrf.mxu1 }
 0x130   :  { %v2130_v22 = vadd.f32 %v2129_v62, %v2105_v60 }
 0x131   :  { %v2160_v43 = vpop.f32.mrf.mxu2 }
 0x132   :  { %v2161_v2 = vadd.f32 %v7567_v7, %v2160_v43  ;;  %2133 = vst.msk [vmem:[#allocation2 + $0x14] sm:$0xf] %vm235_vm1, %v2130_v22 }
 0x133   :  { %v2201_v47 = vpop.f32.mrf.mxu3 }
 0x134   :  { %v2202_v51 = vadd.f32 %v2201_v47, %v2161_v2 }
 0x136   :  { %v2231_v9 = vpop.f32.mrf.mxu0 }
 0x137   :  { %v2232_v20 = vadd.f32 %v2231_v9, %v2202_v51 }
 0x139   :  { %v2258_v37 = vpop.f32.mrf.mxu1 }
 0x13a   :  { %v2259_v25 = vadd.f32 %v2258_v37, %v2232_v20 }
 0x13b   :  { %v2291_v54 = vpop.f32.mrf.mxu2 }
 0x13c   :  { %v2292_v14 = vadd.f32 %v2291_v54, %v2259_v25 }
 0x13d   :  { %v2316_v10 = vpop.f32.mrf.mxu3 }
 0x13e   :  { %v2317_v58 = vadd.f32 %v2316_v10, %v2292_v14 }
 0x140   :  { %2320 = vst.msk [vmem:[#allocation3 + $0x14] sm:$0xf] %vm235_vm1, %v2317_v58  ;;  %v2352_v61 = vpop.f32.mrf.mxu0 }
 0x141   :  { %v2353_v29 = vadd.f32 %v6950_v28, %v2352_v61 }
 0x143   :  { %v2393_v11 = vpop.f32.mrf.mxu1 }
 0x144   :  { %v2394_v31 = vadd.f32 %v2393_v11, %v2353_v29 }
 0x145   :  { %v2423_v38 = vpop.f32.mrf.mxu2 }
 0x146   :  { %v2424_v30 = vadd.f32 %v2423_v38, %v2394_v31 }
 0x147   :  { %v2450_v52 = vpop.f32.mrf.mxu3 }
 0x148   :  { %v2451_v18 = vadd.f32 %v2450_v52, %v2424_v30  ;;  %v6951_v52 = vld [vmem:[%s8628_s2 + $0x1] ss:$0 sm:$0xff]  ;;  %s6828_s2 = sshll.u32 %s8633_s7, 4  ;;  %s7011_s7 = smov [#allocation6]   ;;  %s6829_s2 = int_to_ptr.hbm [resolvable:$true] %s6828_s2 }
 0x149   :  { %s6840_s18 = sshll.u32 %s7011_s7, 4  ;;  %s6841_s18 = int_to_ptr.vmem [resolvable:$true] %s6840_s18 }
 0x14a   :  { %v2483_v19 = vpop.f32.mrf.mxu0 }
 0x14b   :  { %v2484_v33 = vadd.f32 %v2483_v19, %v2451_v18 }
 0x14d   :  { %v2508_v21 = vpop.f32.mrf.mxu1 }
 0x14e   :  { %v2509_v34 = vadd.f32 %v2508_v21, %v2484_v33 }
 0x14f   :  { %v2539_v49 = vpop.f32.mrf.mxu2 }
 0x150   :  { %v2540_v53 = vadd.f32 %v7567_v7, %v2539_v49  ;;  %2512 = vst.msk [vmem:[#allocation2 + $0x18] sm:$0xf] %vm235_vm1, %v2509_v34 }
 0x151   :  { %v2580_v36 = vpop.f32.mrf.mxu3 }
 0x152   :  { %v2581_v60 = vadd.f32 %v2580_v36, %v2540_v53 }
 0x154   :  { %v2610_v62 = vpop.f32.mrf.mxu0 }
 0x155   :  { %v2611_v22 = vadd.f32 %v2610_v62, %v2581_v60  ;;  %v8012_v62 = vld [vmem:[%s8630_s4] ss:$0 sm:$0xff] }
 0x157   :  { %v2637_v43 = vpop.f32.mrf.mxu1 }
 0x158   :  { %v2638_v2 = vadd.f32 %v2637_v43, %v2611_v22 }
 0x159   :  { %v2670_v47 = vpop.f32.mrf.mxu2 }
 0x15a   :  { %v2671_v51 = vadd.f32 %v2670_v47, %v2638_v2 }
 0x15b   :  { %v2695_v9 = vpop.f32.mrf.mxu3 }
 0x15c   :  { %v2696_v20 = vadd.f32 %v2695_v9, %v2671_v51 }
 0x15e   :  { %2699 = vst.msk [vmem:[#allocation3 + $0x18] sm:$0xf] %vm235_vm1, %v2696_v20  ;;  %v2731_v37 = vpop.f32.mrf.mxu0 }
 0x15f   :  { %v2732_v25 = vadd.f32 %v6950_v28, %v2731_v37 }
 0x161   :  { %v2772_v54 = vpop.f32.mrf.mxu1 }
 0x162   :  { %v2773_v14 = vadd.f32 %v2772_v54, %v2732_v25 }
 0x163   :  { %v2802_v10 = vpop.f32.mrf.mxu2 }
 0x164   :  { %v2803_v7 = vadd.f32 %v2802_v10, %v2773_v14  ;;  %v8019_v10 = vld [vmem:[%s8630_s4 + $0x1] ss:$0 sm:$0xff] }
 0x165   :  { %v2829_v58 = vpop.f32.mrf.mxu3 }
 0x166   :  { %v2830_v61 = vadd.f32 %v2829_v58, %v2803_v7 }
 0x168   :  { %v2862_v29 = vpop.f32.mrf.mxu0 }
 0x169   :  { %v2863_v11 = vadd.f32 %v2862_v29, %v2830_v61 }
 0x16b   :  { %v2887_v31 = vpop.f32.mrf.mxu1 }
 0x16c   :  { %v2888_v38 = vadd.f32 %v2887_v31, %v2863_v11 }
 0x16d   :  { %v2918_v30 = vpop.f32.mrf.mxu2 }
 0x16e   :  { %v2919_v18 = vadd.f32 %v6951_v52, %v2918_v30  ;;  %2891 = vst.msk [vmem:[#allocation2 + $0x1c] sm:$0xf] %vm235_vm1, %v2888_v38 }
 0x16f   :  { %v2959_v19 = vpop.f32.mrf.mxu3 }
 0x170   :  { %v2960_v28 = vadd.f32 %v2959_v19, %v2919_v18 }
 0x172   :  { %v2989_v33 = vpop.f32.mrf.mxu0 }
 0x173   :  { %v2990_v21 = vadd.f32 %v2989_v33, %v2960_v28 }
 0x175   :  { %v3016_v34 = vpop.f32.mrf.mxu1 }
 0x176   :  { %v3017_v49 = vadd.f32 %v3016_v34, %v2990_v21  ;;  %v3091_v34 = vld [vmem:[#allocation2] sm:$0xf] }
 0x177   :  { %v3049_v53 = vpop.f32.mrf.mxu2 }
 0x178   :  { %v3050_v36 = vadd.f32 %v3049_v53, %v3017_v49 }
 0x179   :  { %v3074_v60 = vpop.f32.mrf.mxu3 }
 0x17a   :  { %v3075_v22 = vadd.f32 %v3074_v60, %v3050_v36 }
 0x17c   :  { %3078 = vst.msk [vmem:[#allocation3 + $0x1c] sm:$0xf] %vm235_vm1, %v3075_v22  ;;  %v3124_v43 = vpop.f32.mrf.mxu0 }
 0x17d   :  { %v3125_v2 = vadd.f32 %v8012_v62, %v3124_v43 }
 0x17f   :  { %v3165_v47 = vpop.f32.mrf.mxu1 }
 0x180   :  { %v3166_v51 = vadd.f32 %v3165_v47, %v3125_v2 }
 0x181   :  { %v3195_v9 = vpop.f32.mrf.mxu2 }
 0x182   :  { %v3196_v20 = vadd.f32 %v3195_v9, %v3166_v51 }
 0x183   :  { %v3222_v37 = vpop.f32.mrf.mxu3  ;;  %v3307_v36 = vld [vmem:[#allocation3 + $0x1c] sm:$0xf] }
 0x184   :  { %v3223_v25 = vadd.f32 %v3222_v37, %v3196_v20 }
 0x186   :  { %v3255_v54 = vpop.f32.mrf.mxu0 }
 0x187   :  { %v3256_v14 = vadd.f32 %v3255_v54, %v3223_v25 }
 0x189   :  { %v3280_v7 = vpop.f32.mrf.mxu1 }
 0x18a   :  { %v3281_v61 = vadd.f32 %v3280_v7, %v3256_v14 }
 0x18b   :  { %v3337_v58 = vpop.f32.mrf.mxu2 }
 0x18c   :  { %v3338_v29 = vadd.f32 %v8019_v10, %v3337_v58  ;;  %3289 = vrot.lane.b32.xlu0 %v3281_v61, %s7007_s16  ;;  %v3283_v49 = vadd.f32 %v3281_v61, %v3091_v34 }
 0x18d   :  { %v3378_v11 = vpop.f32.mrf.mxu3 }
 0x18e   :  { %v3379_v31 = vadd.f32 %v3378_v11, %v3338_v29  ;;  %v3284_v53 = vmul.f32 0.5, %v3283_v49 }
 0x190   :  { %v3408_v38 = vpop.f32.mrf.mxu0  ;;  %6884 = vtanh.f32 %v3284_v53 }
 0x191   :  { %v3409_v30 = vadd.f32 %v3408_v38, %v3379_v31 }
 0x192   :  { %v3435_v52 = vpop.f32.mrf.mxu1 }
 0x193   :  { %v3436_v18 = vadd.f32 %v3435_v52, %v3409_v30 }
 0x194   :  { %v3468_v19 = vpop.f32.mrf.mxu2 }
 0x195   :  { %v3469_v28 = vadd.f32 %v3468_v19, %v3436_v18 }
 0x196   :  { %v3493_v33 = vpop.f32.mrf.mxu3  ;;  %v6885_v22 = vpop.eup %6884 }
 0x197   :  { %v3494_v21 = vadd.f32 %v3493_v33, %v3469_v28  ;;  %v3286_v2 = vmul.f32 0.5, %v6885_v22 }
 0x199   :  { %3502 = vrot.lane.b32.xlu0 %v3494_v21, %s7007_s16  ;;  %v3496_v60 = vadd.f32 %v3494_v21, %v3307_v36  ;;  %v3287_v47 = vadd.f32 0.5, %v3286_v2 }
 0x19b   :  { %v3497_v43 = vmul.f32 0.5, %v3496_v60  ;;  %v3299_v38 = vsub.f32 1.0, %v3287_v47  ;;  %v3305_v52 = vmul.f32 0.0, %v3287_v47 }
 0x19d   :  { %6886 = vtanh.f32 %v3497_v43 }
 0x1a3   :  { %v6887_v20 = vpop.eup %6886 }
 0x1a4   :  { %v3499_v37 = vmul.f32 0.5, %v6887_v20 }
 0x1a6   :  { %v3500_v25 = vadd.f32 0.5, %v3499_v37 }
 0x1a8   :  { %v3512_v28 = vsub.f32 1.0, %v3500_v25  ;;  %v3518_v21 = vmul.f32 0.0, %v3500_v25 }
 0x1fe   :  { %v3290_v51 = vpop.permute.xlu0 %3289 }
 0x1ff   :  { %v3292_v9 = vmul.f32 %v3290_v51, %v3287_v47 }
 0x201   :  { %3294 = vrot.lane.b32.xlu1 %v3292_v9, %s7007_s16 }
 0x20b   :  { %v3503_v54 = vpop.permute.xlu0 %3502 }
 0x20c   :  { %v3505_v14 = vmul.f32 %v3503_v54, %v3500_v25 }
 0x20e   :  { %3507 = vrot.lane.b32.xlu1 %v3505_v14, %s7007_s16 }
 0x273   :  { %v3295_v7 = vpop.permute.xlu1 %3294 }
 0x274   :  { %v3297_v58 = vadd.f32 %v3295_v7, %v3091_v34 }
 0x276   :  { %6888 = vtanh.f32 %v3297_v58 }
 0x27c   :  { %v6889_v61 = vpop.eup %6888 }
 0x27d   :  { %3301 = vrot.lane.b32.xlu2 %v6889_v61, %s7008_s17 }
 0x280   :  { %v3508_v29 = vpop.permute.xlu1 %3507 }
 0x281   :  { %v3510_v11 = vadd.f32 %v3508_v29, %v3307_v36 }
 0x283   :  { %6890 = vtanh.f32 %v3510_v11 }
 0x289   :  { %v6891_v31 = vpop.eup %6890 }
 0x28a   :  { %3514 = vrot.lane.b32.xlu2 %v6891_v31, %s7008_s17 }
 0x2d7   :  { %v3302_v30 = vpop.permute.xlu2 %3301 }
 0x2d8   :  { %v3304_v18 = vmul.f32 %v3302_v30, %v3299_v38 }
 0x2da   :  { %v8028_v19 = vadd.f32 %v3305_v52, %v3304_v18 }
 0x2dc   :  { %3521 = vrot.lane.b32.xlu0 %v8028_v19, %s7008_s17 }
 0x2e4   :  { %v3515_v33 = vpop.permute.xlu2 %3514 }
 0x2e5   :  { %v3517_v34 = vmul.f32 %v3515_v33, %v3512_v28 }
 0x2e7   :  { %v8032_v49 = vadd.f32 %v3518_v21, %v3517_v34 }
 0x2e9   :  { %3743 = vrot.lane.b32.xlu1 %v8032_v49, %s7008_s17  ;;  %3528 = vst.msk [vmem:[#allocation4 + $0x1c] sm:$0xf] %vm3527_vm2, %v8032_v49 }
 0x34e   :  { %v3522_v53 = vpop.permute.xlu0 %3521 }
 0x34f   :  { %3525 = vst.msk [vmem:[#allocation4] sm:$0xf] %vm3524_vm3, %v3522_v53  ;;  %v3530_v36 = vsel %vm46_vm0, %v3522_v53, 0 }
 0x350   :  { %v3552_v60 = vand.u32 4294901760, %v3530_v36 }
 0x352   :  { %v3553_v22 = vsub.f32 %v3530_v36, %v3552_v60  ;;  %3598 = vmatmul.f32.vlgmr.msra.gmra.mxu1 %v3552_v60 }
 0x353   :  { %3860 = vmatpush.msra.mxu1 %v7794_v8 }
 0x354   :  { %v3554_v43 = vand.u32 4294901760, %v3553_v22  ;;  %3628 = vmatmul.f32.vlgmr.msra.gmra.mxu2 %v3553_v22 }
 0x355   :  { %3862 = vmatpush.msra.mxu1 %v7814_v39  ;;  %3889 = vmatpush.msra.mxu2 %v7854_v50 }
 0x356   :  { %v3555_v2 = vsub.f32 %v3553_v22, %v3554_v43  ;;  %3655 = vmatmul.f32.vlgmr.msra.gmra.mxu3 %v3554_v43 }
 0x357   :  { %3864 = vmatpush.msra.mxu1 %v7831_v27  ;;  %3920 = vmatpush.msra.mxu3 %v7794_v8 }
 0x358   :  { %v3556_v47 = vand.u32 4294901760, %v3555_v2  ;;  %3893 = vmatpush.msra.mxu2 %v7872_v1 }
 0x359   :  { %3866 = vmatpush.msra.mxu1 %v7845_v46  ;;  %3922 = vmatpush.msra.mxu3 %v7814_v39 }
 0x35a   :  { %3557 = vmatmul.f32.vlgmr.msra.gmra.mxu0 %v3556_v47  ;;  %3713 = vmatmul.f32.vlgmr.msrb.gmra.mxu1 %v3552_v60 }
 0x35b   :  { %v3744_v51 = vpop.permute.xlu1 %3743  ;;  %3831 = vmatpush.msra.mxu0 %v7824_v63  ;;  %3924 = vmatpush.msra.mxu3 %v7831_v27 }
 0x35c   :  { %v3745_v9 = vsel %vm46_vm0, %v3744_v51, 0  ;;  %3897 = vmatpush.msra.mxu2 %v7886_v24  ;;  %4013 = vmatpush.msrb.mxu1 %v7849_v23 }
 0x35d   :  { %v3767_v20 = vand.u32 4294901760, %v3745_v9  ;;  %3834 = vmatpush.msra.mxu0 %v7843_v17  ;;  %3926 = vmatpush.msra.mxu3 %v7845_v46 }
 0x35e   :  { %3901 = vmatpush.msra.mxu2 %v7897_v15  ;;  %4019 = vmatpush.msrb.mxu1 %v7865_v40 }
 0x35f   :  { %v3768_v37 = vsub.f32 %v3745_v9, %v3767_v20  ;;  %3813 = vmatmul.f32.vlgmr.msrb.gmra.mxu3 %v3767_v20  ;;  %3837 = vmatpush.msra.mxu0 %v7860_v26 }
 0x360   :  { %4025 = vmatpush.msrb.mxu1 %v7879_v12  ;;  %4080 = vmatpush.msrb.mxu3 %v7748_v16 }
 0x361   :  { %v3769_v25 = vand.u32 4294901760, %v3768_v37  ;;  %3840 = vmatpush.msra.mxu0 %v7875_v0 }
 0x362   :  { %3688 = vmatmul.f32.vlgmr.msrb.gmra.mxu0 %v3552_v60  ;;  %4031 = vmatpush.msrb.mxu1 %v7890_v13 }
 0x363   :  { %v3770_v54 = vsub.f32 %v3768_v37, %v3769_v25  ;;  %3870 = vmatmul.f32.vlgmr.msra.gmra.mxu1 %v3769_v25  ;;  %4082 = vmatpush.msrb.mxu3 %v7758_v3 }
 0x364   :  { %3980 = vmatpush.msrb.mxu0 %v7748_v16  ;;  %4140 = vmatpush.msra.mxu1 %v7748_v16 }
 0x365   :  { %v3771_v14 = vand.u32 4294901760, %v3770_v54  ;;  %4084 = vmatpush.msrb.mxu3 %v7770_v4 }
 0x366   :  { %3982 = vmatpush.msrb.mxu0 %v7758_v3  ;;  %4142 = vmatpush.msra.mxu1 %v7758_v3 }
 0x367   :  { %3772 = vmatmul.f32.vlgmr.msrb.gmra.mxu2 %v3771_v14  ;;  %3928 = vmatmul.f32.vlgmr.msra.gmra.mxu3 %v3767_v20 }
 0x368   :  { %4051 = vmatpush.msrb.mxu2 %v7768_v55  ;;  %4086 = vmatpush.msrb.mxu3 %v7782_v41 }
 0x369   :  { %3984 = vmatpush.msrb.mxu0 %v7770_v4  ;;  %4144 = vmatpush.msra.mxu1 %v7770_v4 }
 0x36a   :  { %3843 = vmatmul.f32.vlgmr.msra.gmra.mxu0 %v3768_v37  ;;  %4054 = vmatpush.msrb.mxu2 %v7780_v5  ;;  %v3529_v37 = vld [vmem:[#allocation2 + $0x4] sm:$0xf] }
 0x36b   :  { %3986 = vmatpush.msrb.mxu0 %v7782_v41  ;;  %4146 = vmatpush.msra.mxu1 %v7782_v41 }
 0x36c   :  { %4057 = vmatpush.msrb.mxu2 %v7792_v44  ;;  %4228 = vmatpush.msra.mxu3 %v7901_v35 }
 0x36d   :  { %4109 = vmatpush.msra.mxu0 %v7789_v59 }
 0x36e   :  { %4060 = vmatpush.msrb.mxu2 %v7807_v56  ;;  %4234 = vmatpush.msra.mxu3 %v7911_v32 }
 0x36f   :  { %4113 = vmatpush.msra.mxu0 %v7804_v45  ;;  %3903 = vmatmul.f32.vlgmr.msra.gmra.mxu2 %v3767_v20 }
 0x370   :  { %4195 = vmatpush.msra.mxu2 %v7794_v8  ;;  %4240 = vmatpush.msra.mxu3 %v7919_v57 }
 0x371   :  { %4117 = vmatpush.msra.mxu0 %v7821_v48 }
 0x372   :  { %4197 = vmatpush.msra.mxu2 %v7814_v39  ;;  %4246 = vmatpush.msra.mxu3 %v7925_v42 }
 0x373   :  { %4121 = vmatpush.msra.mxu0 %v7838_v6 }
 0x374   :  { %4199 = vmatpush.msra.mxu2 %v7831_v27 }
 0x376   :  { %4201 = vmatpush.msra.mxu2 %v7845_v46 }
 0x3cf   :  { %v3599_v7 = vpop.f32.mrf.mxu1 }
 0x3d7   :  { %v3558_v58 = vpop.f32.mrf.mxu0  ;;  %v3629_v11 = vpop.f32.mrf.mxu2 }
 0x3d8   :  { %v3559_v61 = vadd.f32 %v8012_v62, %v3558_v58  ;;  %v3714_v28 = vpop.f32.mrf.mxu1 }
 0x3d9   :  { %v3656_v38 = vpop.f32.mrf.mxu3 }
 0x3da   :  { %v3600_v29 = vadd.f32 %v3599_v7, %v3559_v61 }
 0x3dc   :  { %v3630_v31 = vadd.f32 %v3629_v11, %v3600_v29  ;;  %v3741_v11 = vld [vmem:[#allocation3 + $0x18] sm:$0xf] }
 0x3de   :  { %v3657_v30 = vadd.f32 %v3656_v38, %v3630_v31 }
 0x3df   :  { %v3689_v52 = vpop.f32.mrf.mxu0 }
 0x3e0   :  { %v3690_v18 = vadd.f32 %v3689_v52, %v3657_v30  ;;  %v3871_v43 = vpop.f32.mrf.mxu1 }
 0x3e2   :  { %v3715_v33 = vadd.f32 %v3714_v28, %v3690_v18  ;;  %v3814_v21 = vpop.f32.mrf.mxu3 }
 0x3e4   :  { %3723 = vrot.lane.b32.xlu2 %v3715_v33, %s7007_s16  ;;  %v3717_v25 = vadd.f32 %v3715_v33, %v3529_v37 }
 0x3e6   :  { %v3718_v54 = vmul.f32 0.5, %v3717_v25 }
 0x3e7   :  { %v3844_v60 = vpop.f32.mrf.mxu0 }
 0x3e8   :  { %6892 = vtanh.f32 %v3718_v54 }
 0x3ea   :  { %v3773_v34 = vpop.f32.mrf.mxu2  ;;  %v3929_v9 = vpop.f32.mrf.mxu3 }
 0x3eb   :  { %v3774_v53 = vadd.f32 %v8019_v10, %v3773_v34 }
 0x3ed   :  { %v3815_v36 = vadd.f32 %v3814_v21, %v3774_v53 }
 0x3ee   :  { %v6893_v14 = vpop.eup %6892 }
 0x3ef   :  { %v3845_v22 = vadd.f32 %v3844_v60, %v3815_v36  ;;  %v3720_v7 = vmul.f32 0.5, %v6893_v14 }
 0x3f1   :  { %v3872_v2 = vadd.f32 %v3871_v43, %v3845_v22  ;;  %v3721_v58 = vadd.f32 0.5, %v3720_v7 }
 0x3f2   :  { %v3904_v47 = vpop.f32.mrf.mxu2 }
 0x3f3   :  { %v3905_v51 = vadd.f32 %v3904_v47, %v3872_v2  ;;  %v3733_v43 = vsub.f32 1.0, %v3721_v58  ;;  %v3739_v47 = vmul.f32 %v3721_v58, %v8028_v19 }
 0x3f5   :  { %v3930_v20 = vadd.f32 %v3929_v9, %v3905_v51 }
 0x3f7   :  { %3938 = vrot.lane.b32.xlu0 %v3930_v20, %s7007_s16  ;;  %v3932_v31 = vadd.f32 %v3930_v20, %v3741_v11 }
 0x3f9   :  { %v3933_v38 = vmul.f32 0.5, %v3932_v31 }
 0x3fb   :  { %6894 = vtanh.f32 %v3933_v38 }
 0x401   :  { %v6895_v30 = vpop.eup %6894 }
 0x402   :  { %v3935_v52 = vmul.f32 0.5, %v6895_v30 }
 0x404   :  { %v3936_v18 = vadd.f32 0.5, %v3935_v52 }
 0x406   :  { %v3948_v20 = vsub.f32 1.0, %v3936_v18  ;;  %v3954_v25 = vmul.f32 %v3936_v18, %v8032_v49 }
 0x43e   :  { %v3724_v61 = vpop.permute.xlu2 %3723 }
 0x43f   :  { %v3726_v29 = vmul.f32 %v3724_v61, %v3721_v58 }
 0x441   :  { %3728 = vrot.lane.b32.xlu1 %v3726_v29, %s7007_s16 }
 0x469   :  { %v3939_v28 = vpop.permute.xlu0 %3938 }
 0x46a   :  { %v3941_v21 = vmul.f32 %v3939_v28, %v3936_v18 }
 0x46c   :  { %3943 = vrot.lane.b32.xlu2 %v3941_v21, %s7007_s16 }
 0x4b3   :  { %v3729_v33 = vpop.permute.xlu1 %3728 }
 0x4b4   :  { %v3731_v34 = vadd.f32 %v3729_v33, %v3529_v37 }
 0x4b6   :  { %6896 = vtanh.f32 %v3731_v34 }
 0x4bc   :  { %v6897_v53 = vpop.eup %6896 }
 0x4bd   :  { %3735 = vrot.lane.b32.xlu0 %v6897_v53, %s7008_s17 }
 0x4c6   :  { %v3944_v36 = vpop.permute.xlu2 %3943 }
 0x4c7   :  { %v3946_v60 = vadd.f32 %v3944_v36, %v3741_v11 }
 0x4c9   :  { %6898 = vtanh.f32 %v3946_v60 }
 0x4cf   :  { %v6899_v22 = vpop.eup %6898 }
 0x4d0   :  { %3950 = vrot.lane.b32.xlu1 %v6899_v22, %s7008_s17 }
 0x52f   :  { %v3736_v2 = vpop.permute.xlu0 %3735 }
 0x530   :  { %v3738_v51 = vmul.f32 %v3736_v2, %v3733_v43 }
 0x532   :  { %v8098_v9 = vadd.f32 %v3739_v47, %v3738_v51 }
 0x534   :  { %3957 = vrot.lane.b32.xlu2 %v8098_v9, %s7008_s17 }
 0x542   :  { %v3951_v37 = vpop.permute.xlu1 %3950 }
 0x543   :  { %v3953_v54 = vmul.f32 %v3951_v37, %v3948_v20 }
 0x545   :  { %v8103_v14 = vadd.f32 %v3954_v25, %v3953_v54 }
 0x547   :  { %4178 = vrot.lane.b32.xlu0 %v8103_v14, %s7008_s17  ;;  %3963 = vst.msk [vmem:[#allocation4 + $0x18] sm:$0xf] %vm3527_vm2, %v8103_v14 }
 0x58e   :  { %v3958_v19 = vpop.permute.xlu2 %3957 }
 0x58f   :  { %3961 = vst.msk [vmem:[#allocation4 + $0x4] sm:$0xf] %vm3524_vm3, %v3958_v19  ;;  %v3965_v7 = vsel %vm46_vm0, %v3958_v19, 0 }
 0x590   :  { %v3987_v58 = vand.u32 4294901760, %v3965_v7 }
 0x592   :  { %v3988_v61 = vsub.f32 %v3965_v7, %v3987_v58  ;;  %4033 = vmatmul.f32.vlgmr.msrb.gmra.mxu1 %v3987_v58 }
 0x593   :  { %4295 = vmatpush.msrb.mxu1 %v7794_v8 }
 0x594   :  { %v3989_v49 = vand.u32 4294901760, %v3988_v61  ;;  %4063 = vmatmul.f32.vlgmr.msrb.gmra.mxu2 %v3988_v61 }
 0x595   :  { %4297 = vmatpush.msrb.mxu1 %v7814_v39  ;;  %4324 = vmatpush.msrb.mxu2 %v7854_v50 }
 0x596   :  { %v3990_v29 = vsub.f32 %v3988_v61, %v3989_v49  ;;  %4090 = vmatmul.f32.vlgmr.msrb.gmra.mxu3 %v3989_v49 }
 0x597   :  { %4299 = vmatpush.msrb.mxu1 %v7831_v27  ;;  %4355 = vmatpush.msrb.mxu3 %v7794_v8 }
 0x598   :  { %v3991_v11 = vand.u32 4294901760, %v3990_v29  ;;  %4328 = vmatpush.msrb.mxu2 %v7872_v1 }
 0x599   :  { %4301 = vmatpush.msrb.mxu1 %v7845_v46  ;;  %4357 = vmatpush.msrb.mxu3 %v7814_v39 }
 0x59a   :  { %3992 = vmatmul.f32.vlgmr.msrb.gmra.mxu0 %v3991_v11  ;;  %4148 = vmatmul.f32.vlgmr.msra.gmra.mxu1 %v3987_v58 }
 0x59b   :  { %4266 = vmatpush.msrb.mxu0 %v7824_v63  ;;  %4359 = vmatpush.msrb.mxu3 %v7831_v27 }
 0x59c   :  { %4332 = vmatpush.msrb.mxu2 %v7886_v24  ;;  %4448 = vmatpush.msra.mxu1 %v7849_v23 }
 0x59d   :  { %4269 = vmatpush.msrb.mxu0 %v7843_v17  ;;  %4361 = vmatpush.msrb.mxu3 %v7845_v46 }
 0x59e   :  { %4336 = vmatpush.msrb.mxu2 %v7897_v15  ;;  %4454 = vmatpush.msra.mxu1 %v7865_v40 }
 0x59f   :  { %4272 = vmatpush.msrb.mxu0 %v7860_v26 }
 0x5a0   :  { %4460 = vmatpush.msra.mxu1 %v7879_v12 }
 0x5a1   :  { %4275 = vmatpush.msrb.mxu0 %v7875_v0 }
 0x5a2   :  { %4123 = vmatmul.f32.vlgmr.msra.gmra.mxu0 %v3987_v58  ;;  %4466 = vmatpush.msra.mxu1 %v7890_v13 }
 0x5a3   :  { %4415 = vmatpush.msra.mxu0 %v7748_v16 }
 0x5a5   :  { %4417 = vmatpush.msra.mxu0 %v7758_v3 }
 0x5a7   :  { %4419 = vmatpush.msra.mxu0 %v7770_v4 }
 0x5a9   :  { %4421 = vmatpush.msra.mxu0 %v7782_v41 }
 0x5b9   :  { %v4179_v31 = vpop.permute.xlu0 %4178 }
 0x5ba   :  { %v4180_v38 = vsel %vm46_vm0, %v4179_v31, 0 }
 0x5bb   :  { %v4202_v30 = vand.u32 4294901760, %v4180_v38 }
 0x5bd   :  { %v4203_v52 = vsub.f32 %v4180_v38, %v4202_v30  ;;  %4248 = vmatmul.f32.vlgmr.msra.gmra.mxu3 %v4202_v30 }
 0x5be   :  { %4515 = vmatpush.msra.mxu3 %v7748_v16 }
 0x5bf   :  { %v4204_v18 = vand.u32 4294901760, %v4203_v52  ;;  %4278 = vmatmul.f32.vlgmr.msrb.gmra.mxu0 %v4203_v52 }
 0x5c0   :  { %4517 = vmatpush.msra.mxu3 %v7758_v3  ;;  %4544 = vmatpush.msrb.mxu0 %v7789_v59 }
 0x5c1   :  { %v4205_v28 = vsub.f32 %v4203_v52, %v4204_v18  ;;  %4305 = vmatmul.f32.vlgmr.msrb.gmra.mxu1 %v4204_v18  ;;  %v3964_v52 = vld [vmem:[#allocation2 + $0x8] sm:$0xf] }
 0x5c2   :  { %4519 = vmatpush.msra.mxu3 %v7770_v4  ;;  %4575 = vmatpush.msrb.mxu1 %v7748_v16 }
 0x5c3   :  { %v4206_v21 = vand.u32 4294901760, %v4205_v28  ;;  %4548 = vmatpush.msrb.mxu0 %v7804_v45 }
 0x5c4   :  { %4521 = vmatpush.msra.mxu3 %v7782_v41  ;;  %4577 = vmatpush.msrb.mxu1 %v7758_v3 }
 0x5c5   :  { %4207 = vmatmul.f32.vlgmr.msra.gmra.mxu2 %v4206_v21  ;;  %4363 = vmatmul.f32.vlgmr.msrb.gmra.mxu3 %v4202_v30 }
 0x5c6   :  { %4486 = vmatpush.msra.mxu2 %v7768_v55  ;;  %4579 = vmatpush.msrb.mxu1 %v7770_v4 }
 0x5c7   :  { %4552 = vmatpush.msrb.mxu0 %v7821_v48  ;;  %4663 = vmatpush.msrb.mxu3 %v7901_v35 }
 0x5c8   :  { %4489 = vmatpush.msra.mxu2 %v7780_v5  ;;  %4581 = vmatpush.msrb.mxu1 %v7782_v41 }
 0x5c9   :  { %4556 = vmatpush.msrb.mxu0 %v7838_v6  ;;  %4669 = vmatpush.msrb.mxu3 %v7911_v32 }
 0x5ca   :  { %4492 = vmatpush.msra.mxu2 %v7792_v44 }
 0x5cb   :  { %4675 = vmatpush.msrb.mxu3 %v7919_v57 }
 0x5cc   :  { %4495 = vmatpush.msra.mxu2 %v7807_v56 }
 0x5cd   :  { %4338 = vmatmul.f32.vlgmr.msrb.gmra.mxu2 %v4202_v30  ;;  %4681 = vmatpush.msrb.mxu3 %v7925_v42 }
 0x5ce   :  { %4630 = vmatpush.msrb.mxu2 %v7794_v8 }
 0x5d0   :  { %4632 = vmatpush.msrb.mxu2 %v7814_v39 }
 0x5d2   :  { %4634 = vmatpush.msrb.mxu2 %v7831_v27 }
 0x5d4   :  { %4636 = vmatpush.msrb.mxu2 %v7845_v46 }
 0x60f   :  { %v4034_v33 = vpop.f32.mrf.mxu1 }
 0x617   :  { %v3993_v34 = vpop.f32.mrf.mxu0  ;;  %v4064_v60 = vpop.f32.mrf.mxu2 }
 0x618   :  { %v3994_v53 = vadd.f32 %v8012_v62, %v3993_v34  ;;  %v4149_v20 = vpop.f32.mrf.mxu1 }
 0x619   :  { %v4091_v43 = vpop.f32.mrf.mxu3 }
 0x61a   :  { %v4035_v36 = vadd.f32 %v4034_v33, %v3994_v53 }
 0x61c   :  { %v4065_v22 = vadd.f32 %v4064_v60, %v4035_v36  ;;  %v4176_v60 = vld [vmem:[#allocation3 + $0x14] sm:$0xf] }
 0x61e   :  { %v4092_v2 = vadd.f32 %v4091_v43, %v4065_v22 }
 0x61f   :  { %v4124_v47 = vpop.f32.mrf.mxu0 }
 0x620   :  { %v4125_v51 = vadd.f32 %v4124_v47, %v4092_v2 }
 0x622   :  { %v4150_v37 = vadd.f32 %v4149_v20, %v4125_v51 }
 0x624   :  { %4158 = vrot.lane.b32.xlu1 %v4150_v37, %s7007_s16  ;;  %v4152_v18 = vadd.f32 %v4150_v37, %v3964_v52 }
 0x626   :  { %v4153_v28 = vmul.f32 0.5, %v4152_v18 }
 0x628   :  { %6900 = vtanh.f32 %v4153_v28 }
 0x62e   :  { %v6901_v21 = vpop.eup %6900 }
 0x62f   :  { %v4155_v33 = vmul.f32 0.5, %v6901_v21 }
 0x631   :  { %v4156_v34 = vadd.f32 0.5, %v4155_v33 }
 0x63c   :  { %v4279_v58 = vpop.f32.mrf.mxu0 }
 0x63e   :  { %v4306_v49 = vpop.f32.mrf.mxu1 }
 0x640   :  { %v4249_v25 = vpop.f32.mrf.mxu3 }
 0x648   :  { %v4208_v54 = vpop.f32.mrf.mxu2  ;;  %v4364_v38 = vpop.f32.mrf.mxu3 }
 0x649   :  { %v4209_v19 = vadd.f32 %v8019_v10, %v4208_v54 }
 0x64b   :  { %v4250_v7 = vadd.f32 %v4249_v25, %v4209_v19 }
 0x64d   :  { %v4280_v61 = vadd.f32 %v4279_v58, %v4250_v7 }
 0x64f   :  { %v4307_v29 = vadd.f32 %v4306_v49, %v4280_v61  ;;  %v4168_v49 = vsub.f32 1.0, %v4156_v34 }
 0x650   :  { %v4339_v11 = vpop.f32.mrf.mxu2 }
 0x651   :  { %v4340_v31 = vadd.f32 %v4339_v11, %v4307_v29  ;;  %v4174_v11 = vmul.f32 %v4156_v34, %v8098_v9 }
 0x653   :  { %v4365_v30 = vadd.f32 %v4364_v38, %v4340_v31 }
 0x655   :  { %4373 = vrot.lane.b32.xlu2 %v4365_v30, %s7007_s16  ;;  %v4367_v22 = vadd.f32 %v4365_v30, %v4176_v60 }
 0x657   :  { %v4368_v43 = vmul.f32 0.5, %v4367_v22 }
 0x659   :  { %6902 = vtanh.f32 %v4368_v43 }
 0x65f   :  { %v6903_v2 = vpop.eup %6902 }
 0x660   :  { %v4370_v47 = vmul.f32 0.5, %v6903_v2 }
 0x662   :  { %v4371_v51 = vadd.f32 0.5, %v4370_v47 }
 0x664   :  { %v4383_v30 = vsub.f32 1.0, %v4371_v51  ;;  %v4389_v18 = vmul.f32 %v4371_v51, %v8103_v14 }
 0x696   :  { %v4159_v53 = vpop.permute.xlu1 %4158 }
 0x697   :  { %v4161_v36 = vmul.f32 %v4159_v53, %v4156_v34 }
 0x699   :  { %4163 = vrot.lane.b32.xlu0 %v4161_v36, %s7007_s16 }
 0x6af   :  { %v4374_v20 = vpop.permute.xlu2 %4373 }
 0x6b0   :  { %v4376_v25 = vmul.f32 %v4374_v20, %v4371_v51 }
 0x6b2   :  { %4378 = vrot.lane.b32.xlu1 %v4376_v25, %s7007_s16 }
 0x70b   :  { %v4164_v37 = vpop.permute.xlu0 %4163 }
 0x70c   :  { %v4166_v54 = vadd.f32 %v4164_v37, %v3964_v52 }
 0x70e   :  { %6904 = vtanh.f32 %v4166_v54 }
 0x714   :  { %v6905_v19 = vpop.eup %6904 }
 0x715   :  { %4170 = vrot.lane.b32.xlu2 %v6905_v19, %s7008_s17 }
 0x724   :  { %v4379_v7 = vpop.permute.xlu1 %4378 }
 0x725   :  { %v4381_v58 = vadd.f32 %v4379_v7, %v4176_v60 }
 0x727   :  { %6906 = vtanh.f32 %v4381_v58 }
 0x72d   :  { %v6907_v61 = vpop.eup %6906 }
 0x72e   :  { %4385 = vrot.lane.b32.xlu0 %v6907_v61, %s7008_s17 }
 0x76f   :  { %v4171_v29 = vpop.permute.xlu2 %4170 }
 0x770   :  { %v4173_v31 = vmul.f32 %v4171_v29, %v4168_v49 }
 0x772   :  { %v8169_v38 = vadd.f32 %v4174_v11, %v4173_v31 }
 0x774   :  { %4392 = vrot.lane.b32.xlu1 %v8169_v38, %s7008_s17 }
 0x7a0   :  { %v4386_v52 = vpop.permute.xlu0 %4385 }
 0x7a1   :  { %v4388_v28 = vmul.f32 %v4386_v52, %v4383_v30 }
 0x7a3   :  { %v8174_v21 = vadd.f32 %v4389_v18, %v4388_v28 }
 0x7a5   :  { %4613 = vrot.lane.b32.xlu2 %v8174_v21, %s7008_s17  ;;  %4398 = vst.msk [vmem:[#allocation4 + $0x14] sm:$0xf] %vm3527_vm2, %v8174_v21 }
 0x7e6   :  { %v4393_v9 = vpop.permute.xlu1 %4392 }
 0x7e7   :  { %4396 = vst.msk [vmem:[#allocation4 + $0x8] sm:$0xf] %vm3524_vm3, %v4393_v9  ;;  %v4400_v33 = vsel %vm46_vm0, %v4393_v9, 0 }
 0x7e8   :  { %v4422_v34 = vand.u32 4294901760, %v4400_v33 }
 0x7ea   :  { %v4423_v53 = vsub.f32 %v4400_v33, %v4422_v34  ;;  %4468 = vmatmul.f32.vlgmr.msra.gmra.mxu1 %v4422_v34 }
 0x7eb   :  { %4730 = vmatpush.msra.mxu1 %v7794_v8 }
 0x7ec   :  { %v4424_v14 = vand.u32 4294901760, %v4423_v53  ;;  %4498 = vmatmul.f32.vlgmr.msra.gmra.mxu2 %v4423_v53 }
 0x7ed   :  { %4732 = vmatpush.msra.mxu1 %v7814_v39  ;;  %4759 = vmatpush.msra.mxu2 %v7854_v50 }
 0x7ee   :  { %v4425_v36 = vsub.f32 %v4423_v53, %v4424_v14  ;;  %4525 = vmatmul.f32.vlgmr.msra.gmra.mxu3 %v4424_v14 }
 0x7ef   :  { %4734 = vmatpush.msra.mxu1 %v7831_v27  ;;  %4790 = vmatpush.msra.mxu3 %v7794_v8 }
 0x7f0   :  { %v4426_v60 = vand.u32 4294901760, %v4425_v36  ;;  %4763 = vmatpush.msra.mxu2 %v7872_v1 }
 0x7f1   :  { %4736 = vmatpush.msra.mxu1 %v7845_v46  ;;  %4792 = vmatpush.msra.mxu3 %v7814_v39 }
 0x7f2   :  { %4427 = vmatmul.f32.vlgmr.msra.gmra.mxu0 %v4426_v60  ;;  %4583 = vmatmul.f32.vlgmr.msrb.gmra.mxu1 %v4422_v34 }
 0x7f3   :  { %4701 = vmatpush.msra.mxu0 %v7824_v63  ;;  %4794 = vmatpush.msra.mxu3 %v7831_v27 }
 0x7f4   :  { %4767 = vmatpush.msra.mxu2 %v7886_v24  ;;  %4883 = vmatpush.msrb.mxu1 %v7849_v23 }
 0x7f5   :  { %4704 = vmatpush.msra.mxu0 %v7843_v17  ;;  %4796 = vmatpush.msra.mxu3 %v7845_v46 }
 0x7f6   :  { %4771 = vmatpush.msra.mxu2 %v7897_v15  ;;  %4889 = vmatpush.msrb.mxu1 %v7865_v40 }
 0x7f7   :  { %4707 = vmatpush.msra.mxu0 %v7860_v26 }
 0x7f8   :  { %4895 = vmatpush.msrb.mxu1 %v7879_v12 }
 0x7f9   :  { %4710 = vmatpush.msra.mxu0 %v7875_v0 }
 0x7fa   :  { %4558 = vmatmul.f32.vlgmr.msrb.gmra.mxu0 %v4422_v34  ;;  %4901 = vmatpush.msrb.mxu1 %v7890_v13 }
 0x7fb   :  { %4850 = vmatpush.msrb.mxu0 %v7748_v16 }
 0x7fd   :  { %4852 = vmatpush.msrb.mxu0 %v7758_v3 }
 0x7ff   :  { %v4614_v22 = vpop.permute.xlu2 %4613  ;;  %4854 = vmatpush.msrb.mxu0 %v7770_v4 }
 0x800   :  { %v4615_v43 = vsel %vm46_vm0, %v4614_v22, 0 }
 0x801   :  { %v4637_v2 = vand.u32 4294901760, %v4615_v43  ;;  %4856 = vmatpush.msrb.mxu0 %v7782_v41 }
 0x803   :  { %v4638_v47 = vsub.f32 %v4615_v43, %v4637_v2  ;;  %4683 = vmatmul.f32.vlgmr.msrb.gmra.mxu3 %v4637_v2 }
 0x804   :  { %4950 = vmatpush.msrb.mxu3 %v7748_v16 }
 0x805   :  { %v4639_v51 = vand.u32 4294901760, %v4638_v47  ;;  %4713 = vmatmul.f32.vlgmr.msra.gmra.mxu0 %v4638_v47 }
 0x806   :  { %4952 = vmatpush.msrb.mxu3 %v7758_v3  ;;  %4979 = vmatpush.msra.mxu0 %v7789_v59 }
 0x807   :  { %v4640_v20 = vsub.f32 %v4638_v47, %v4639_v51  ;;  %4740 = vmatmul.f32.vlgmr.msra.gmra.mxu1 %v4639_v51 }
 0x808   :  { %4954 = vmatpush.msrb.mxu3 %v7770_v4  ;;  %5010 = vmatpush.msra.mxu1 %v7748_v16 }
 0x809   :  { %v4641_v25 = vand.u32 4294901760, %v4640_v20  ;;  %4983 = vmatpush.msra.mxu0 %v7804_v45 }
 0x80a   :  { %4956 = vmatpush.msrb.mxu3 %v7782_v41  ;;  %5012 = vmatpush.msra.mxu1 %v7758_v3 }
 0x80b   :  { %4642 = vmatmul.f32.vlgmr.msrb.gmra.mxu2 %v4641_v25  ;;  %4798 = vmatmul.f32.vlgmr.msra.gmra.mxu3 %v4637_v2 }
 0x80c   :  { %4921 = vmatpush.msrb.mxu2 %v7768_v55  ;;  %5014 = vmatpush.msra.mxu1 %v7770_v4 }
 0x80d   :  { %4987 = vmatpush.msra.mxu0 %v7821_v48  ;;  %5098 = vmatpush.msra.mxu3 %v7901_v35 }
 0x80e   :  { %4924 = vmatpush.msrb.mxu2 %v7780_v5  ;;  %5016 = vmatpush.msra.mxu1 %v7782_v41 }
 0x80f   :  { %4991 = vmatpush.msra.mxu0 %v7838_v6  ;;  %5104 = vmatpush.msra.mxu3 %v7911_v32 }
 0x810   :  { %4927 = vmatpush.msrb.mxu2 %v7792_v44 }
 0x811   :  { %5110 = vmatpush.msra.mxu3 %v7919_v57 }
 0x812   :  { %4930 = vmatpush.msrb.mxu2 %v7807_v56 }
 0x813   :  { %4773 = vmatmul.f32.vlgmr.msra.gmra.mxu2 %v4637_v2  ;;  %5116 = vmatpush.msra.mxu3 %v7925_v42  ;;  %v4399_v2 = vld [vmem:[#allocation2 + $0xc] sm:$0xf] }
 0x814   :  { %5065 = vmatpush.msra.mxu2 %v7794_v8 }
 0x816   :  { %5067 = vmatpush.msra.mxu2 %v7814_v39 }
 0x818   :  { %5069 = vmatpush.msra.mxu2 %v7831_v27 }
 0x81a   :  { %5071 = vmatpush.msra.mxu2 %v7845_v46 }
 0x867   :  { %v4469_v37 = vpop.f32.mrf.mxu1 }
 0x86f   :  { %v4428_v54 = vpop.f32.mrf.mxu0  ;;  %v4499_v58 = vpop.f32.mrf.mxu2 }
 0x870   :  { %v4429_v19 = vadd.f32 %v8012_v62, %v4428_v54  ;;  %v4584_v30 = vpop.f32.mrf.mxu1 }
 0x871   :  { %v4526_v49 = vpop.f32.mrf.mxu3 }
 0x872   :  { %v4470_v7 = vadd.f32 %v4469_v37, %v4429_v19  ;;  %v4611_v19 = vld [vmem:[#allocation3 + $0x10] sm:$0xf] }
 0x874   :  { %v4500_v61 = vadd.f32 %v4499_v58, %v4470_v7 }
 0x876   :  { %v4527_v29 = vadd.f32 %v4526_v49, %v4500_v61 }
 0x877   :  { %v4559_v11 = vpop.f32.mrf.mxu0 }
 0x878   :  { %v4560_v31 = vadd.f32 %v4559_v11, %v4527_v29 }
 0x87a   :  { %v4585_v52 = vadd.f32 %v4584_v30, %v4560_v31 }
 0x87c   :  { %4593 = vrot.lane.b32.xlu0 %v4585_v52, %s7007_s16  ;;  %v4587_v47 = vadd.f32 %v4585_v52, %v4399_v2 }
 0x87e   :  { %v4588_v51 = vmul.f32 0.5, %v4587_v47 }
 0x880   :  { %6908 = vtanh.f32 %v4588_v51 }
 0x882   :  { %v4714_v34 = vpop.f32.mrf.mxu0 }
 0x884   :  { %v4741_v14 = vpop.f32.mrf.mxu1 }
 0x886   :  { %v4684_v18 = vpop.f32.mrf.mxu3  ;;  %v6909_v20 = vpop.eup %6908 }
 0x887   :  { %v4590_v25 = vmul.f32 0.5, %v6909_v20 }
 0x889   :  { %v4591_v37 = vadd.f32 0.5, %v4590_v25 }
 0x88e   :  { %v4643_v28 = vpop.f32.mrf.mxu2  ;;  %v4799_v22 = vpop.f32.mrf.mxu3 }
 0x88f   :  { %v4644_v9 = vadd.f32 %v8019_v10, %v4643_v28 }
 0x891   :  { %v4685_v33 = vadd.f32 %v4684_v18, %v4644_v9 }
 0x893   :  { %v4715_v53 = vadd.f32 %v4714_v34, %v4685_v33  ;;  %v4603_v34 = vsub.f32 1.0, %v4591_v37 }
 0x895   :  { %v4742_v62 = vadd.f32 %v4741_v14, %v4715_v53  ;;  %v4609_v14 = vmul.f32 %v4591_v37, %v8169_v38 }
 0x896   :  { %v4774_v36 = vpop.f32.mrf.mxu2 }
 0x897   :  { %v4775_v60 = vadd.f32 %v4774_v36, %v4742_v62 }
 0x899   :  { %v4800_v43 = vadd.f32 %v4799_v22, %v4775_v60 }
 0x89b   :  { %4808 = vrot.lane.b32.xlu1 %v4800_v43, %s7007_s16  ;;  %v4802_v7 = vadd.f32 %v4800_v43, %v4611_v19 }
 0x89d   :  { %v4803_v58 = vmul.f32 0.5, %v4802_v7 }
 0x89f   :  { %6910 = vtanh.f32 %v4803_v58 }
 0x8a5   :  { %v6911_v61 = vpop.eup %6910 }
 0x8a6   :  { %v4805_v49 = vmul.f32 0.5, %v6911_v61 }
 0x8a8   :  { %v4806_v29 = vadd.f32 0.5, %v4805_v49 }
 0x8aa   :  { %v4818_v60 = vsub.f32 1.0, %v4806_v29  ;;  %v4824_v43 = vmul.f32 %v4806_v29, %v8174_v21 }
 0x8ee   :  { %v4594_v54 = vpop.permute.xlu0 %4593 }
 0x8ef   :  { %v4596_v10 = vmul.f32 %v4594_v54, %v4591_v37 }
 0x8f1   :  { %4598 = vrot.lane.b32.xlu2 %v4596_v10, %s7007_s16 }
 0x90d   :  { %v4809_v11 = vpop.permute.xlu1 %4808 }
 0x90e   :  { %v4811_v31 = vmul.f32 %v4809_v11, %v4806_v29 }
 0x910   :  { %4813 = vrot.lane.b32.xlu0 %v4811_v31, %s7007_s16 }
 0x94b   :  { %v4599_v30 = vpop.permute.xlu2 %4598 }
 0x94c   :  { %v4601_v52 = vadd.f32 %v4599_v30, %v4399_v2  ;;  %v8305_v30 = vld [vmem:[%s8630_s4] ss:$0 sm:$0xff] }
 0x94e   :  { %6912 = vtanh.f32 %v4601_v52 }
 0x954   :  { %v6913_v18 = vpop.eup %6912 }
 0x955   :  { %4605 = vrot.lane.b32.xlu1 %v6913_v18, %s7008_s17 }
 0x982   :  { %v4814_v28 = vpop.permute.xlu0 %4813 }
 0x983   :  { %v4816_v9 = vadd.f32 %v4814_v28, %v4611_v19 }
 0x985   :  { %6914 = vtanh.f32 %v4816_v9 }
 0x98b   :  { %v6915_v33 = vpop.eup %6914 }
 0x98c   :  { %4820 = vrot.lane.b32.xlu2 %v6915_v33, %s7008_s17 }
 0x9c7   :  { %v4606_v53 = vpop.permute.xlu1 %4605 }
 0x9c8   :  { %v4608_v62 = vmul.f32 %v4606_v53, %v4603_v34 }
 0x9ca   :  { %v8240_v36 = vadd.f32 %v4609_v14, %v4608_v62 }
 0x9cc   :  { %4827 = vrot.lane.b32.xlu0 %v8240_v36, %s7008_s17 }
 0x9e6   :  { %v4821_v22 = vpop.permute.xlu2 %4820 }
 0x9e7   :  { %v4823_v2 = vmul.f32 %v4821_v22, %v4818_v60 }
 0x9e9   :  { %v8245_v47 = vadd.f32 %v4824_v43, %v4823_v2  ;;  %v8312_v2 = vld [vmem:[%s8630_s4 + $0x1] ss:$0 sm:$0xff] }
 0x9eb   :  { %5048 = vrot.lane.b32.xlu1 %v8245_v47, %s7008_s17  ;;  %4833 = vst.msk [vmem:[#allocation4 + $0x10] sm:$0xf] %vm3527_vm2, %v8245_v47 }
 0xa3e   :  { %v4828_v38 = vpop.permute.xlu0 %4827 }
 0xa3f   :  { %4831 = vst.msk [vmem:[#allocation4 + $0xc] sm:$0xf] %vm3524_vm3, %v4828_v38  ;;  %v4835_v51 = vsel %vm46_vm0, %v4828_v38, 0 }
 0xa40   :  { %v4857_v20 = vand.u32 4294901760, %v4835_v51 }
 0xa42   :  { %v4858_v25 = vsub.f32 %v4835_v51, %v4857_v20  ;;  %4903 = vmatmul.f32.vlgmr.msrb.gmra.mxu1 %v4857_v20 }
 0xa43   :  { %5165 = vmatpush.msrb.mxu1 %v7794_v8 }
 0xa44   :  { %v4859_v21 = vand.u32 4294901760, %v4858_v25  ;;  %4933 = vmatmul.f32.vlgmr.msrb.gmra.mxu2 %v4858_v25 }
 0xa45   :  { %5167 = vmatpush.msrb.mxu1 %v7814_v39  ;;  %5194 = vmatpush.msrb.mxu2 %v7854_v50 }
 0xa46   :  { %v4860_v37 = vsub.f32 %v4858_v25, %v4859_v21  ;;  %4960 = vmatmul.f32.vlgmr.msrb.gmra.mxu3 %v4859_v21 }
 0xa47   :  { %5169 = vmatpush.msrb.mxu1 %v7831_v27  ;;  %5225 = vmatpush.msrb.mxu3 %v7794_v8 }
 0xa48   :  { %v4861_v54 = vand.u32 4294901760, %v4860_v37  ;;  %5198 = vmatpush.msrb.mxu2 %v7872_v1 }
 0xa49   :  { %5171 = vmatpush.msrb.mxu1 %v7845_v46  ;;  %5227 = vmatpush.msrb.mxu3 %v7814_v39 }
 0xa4a   :  { %4862 = vmatmul.f32.vlgmr.msrb.gmra.mxu0 %v4861_v54  ;;  %5018 = vmatmul.f32.vlgmr.msra.gmra.mxu1 %v4857_v20 }
 0xa4b   :  { %5136 = vmatpush.msrb.mxu0 %v7824_v63  ;;  %5229 = vmatpush.msrb.mxu3 %v7831_v27 }
 0xa4c   :  { %5202 = vmatpush.msrb.mxu2 %v7886_v24  ;;  %5316 = vmatpush.msra.mxu1 %v7849_v23 }
 0xa4d   :  { %5139 = vmatpush.msrb.mxu0 %v7843_v17  ;;  %5231 = vmatpush.msrb.mxu3 %v7845_v46 }
 0xa4e   :  { %5206 = vmatpush.msrb.mxu2 %v7897_v15  ;;  %5322 = vmatpush.msra.mxu1 %v7865_v40 }
 0xa4f   :  { %5142 = vmatpush.msrb.mxu0 %v7860_v26 }
 0xa50   :  { %5328 = vmatpush.msra.mxu1 %v7879_v12 }
 0xa51   :  { %5145 = vmatpush.msrb.mxu0 %v7875_v0 }
 0xa52   :  { %4993 = vmatmul.f32.vlgmr.msra.gmra.mxu0 %v4857_v20  ;;  %5334 = vmatpush.msra.mxu1 %v7890_v13 }
 0xa53   :  { %5283 = vmatpush.msra.mxu0 %v7748_v16 }
 0xa55   :  { %5285 = vmatpush.msra.mxu0 %v7758_v3 }
 0xa57   :  { %5287 = vmatpush.msra.mxu0 %v7770_v4 }
 0xa59   :  { %5289 = vmatpush.msra.mxu0 %v7782_v41 }
 0xa5d   :  { %v5049_v10 = vpop.permute.xlu1 %5048 }
 0xa5e   :  { %v5050_v19 = vsel %vm46_vm0, %v5049_v10, 0 }
 0xa5f   :  { %v5072_v7 = vand.u32 4294901760, %v5050_v19 }
 0xa61   :  { %v5073_v58 = vsub.f32 %v5050_v19, %v5072_v7  ;;  %5118 = vmatmul.f32.vlgmr.msra.gmra.mxu3 %v5072_v7 }
 0xa62   :  { %5383 = vmatpush.msra.mxu3 %v7748_v16 }
 0xa63   :  { %v5074_v61 = vand.u32 4294901760, %v5073_v58  ;;  %5148 = vmatmul.f32.vlgmr.msrb.gmra.mxu0 %v5073_v58 }
 0xa64   :  { %5385 = vmatpush.msra.mxu3 %v7758_v3  ;;  %5412 = vmatpush.msrb.mxu0 %v7789_v59 }
 0xa65   :  { %v5075_v49 = vsub.f32 %v5073_v58, %v5074_v61  ;;  %5175 = vmatmul.f32.vlgmr.msrb.gmra.mxu1 %v5074_v61  ;;  %v4834_v58 = vld [vmem:[#allocation2 + $0x10] sm:$0xf] }
 0xa66   :  { %5387 = vmatpush.msra.mxu3 %v7770_v4  ;;  %5443 = vmatpush.msrb.mxu1 %v7748_v16 }
 0xa67   :  { %v5076_v29 = vand.u32 4294901760, %v5075_v49  ;;  %5416 = vmatpush.msrb.mxu0 %v7804_v45 }
 0xa68   :  { %5389 = vmatpush.msra.mxu3 %v7782_v41  ;;  %5445 = vmatpush.msrb.mxu1 %v7758_v3 }
 0xa69   :  { %5077 = vmatmul.f32.vlgmr.msra.gmra.mxu2 %v5076_v29  ;;  %5233 = vmatmul.f32.vlgmr.msrb.gmra.mxu3 %v5072_v7 }
 0xa6a   :  { %5354 = vmatpush.msra.mxu2 %v7768_v55  ;;  %5447 = vmatpush.msrb.mxu1 %v7770_v4 }
 0xa6b   :  { %5420 = vmatpush.msrb.mxu0 %v7821_v48  ;;  %5531 = vmatpush.msrb.mxu3 %v7901_v35 }
 0xa6c   :  { %5357 = vmatpush.msra.mxu2 %v7780_v5  ;;  %5449 = vmatpush.msrb.mxu1 %v7782_v41 }
 0xa6d   :  { %5424 = vmatpush.msrb.mxu0 %v7838_v6  ;;  %5537 = vmatpush.msrb.mxu3 %v7911_v32 }
 0xa6e   :  { %5360 = vmatpush.msra.mxu2 %v7792_v44 }
 0xa6f   :  { %5543 = vmatpush.msrb.mxu3 %v7919_v57 }
 0xa70   :  { %5363 = vmatpush.msra.mxu2 %v7807_v56 }
 0xa71   :  { %5208 = vmatmul.f32.vlgmr.msrb.gmra.mxu2 %v5072_v7  ;;  %5549 = vmatpush.msrb.mxu3 %v7925_v42 }
 0xa72   :  { %5498 = vmatpush.msrb.mxu2 %v7794_v8 }
 0xa74   :  { %5500 = vmatpush.msrb.mxu2 %v7814_v39 }
 0xa76   :  { %5502 = vmatpush.msrb.mxu2 %v7831_v27 }
 0xa78   :  { %5504 = vmatpush.msrb.mxu2 %v7845_v46 }
 0xabf   :  { %v4904_v11 = vpop.f32.mrf.mxu1 }
 0xac7   :  { %v4863_v31 = vpop.f32.mrf.mxu0  ;;  %v4934_v28 = vpop.f32.mrf.mxu2 }
 0xac8   :  { %v4864_v52 = vadd.f32 %v8305_v30, %v4863_v31  ;;  %v5019_v62 = vpop.f32.mrf.mxu1 }
 0xac9   :  { %v4961_v33 = vpop.f32.mrf.mxu3 }
 0xaca   :  { %v4905_v18 = vadd.f32 %v4904_v11, %v4864_v52 }
 0xacc   :  { %v4935_v9 = vadd.f32 %v4934_v28, %v4905_v18  ;;  %v5046_v28 = vld [vmem:[#allocation3 + $0xc] sm:$0xf] }
 0xace   :  { %v4962_v34 = vadd.f32 %v4961_v33, %v4935_v9 }
 0xacf   :  { %v4994_v53 = vpop.f32.mrf.mxu0 }
 0xad0   :  { %v4995_v14 = vadd.f32 %v4994_v53, %v4962_v34 }
 0xad2   :  { %v5020_v60 = vadd.f32 %v5019_v62, %v4995_v14 }
 0xad4   :  { %5028 = vrot.lane.b32.xlu2 %v5020_v60, %s7007_s16  ;;  %v5022_v61 = vadd.f32 %v5020_v60, %v4834_v58 }
 0xad6   :  { %v5023_v49 = vmul.f32 0.5, %v5022_v61 }
 0xad8   :  { %6916 = vtanh.f32 %v5023_v49 }
 0xade   :  { %v6917_v29 = vpop.eup %6916 }
 0xadf   :  { %v5025_v11 = vmul.f32 0.5, %v6917_v29 }
 0xae0   :  { %v5149_v20 = vpop.f32.mrf.mxu0 }
 0xae1   :  { %v5026_v31 = vadd.f32 0.5, %v5025_v11 }
 0xae2   :  { %v5176_v21 = vpop.f32.mrf.mxu1 }
 0xae4   :  { %v5119_v22 = vpop.f32.mrf.mxu3 }
 0xaec   :  { %v5078_v43 = vpop.f32.mrf.mxu2  ;;  %v5234_v19 = vpop.f32.mrf.mxu3 }
 0xaed   :  { %v5079_v38 = vadd.f32 %v8312_v2, %v5078_v43 }
 0xaef   :  { %v5120_v51 = vadd.f32 %v5119_v22, %v5079_v38 }
 0xaf1   :  { %v5150_v25 = vadd.f32 %v5149_v20, %v5120_v51 }
 0xaf3   :  { %v5177_v37 = vadd.f32 %v5176_v21, %v5150_v25  ;;  %v5038_v21 = vsub.f32 1.0, %v5026_v31 }
 0xaf4   :  { %v5209_v54 = vpop.f32.mrf.mxu2 }
 0xaf5   :  { %v5210_v10 = vadd.f32 %v5209_v54, %v5177_v37  ;;  %v5044_v54 = vmul.f32 %v5026_v31, %v8240_v36 }
 0xaf7   :  { %v5235_v7 = vadd.f32 %v5234_v19, %v5210_v10 }
 0xaf9   :  { %5243 = vrot.lane.b32.xlu0 %v5235_v7, %s7007_s16  ;;  %v5237_v9 = vadd.f32 %v5235_v7, %v5046_v28 }
 0xafb   :  { %v5238_v33 = vmul.f32 0.5, %v5237_v9 }
 0xafd   :  { %6918 = vtanh.f32 %v5238_v33 }
 0xb03   :  { %v6919_v34 = vpop.eup %6918 }
 0xb04   :  { %v5240_v53 = vmul.f32 0.5, %v6919_v34 }
 0xb06   :  { %v5241_v14 = vadd.f32 0.5, %v5240_v53 }
 0xb08   :  { %v5253_v7 = vsub.f32 1.0, %v5241_v14  ;;  %v5259_v61 = vmul.f32 %v5241_v14, %v8245_v47 }
 0xb2e   :  { %v5029_v52 = vpop.permute.xlu2 %5028 }
 0xb2f   :  { %v5031_v18 = vmul.f32 %v5029_v52, %v5026_v31 }
 0xb31   :  { %5033 = vrot.lane.b32.xlu1 %v5031_v18, %s7007_s16 }
 0xb6b   :  { %v5244_v62 = vpop.permute.xlu0 %5243 }
 0xb6c   :  { %v5246_v22 = vmul.f32 %v5244_v62, %v5241_v14 }
 0xb6e   :  { %5248 = vrot.lane.b32.xlu2 %v5246_v22, %s7007_s16 }
 0xba3   :  { %v5034_v60 = vpop.permute.xlu1 %5033 }
 0xba4   :  { %v5036_v43 = vadd.f32 %v5034_v60, %v4834_v58 }
 0xba6   :  { %6920 = vtanh.f32 %v5036_v43 }
 0xbac   :  { %v6921_v38 = vpop.eup %6920 }
 0xbad   :  { %5040 = vrot.lane.b32.xlu0 %v6921_v38, %s7008_s17 }
 0xbc8   :  { %v5249_v51 = vpop.permute.xlu2 %5248 }
 0xbc9   :  { %v5251_v20 = vadd.f32 %v5249_v51, %v5046_v28 }
 0xbcb   :  { %6922 = vtanh.f32 %v5251_v20 }
 0xbd1   :  { %v6923_v25 = vpop.eup %6922 }
 0xbd2   :  { %5255 = vrot.lane.b32.xlu1 %v6923_v25, %s7008_s17 }
 0xc1f   :  { %v5041_v37 = vpop.permute.xlu0 %5040 }
 0xc20   :  { %v5043_v10 = vmul.f32 %v5041_v37, %v5038_v21 }
 0xc22   :  { %v8321_v19 = vadd.f32 %v5044_v54, %v5043_v10 }
 0xc24   :  { %5262 = vrot.lane.b32.xlu2 %v8321_v19, %s7008_s17 }
 0xc44   :  { %v5256_v58 = vpop.permute.xlu1 %5255 }
 0xc45   :  { %v5258_v49 = vmul.f32 %v5256_v58, %v5253_v7 }
 0xc47   :  { %v8326_v29 = vadd.f32 %v5259_v61, %v5258_v49 }
 0xc49   :  { %5266 = vst.msk [vmem:[#allocation4 + $0xc] sm:$0xf] %vm3527_vm2, %v8326_v29  ;;  %5481 = vrot.lane.b32.xlu0 %v8326_v29, %s7008_s17 }
 0xc7e   :  { %v5263_v36 = vpop.permute.xlu2 %5262 }
 0xc7f   :  { %5265 = vst.msk [vmem:[#allocation4 + $0x10] sm:$0xf] %vm3524_vm3, %v5263_v36  ;;  %v5268_v11 = vsel %vm46_vm0, %v5263_v36, 0 }
 0xc80   :  { %v5290_v31 = vand.u32 4294901760, %v5268_v11 }
 0xc82   :  { %v5291_v52 = vsub.f32 %v5268_v11, %v5290_v31  ;;  %5336 = vmatmul.f32.vlgmr.msra.gmra.mxu1 %v5290_v31 }
 0xc83   :  { %5598 = vmatpush.msra.mxu1 %v7794_v8 }
 0xc84   :  { %v5292_v47 = vand.u32 4294901760, %v5291_v52  ;;  %5366 = vmatmul.f32.vlgmr.msra.gmra.mxu2 %v5291_v52 }
 0xc85   :  { %5600 = vmatpush.msra.mxu1 %v7814_v39  ;;  %5627 = vmatpush.msra.mxu2 %v7854_v50 }
 0xc86   :  { %v5293_v18 = vsub.f32 %v5291_v52, %v5292_v47  ;;  %5393 = vmatmul.f32.vlgmr.msra.gmra.mxu3 %v5292_v47 }
 0xc87   :  { %5602 = vmatpush.msra.mxu1 %v7831_v27  ;;  %5658 = vmatpush.msra.mxu3 %v7794_v8 }
 0xc88   :  { %v5294_v28 = vand.u32 4294901760, %v5293_v18  ;;  %5631 = vmatpush.msra.mxu2 %v7872_v1 }
 0xc89   :  { %5604 = vmatpush.msra.mxu1 %v7845_v46  ;;  %5660 = vmatpush.msra.mxu3 %v7814_v39 }
 0xc8a   :  { %5295 = vmatmul.f32.vlgmr.msra.gmra.mxu0 %v5294_v28  ;;  %5451 = vmatmul.f32.vlgmr.msrb.gmra.mxu1 %v5290_v31 }
 0xc8b   :  { %5569 = vmatpush.msra.mxu0 %v7824_v63  ;;  %5662 = vmatpush.msra.mxu3 %v7831_v27 }
 0xc8c   :  { %5635 = vmatpush.msra.mxu2 %v7886_v24  ;;  %5749 = vmatpush.msrb.mxu1 %v7849_v23 }
 0xc8d   :  { %5572 = vmatpush.msra.mxu0 %v7843_v17  ;;  %5664 = vmatpush.msra.mxu3 %v7845_v46 }
 0xc8e   :  { %5639 = vmatpush.msra.mxu2 %v7897_v15  ;;  %5755 = vmatpush.msrb.mxu1 %v7865_v40 }
 0xc8f   :  { %5575 = vmatpush.msra.mxu0 %v7860_v26 }
 0xc90   :  { %5761 = vmatpush.msrb.mxu1 %v7879_v12 }
 0xc91   :  { %5578 = vmatpush.msra.mxu0 %v7875_v0 }
 0xc92   :  { %5426 = vmatmul.f32.vlgmr.msrb.gmra.mxu0 %v5290_v31  ;;  %5767 = vmatpush.msrb.mxu1 %v7890_v13 }
 0xc93   :  { %5716 = vmatpush.msrb.mxu0 %v7748_v16 }
 0xc95   :  { %5718 = vmatpush.msrb.mxu0 %v7758_v3 }
 0xc97   :  { %5720 = vmatpush.msrb.mxu0 %v7770_v4 }
 0xc99   :  { %5722 = vmatpush.msrb.mxu0 %v7782_v41 }
 0xcbb   :  { %v5482_v9 = vpop.permute.xlu0 %5481 }
 0xcbc   :  { %v5483_v33 = vsel %vm46_vm0, %v5482_v9, 0 }
 0xcbd   :  { %v5505_v34 = vand.u32 4294901760, %v5483_v33 }
 0xcbf   :  { %v5506_v53 = vsub.f32 %v5483_v33, %v5505_v34  ;;  %5551 = vmatmul.f32.vlgmr.msrb.gmra.mxu3 %v5505_v34 }
 0xcc0   :  { %5816 = vmatpush.msrb.mxu3 %v7748_v16 }
 0xcc1   :  { %v5507_v14 = vand.u32 4294901760, %v5506_v53  ;;  %5581 = vmatmul.f32.vlgmr.msra.gmra.mxu0 %v5506_v53 }
 0xcc2   :  { %5818 = vmatpush.msrb.mxu3 %v7758_v3  ;;  %5845 = vmatpush.msra.mxu0 %v7789_v59 }
 0xcc3   :  { %v5508_v62 = vsub.f32 %v5506_v53, %v5507_v14  ;;  %5608 = vmatmul.f32.vlgmr.msra.gmra.mxu1 %v5507_v14  ;;  %v5267_v53 = vld [vmem:[#allocation2 + $0x14] sm:$0xf] }
 0xcc4   :  { %5820 = vmatpush.msrb.mxu3 %v7770_v4  ;;  %5876 = vmatpush.msra.mxu1 %v7748_v16 }
 0xcc5   :  { %v5509_v22 = vand.u32 4294901760, %v5508_v62  ;;  %5849 = vmatpush.msra.mxu0 %v7804_v45 }
 0xcc6   :  { %5822 = vmatpush.msrb.mxu3 %v7782_v41  ;;  %5878 = vmatpush.msra.mxu1 %v7758_v3 }
 0xcc7   :  { %5510 = vmatmul.f32.vlgmr.msrb.gmra.mxu2 %v5509_v22  ;;  %5666 = vmatmul.f32.vlgmr.msra.gmra.mxu3 %v5505_v34 }
 0xcc8   :  { %5787 = vmatpush.msrb.mxu2 %v7768_v55  ;;  %5880 = vmatpush.msra.mxu1 %v7770_v4 }
 0xcc9   :  { %5853 = vmatpush.msra.mxu0 %v7821_v48  ;;  %5964 = vmatpush.msra.mxu3 %v7901_v35 }
 0xcca   :  { %5790 = vmatpush.msrb.mxu2 %v7780_v5  ;;  %5882 = vmatpush.msra.mxu1 %v7782_v41 }
 0xccb   :  { %5857 = vmatpush.msra.mxu0 %v7838_v6  ;;  %5970 = vmatpush.msra.mxu3 %v7911_v32 }
 0xccc   :  { %5793 = vmatpush.msrb.mxu2 %v7792_v44 }
 0xccd   :  { %5976 = vmatpush.msra.mxu3 %v7919_v57 }
 0xcce   :  { %5796 = vmatpush.msrb.mxu2 %v7807_v56 }
 0xccf   :  { %5641 = vmatmul.f32.vlgmr.msra.gmra.mxu2 %v5505_v34  ;;  %5982 = vmatpush.msra.mxu3 %v7925_v42 }
 0xcd0   :  { %5931 = vmatpush.msra.mxu2 %v7794_v8 }
 0xcd2   :  { %5933 = vmatpush.msra.mxu2 %v7814_v39 }
 0xcd4   :  { %5935 = vmatpush.msra.mxu2 %v7831_v27 }
 0xcd6   :  { %5937 = vmatpush.msra.mxu2 %v7845_v46 }
 0xcff   :  { %v5337_v60 = vpop.f32.mrf.mxu1 }
 0xd07   :  { %v5296_v43 = vpop.f32.mrf.mxu0  ;;  %v5367_v20 = vpop.f32.mrf.mxu2 }
 0xd08   :  { %v5297_v38 = vadd.f32 %v8305_v30, %v5296_v43  ;;  %v5452_v7 = vpop.f32.mrf.mxu1 }
 0xd09   :  { %v5394_v21 = vpop.f32.mrf.mxu3 }
 0xd0a   :  { %v5338_v51 = vadd.f32 %v5337_v60, %v5297_v38 }
 0xd0c   :  { %v5368_v25 = vadd.f32 %v5367_v20, %v5338_v51  ;;  %v5479_v20 = vld [vmem:[#allocation3 + $0x8] sm:$0xf] }
 0xd0e   :  { %v5395_v37 = vadd.f32 %v5394_v21, %v5368_v25 }
 0xd0f   :  { %v5427_v54 = vpop.f32.mrf.mxu0 }
 0xd10   :  { %v5428_v10 = vadd.f32 %v5427_v54, %v5395_v37 }
 0xd12   :  { %v5453_v58 = vadd.f32 %v5452_v7, %v5428_v10 }
 0xd14   :  { %5461 = vrot.lane.b32.xlu1 %v5453_v58, %s7007_s16  ;;  %v5455_v14 = vadd.f32 %v5453_v58, %v5267_v53 }
 0xd16   :  { %v5456_v62 = vmul.f32 0.5, %v5455_v14 }
 0xd18   :  { %6924 = vtanh.f32 %v5456_v62 }
 0xd1e   :  { %v6925_v22 = vpop.eup %6924 }
 0xd1f   :  { %v5458_v60 = vmul.f32 0.5, %v6925_v22 }
 0xd21   :  { %v5459_v43 = vadd.f32 0.5, %v5458_v60 }
 0xd3e   :  { %v5582_v31 = vpop.f32.mrf.mxu0 }
 0xd40   :  { %v5609_v47 = vpop.f32.mrf.mxu1 }
 0xd42   :  { %v5552_v61 = vpop.f32.mrf.mxu3 }
 0xd4a   :  { %v5511_v49 = vpop.f32.mrf.mxu2  ;;  %v5667_v33 = vpop.f32.mrf.mxu3 }
 0xd4b   :  { %v5512_v36 = vadd.f32 %v8312_v2, %v5511_v49 }
 0xd4d   :  { %v5553_v11 = vadd.f32 %v5552_v61, %v5512_v36 }
 0xd4f   :  { %v5583_v52 = vadd.f32 %v5582_v31, %v5553_v11 }
 0xd51   :  { %v5610_v18 = vadd.f32 %v5609_v47, %v5583_v52  ;;  %v5471_v47 = vsub.f32 1.0, %v5459_v43 }
 0xd52   :  { %v5642_v28 = vpop.f32.mrf.mxu2 }
 0xd53   :  { %v5643_v9 = vadd.f32 %v5642_v28, %v5610_v18  ;;  %v5477_v28 = vmul.f32 %v5459_v43, %v8321_v19 }
 0xd55   :  { %v5668_v34 = vadd.f32 %v5667_v33, %v5643_v9 }
 0xd57   :  { %5676 = vrot.lane.b32.xlu2 %v5668_v34, %s7007_s16  ;;  %v5670_v25 = vadd.f32 %v5668_v34, %v5479_v20 }
 0xd59   :  { %v5671_v21 = vmul.f32 0.5, %v5670_v25 }
 0xd5b   :  { %6926 = vtanh.f32 %v5671_v21 }
 0xd61   :  { %v6927_v37 = vpop.eup %6926 }
 0xd62   :  { %v5673_v54 = vmul.f32 0.5, %v6927_v37 }
 0xd64   :  { %v5674_v10 = vadd.f32 0.5, %v5673_v54 }
 0xd66   :  { %v5686_v34 = vsub.f32 1.0, %v5674_v10  ;;  %v5692_v14 = vmul.f32 %v5674_v10, %v8326_v29 }
 0xd86   :  { %v5462_v38 = vpop.permute.xlu1 %5461 }
 0xd87   :  { %v5464_v51 = vmul.f32 %v5462_v38, %v5459_v43 }
 0xd89   :  { %5466 = vrot.lane.b32.xlu0 %v5464_v51, %s7007_s16 }
 0xdb1   :  { %v5677_v7 = vpop.permute.xlu2 %5676 }
 0xdb2   :  { %v5679_v61 = vmul.f32 %v5677_v7, %v5674_v10 }
 0xdb4   :  { %5681 = vrot.lane.b32.xlu1 %v5679_v61, %s7007_s16 }
 0xdfb   :  { %v5467_v58 = vpop.permute.xlu0 %5466 }
 0xdfc   :  { %v5469_v49 = vadd.f32 %v5467_v58, %v5267_v53 }
 0xdfe   :  { %6928 = vtanh.f32 %v5469_v49 }
 0xe04   :  { %v6929_v36 = vpop.eup %6928 }
 0xe05   :  { %5473 = vrot.lane.b32.xlu2 %v6929_v36, %s7008_s17 }
 0xe26   :  { %v5682_v11 = vpop.permute.xlu1 %5681 }
 0xe27   :  { %v5684_v31 = vadd.f32 %v5682_v11, %v5479_v20 }
 0xe29   :  { %6930 = vtanh.f32 %v5684_v31  ;;  %v5700_v31 = vld [vmem:[#allocation2 + $0x18] sm:$0xf] }
 0xe2f   :  { %v6931_v52 = vpop.eup %6930 }
 0xe30   :  { %5688 = vrot.lane.b32.xlu0 %v6931_v52, %s7008_s17 }
 0xe5f   :  { %v5474_v18 = vpop.permute.xlu2 %5473 }
 0xe60   :  { %v5476_v9 = vmul.f32 %v5474_v18, %v5471_v47 }
 0xe62   :  { %v8392_v33 = vadd.f32 %v5477_v28, %v5476_v9 }
 0xe64   :  { %5695 = vrot.lane.b32.xlu1 %v8392_v33, %s7008_s17 }
 0xea2   :  { %v5689_v53 = vpop.permute.xlu0 %5688 }
 0xea3   :  { %v5691_v62 = vmul.f32 %v5689_v53, %v5686_v34 }
 0xea5   :  { %v8397_v22 = vadd.f32 %v5692_v14, %v5691_v62  ;;  %v5912_v14 = vld [vmem:[#allocation3 + $0x4] sm:$0xf] }
 0xea7   :  { %5699 = vst.msk [vmem:[#allocation4 + $0x8] sm:$0xf] %vm3527_vm2, %v8397_v22  ;;  %5914 = vrot.lane.b32.xlu2 %v8397_v22, %s7008_s17 }
 0xed6   :  { %v5696_v19 = vpop.permute.xlu1 %5695 }
 0xed7   :  { %5698 = vst.msk [vmem:[#allocation4 + $0x14] sm:$0xf] %vm3524_vm3, %v5696_v19  ;;  %v5701_v60 = vsel %vm46_vm0, %v5696_v19, 0 }
 0xed8   :  { %v5723_v43 = vand.u32 4294901760, %v5701_v60 }
 0xeda   :  { %v5724_v38 = vsub.f32 %v5701_v60, %v5723_v43  ;;  %5769 = vmatmul.f32.vlgmr.msrb.gmra.mxu1 %v5723_v43 }
 0xedb   :  { %6031 = vmatpush.msrb.mxu1 %v7794_v8 }
 0xedc   :  { %v5725_v29 = vand.u32 4294901760, %v5724_v38  ;;  %5799 = vmatmul.f32.vlgmr.msrb.gmra.mxu2 %v5724_v38 }
 0xedd   :  { %6033 = vmatpush.msrb.mxu1 %v7814_v39  ;;  %6060 = vmatpush.msrb.mxu2 %v7854_v50 }
 0xede   :  { %v5726_v51 = vsub.f32 %v5724_v38, %v5725_v29  ;;  %5826 = vmatmul.f32.vlgmr.msrb.gmra.mxu3 %v5725_v29 }
 0xedf   :  { %6035 = vmatpush.msrb.mxu1 %v7831_v27  ;;  %6091 = vmatpush.msrb.mxu3 %v7794_v8 }
 0xee0   :  { %v5727_v20 = vand.u32 4294901760, %v5726_v51  ;;  %6064 = vmatpush.msrb.mxu2 %v7872_v1 }
 0xee1   :  { %6037 = vmatpush.msrb.mxu1 %v7845_v46  ;;  %6093 = vmatpush.msrb.mxu3 %v7814_v39 }
 0xee2   :  { %5728 = vmatmul.f32.vlgmr.msrb.gmra.mxu0 %v5727_v20  ;;  %5884 = vmatmul.f32.vlgmr.msra.gmra.mxu1 %v5723_v43 }
 0xee3   :  { %6002 = vmatpush.msrb.mxu0 %v7824_v63  ;;  %6095 = vmatpush.msrb.mxu3 %v7831_v27 }
 0xee4   :  { %6068 = vmatpush.msrb.mxu2 %v7886_v24  ;;  %6182 = vmatpush.msra.mxu1 %v7849_v23 }
 0xee5   :  { %6005 = vmatpush.msrb.mxu0 %v7843_v17  ;;  %6097 = vmatpush.msrb.mxu3 %v7845_v46 }
 0xee6   :  { %6072 = vmatpush.msrb.mxu2 %v7897_v15  ;;  %6188 = vmatpush.msra.mxu1 %v7865_v40 }
 0xee7   :  { %6008 = vmatpush.msrb.mxu0 %v7860_v26 }
 0xee8   :  { %6194 = vmatpush.msra.mxu1 %v7879_v12 }
 0xee9   :  { %6011 = vmatpush.msrb.mxu0 %v7875_v0 }
 0xeea   :  { %5859 = vmatmul.f32.vlgmr.msra.gmra.mxu0 %v5723_v43  ;;  %6200 = vmatpush.msra.mxu1 %v7890_v13 }
 0xeeb   :  { %6149 = vmatpush.msra.mxu0 %v7748_v16 }
 0xeed   :  { %6151 = vmatpush.msra.mxu0 %v7758_v3 }
 0xeef   :  { %6153 = vmatpush.msra.mxu0 %v7770_v4 }
 0xef1   :  { %6155 = vmatpush.msra.mxu0 %v7782_v41 }
 0xf01   :  { %v5915_v23 = vpop.permute.xlu2 %5914 }
 0xf02   :  { %v5916_v40 = vsel %vm46_vm0, %v5915_v23, 0 }
 0xf03   :  { %v5938_v25 = vand.u32 4294901760, %v5916_v40 }
 0xf05   :  { %v5939_v21 = vsub.f32 %v5916_v40, %v5938_v25  ;;  %5984 = vmatmul.f32.vlgmr.msra.gmra.mxu3 %v5938_v25 }
 0xf06   :  { %6249 = vmatpush.msra.mxu3 %v7748_v16 }
 0xf07   :  { %v5940_v12 = vand.u32 4294901760, %v5939_v21  ;;  %6014 = vmatmul.f32.vlgmr.msrb.gmra.mxu0 %v5939_v21 }
 0xf08   :  { %6251 = vmatpush.msra.mxu3 %v7758_v3  ;;  %6278 = vmatpush.msrb.mxu0 %v7789_v59 }
 0xf09   :  { %v5941_v13 = vsub.f32 %v5939_v21, %v5940_v12  ;;  %6041 = vmatmul.f32.vlgmr.msrb.gmra.mxu1 %v5940_v12 }
 0xf0a   :  { %6253 = vmatpush.msra.mxu3 %v7770_v4  ;;  %6309 = vmatpush.msrb.mxu1 %v7748_v16 }
 0xf0b   :  { %v5942_v37 = vand.u32 4294901760, %v5941_v13  ;;  %6282 = vmatpush.msrb.mxu0 %v7804_v45 }
 0xf0c   :  { %6255 = vmatpush.msra.mxu3 %v7782_v41  ;;  %6311 = vmatpush.msrb.mxu1 %v7758_v3 }
 0xf0d   :  { %5943 = vmatmul.f32.vlgmr.msra.gmra.mxu2 %v5942_v37  ;;  %6099 = vmatmul.f32.vlgmr.msrb.gmra.mxu3 %v5938_v25 }
 0xf0e   :  { %6220 = vmatpush.msra.mxu2 %v7768_v55  ;;  %6313 = vmatpush.msrb.mxu1 %v7770_v4 }
 0xf0f   :  { %6286 = vmatpush.msrb.mxu0 %v7821_v48  ;;  %6397 = vmatpush.msrb.mxu3 %v7901_v35 }
 0xf10   :  { %6223 = vmatpush.msra.mxu2 %v7780_v5  ;;  %6315 = vmatpush.msrb.mxu1 %v7782_v41 }
 0xf11   :  { %6290 = vmatpush.msrb.mxu0 %v7838_v6  ;;  %6403 = vmatpush.msrb.mxu3 %v7911_v32 }
 0xf12   :  { %6226 = vmatpush.msra.mxu2 %v7792_v44 }
 0xf13   :  { %6409 = vmatpush.msrb.mxu3 %v7919_v57 }
 0xf14   :  { %6229 = vmatpush.msra.mxu2 %v7807_v56 }
 0xf15   :  { %6074 = vmatmul.f32.vlgmr.msrb.gmra.mxu2 %v5938_v25  ;;  %6415 = vmatpush.msrb.mxu3 %v7925_v42 }
 0xf16   :  { %6364 = vmatpush.msrb.mxu2 %v7794_v8 }
 0xf18   :  { %6366 = vmatpush.msrb.mxu2 %v7814_v39 }
 0xf1a   :  { %6368 = vmatpush.msrb.mxu2 %v7831_v27 }
 0xf1c   :  { %6370 = vmatpush.msrb.mxu2 %v7845_v46 }
 0xf57   :  { %v5770_v16 = vpop.f32.mrf.mxu1 }
 0xf5f   :  { %v5729_v3 = vpop.f32.mrf.mxu0  ;;  %v5800_v5 = vpop.f32.mrf.mxu2 }
 0xf60   :  { %v5730_v55 = vadd.f32 %v8305_v30, %v5729_v3  ;;  %v5885_v48 = vpop.f32.mrf.mxu1 }
 0xf61   :  { %v5827_v59 = vpop.f32.mrf.mxu3 }
 0xf62   :  { %v5771_v4 = vadd.f32 %v5770_v16, %v5730_v55 }
 0xf64   :  { %v5801_v41 = vadd.f32 %v5800_v5, %v5771_v4 }
 0xf66   :  { %v5828_v44 = vadd.f32 %v5827_v59, %v5801_v41 }
 0xf67   :  { %v5860_v45 = vpop.f32.mrf.mxu0 }
 0xf68   :  { %v5861_v56 = vadd.f32 %v5860_v45, %v5828_v44 }
 0xf6a   :  { %v5886_v6 = vadd.f32 %v5885_v48, %v5861_v56 }
 0xf6c   :  { %5894 = vrot.lane.b32.xlu0 %v5886_v6, %s7007_s16  ;;  %v5888_v52 = vadd.f32 %v5886_v6, %v5700_v31 }
 0xf6e   :  { %v5889_v47 = vmul.f32 0.5, %v5888_v52 }
 0xf70   :  { %6932 = vtanh.f32 %v5889_v47 }
 0xf76   :  { %v6933_v18 = vpop.eup %6932 }
 0xf77   :  { %v5891_v28 = vmul.f32 0.5, %v6933_v18 }
 0xf79   :  { %v5892_v9 = vadd.f32 0.5, %v5891_v28 }
 0xf7b   :  { %v5904_v13 = vsub.f32 1.0, %v5892_v9  ;;  %v5910_v16 = vmul.f32 %v5892_v9, %v8392_v33 }
 0xf84   :  { %v6015_v54 = vpop.f32.mrf.mxu0 }
 0xf86   :  { %v6042_v7 = vpop.f32.mrf.mxu1 }
 0xf88   :  { %v5985_v35 = vpop.f32.mrf.mxu3 }
 0xf90   :  { %v5944_v32 = vpop.f32.mrf.mxu2  ;;  %v6100_v36 = vpop.f32.mrf.mxu3 }
 0xf91   :  { %v5945_v57 = vadd.f32 %v8312_v2, %v5944_v32 }
 0xf93   :  { %v5986_v42 = vadd.f32 %v5985_v35, %v5945_v57 }
 0xf95   :  { %v6016_v10 = vadd.f32 %v6015_v54, %v5986_v42 }
 0xf97   :  { %v6043_v61 = vadd.f32 %v6042_v7, %v6016_v10 }
 0xf98   :  { %v6075_v58 = vpop.f32.mrf.mxu2 }
 0xf99   :  { %v6076_v49 = vadd.f32 %v6075_v58, %v6043_v61 }
 0xf9b   :  { %v6101_v11 = vadd.f32 %v6100_v36, %v6076_v49 }
 0xf9d   :  { %6109 = vrot.lane.b32.xlu1 %v6101_v11, %s7007_s16  ;;  %v6103_v62 = vadd.f32 %v6101_v11, %v5912_v14 }
 0xf9f   :  { %v6104_v19 = vmul.f32 0.5, %v6103_v62 }
 0xfa1   :  { %6934 = vtanh.f32 %v6104_v19 }
 0xfa7   :  { %v6935_v60 = vpop.eup %6934 }
 0xfa8   :  { %v6106_v43 = vmul.f32 0.5, %v6935_v60 }
 0xfaa   :  { %v6107_v38 = vadd.f32 0.5, %v6106_v43 }
 0xfac   :  { %v6119_v4 = vsub.f32 1.0, %v6107_v38  ;;  %v6125_v41 = vmul.f32 %v6107_v38, %v8397_v22 }
 0xfde   :  { %v5895_v34 = vpop.permute.xlu0 %5894 }
 0xfdf   :  { %v5897_v53 = vmul.f32 %v5895_v34, %v5892_v9 }
 0xfe1   :  { %5899 = vrot.lane.b32.xlu2 %v5897_v53, %s7007_s16  ;;  %v6133_v53 = vld [vmem:[#allocation2 + $0x1c] sm:$0xf] }
0x100f   :  { %v6110_v29 = vpop.permute.xlu1 %6109 }
0x1010   :  { %v6112_v51 = vmul.f32 %v6110_v29, %v6107_v38  ;;  %v6345_v29 = vld [vmem:[#allocation3] sm:$0xf] }
0x1012   :  { %6114 = vrot.lane.b32.xlu0 %v6112_v51, %s7007_s16 }
0x103b   :  { %v5900_v20 = vpop.permute.xlu2 %5899 }
0x103c   :  { %v5902_v23 = vadd.f32 %v5900_v20, %v5700_v31 }
0x103e   :  { %6936 = vtanh.f32 %v5902_v23 }
0x1044   :  { %v6937_v40 = vpop.eup %6936 }
0x1045   :  { %5906 = vrot.lane.b32.xlu1 %v6937_v40, %s7008_s17 }
0x1084   :  { %v6115_v25 = vpop.permute.xlu0 %6114 }
0x1085   :  { %v6117_v21 = vadd.f32 %v6115_v25, %v5912_v14 }
0x1087   :  { %6938 = vtanh.f32 %v6117_v21 }
0x108d   :  { %v6939_v12 = vpop.eup %6938 }
0x108e   :  { %6121 = vrot.lane.b32.xlu2 %v6939_v12, %s7008_s17 }
0x10b7   :  { %v5907_v37 = vpop.permute.xlu1 %5906 }
0x10b8   :  { %v5909_v3 = vmul.f32 %v5907_v37, %v5904_v13 }
0x10ba   :  { %v8463_v55 = vadd.f32 %v5910_v16, %v5909_v3 }
0x10bc   :  { %6128 = vrot.lane.b32.xlu0 %v8463_v55, %s7008_s17 }
0x10e8   :  { %v6122_v5 = vpop.permute.xlu2 %6121 }
0x10e9   :  { %v6124_v59 = vmul.f32 %v6122_v5, %v6119_v4 }
0x10eb   :  { %v8468_v44 = vadd.f32 %v6125_v41, %v6124_v59 }
0x10ed   :  { %6132 = vst.msk [vmem:[#allocation4 + $0x4] sm:$0xf] %vm3527_vm2, %v8468_v44  ;;  %6347 = vrot.lane.b32.xlu1 %v8468_v44, %s7008_s17 }
0x112e   :  { %v6129_v33 = vpop.permute.xlu0 %6128 }
0x112f   :  { %6131 = vst.msk [vmem:[#allocation4 + $0x18] sm:$0xf] %vm3524_vm3, %v6129_v33  ;;  %v6134_v45 = vsel %vm46_vm0, %v6129_v33, 0 }
0x1130   :  { %v6156_v56 = vand.u32 4294901760, %v6134_v45 }
0x1132   :  { %v6157_v48 = vsub.f32 %v6134_v45, %v6156_v56  ;;  %6202 = vmatmul.f32.vlgmr.msra.gmra.mxu1 %v6156_v56 }
0x1133   :  { %6464 = vmatpush.msra.mxu1 %v7794_v8 }
0x1134   :  { %v6158_v22 = vand.u32 4294901760, %v6157_v48  ;;  %6232 = vmatmul.f32.vlgmr.msra.gmra.mxu2 %v6157_v48 }
0x1135   :  { %6466 = vmatpush.msra.mxu1 %v7814_v39  ;;  %6493 = vmatpush.msra.mxu2 %v7854_v50 }
0x1136   :  { %v6159_v6 = vsub.f32 %v6157_v48, %v6158_v22  ;;  %6259 = vmatmul.f32.vlgmr.msra.gmra.mxu3 %v6158_v22  ;;  %v6574_v48 = vld [vmem:[%s8631_s5 + $0x38] sm:$0xff]  ;;  %v6573_v22 = vld [vmem:[%s8631_s5 + $0x30] sm:$0xff] }
0x1137   :  { %6468 = vmatpush.msra.mxu1 %v7831_v27  ;;  %6524 = vmatpush.msra.mxu3 %v7794_v8 }
0x1138   :  { %v6160_v35 = vand.u32 4294901760, %v6159_v6  ;;  %6497 = vmatpush.msra.mxu2 %v7872_v1  ;;  %v6572_v6 = vld [vmem:[%s8631_s5 + $0x28] sm:$0xff] }
0x1139   :  { %6470 = vmatpush.msra.mxu1 %v7845_v46  ;;  %6526 = vmatpush.msra.mxu3 %v7814_v39 }
0x113a   :  { %6161 = vmatmul.f32.vlgmr.msra.gmra.mxu0 %v6160_v35  ;;  %6317 = vmatmul.f32.vlgmr.msrb.gmra.mxu1 %v6156_v56  ;;  %v8515_v35 = vand.u32 4294901760, %v6574_v48 }
0x113b   :  { %6435 = vmatpush.msra.mxu0 %v7824_v63  ;;  %6528 = vmatpush.msra.mxu3 %v7831_v27 }
0x113c   :  { %6501 = vmatpush.msra.mxu2 %v7886_v24 }
0x113d   :  { %6438 = vmatpush.msra.mxu0 %v7843_v17  ;;  %6530 = vmatpush.msra.mxu3 %v7845_v46 }
0x113e   :  { %6505 = vmatpush.msra.mxu2 %v7897_v15 }
0x113f   :  { %6441 = vmatpush.msra.mxu0 %v7860_v26 }
0x1141   :  { %6444 = vmatpush.msra.mxu0 %v7875_v0 }
0x1142   :  { %6292 = vmatmul.f32.vlgmr.msrb.gmra.mxu0 %v6156_v56 }
0x1143   :  { %6592 = vmatpush.msrb.mxu0 %v8515_v35 }
0x115f   :  { %v6348_v8 = vpop.permute.xlu1 %6347 }
0x1160   :  { %v6349_v39 = vsel %vm46_vm0, %v6348_v8, 0  ;;  %v8517_v8 = vand.u32 4294901760, %v6573_v22 }
0x1161   :  { %v6371_v50 = vand.u32 4294901760, %v6349_v39 }
0x1162   :  { %6594 = vmatpush.msrb.mxu0 %v8517_v8 }
0x1163   :  { %v6372_v63 = vsub.f32 %v6349_v39, %v6371_v50  ;;  %6417 = vmatmul.f32.vlgmr.msrb.gmra.mxu3 %v6371_v50  ;;  %v6571_v39 = vld [vmem:[%s8631_s5 + $0x20] sm:$0xff] }
0x1164   :  { %6724 = vmatpush.msrb.mxu3 %v8515_v35 }
0x1165   :  { %v6373_v27 = vand.u32 4294901760, %v6372_v63  ;;  %6447 = vmatmul.f32.vlgmr.msra.gmra.mxu0 %v6372_v63 }
0x1166   :  { %6726 = vmatpush.msrb.mxu3 %v8517_v8 }
0x1167   :  { %v6374_v1 = vsub.f32 %v6372_v63, %v6373_v27  ;;  %6474 = vmatmul.f32.vlgmr.msra.gmra.mxu1 %v6373_v27  ;;  %v6569_v63 = vld [vmem:[%s8631_s5 + $0x10] sm:$0xff]  ;;  %v8530_v27 = vand.u32 4294901760, %v6571_v39 }
0x1169   :  { %v6375_v17 = vand.u32 4294901760, %v6374_v1 }
0x116b   :  { %6376 = vmatmul.f32.vlgmr.msrb.gmra.mxu2 %v6375_v17  ;;  %6532 = vmatmul.f32.vlgmr.msra.gmra.mxu3 %v6371_v50  ;;  %v8534_v17 = vand.u32 4294901760, %v6569_v63 }
0x1173   :  { %6507 = vmatmul.f32.vlgmr.msra.gmra.mxu2 %v6371_v50  ;;  %v6570_v50 = vld [vmem:[%s8631_s5 + $0x18] sm:$0xff] }
0x1174   :  { %v8532_v1 = vand.u32 4294901760, %v6570_v50 }
0x11af   :  { %v6203_v46 = vpop.f32.mrf.mxu1 }
0x11b7   :  { %v6162_v24 = vpop.f32.mrf.mxu0  ;;  %v6233_v15 = vpop.f32.mrf.mxu2 }
0x11b8   :  { %v6163_v26 = vadd.f32 %v8305_v30, %v6162_v24  ;;  %v6318_v7 = vpop.f32.mrf.mxu1  ;;  %v6567_v24 = vld [vmem:[%s8631_s5] sm:$0xff] }
0x11b9   :  { %v6260_v57 = vpop.f32.mrf.mxu3 }
0x11ba   :  { %v6204_v0 = vadd.f32 %v6203_v46, %v6163_v26  ;;  %v6568_v46 = vld [vmem:[%s8631_s5 + $0x8] sm:$0xff]  ;;  %v6625_v26 = vsub.f32 %v6574_v48, %v8515_v35  ;;  %s7009_s5 = smov [#allocation4]  }
0x11bb   :  { %s6826_s12 = sshll.u32 %s7009_s5, 4  ;;  %s6827_s12 = int_to_ptr.vmem [resolvable:$true] %s6826_s12 }
0x11bc   :  { %v6234_v32 = vadd.f32 %v6233_v15, %v6204_v0  ;;  %v8544_v0 = vsub.f32 %v6573_v22, %v8517_v8  ;;  %6687 = vmatpush.msrb.mxu2 %v6625_v26 }
0x11be   :  { %v6261_v42 = vadd.f32 %v6260_v57, %v6234_v32  ;;  %v8551_v32 = vand.u32 4294901760, %v6568_v46  ;;  %v8554_v57 = vsub.f32 %v6571_v39, %v8530_v27  ;;  %6690 = vmatpush.msrb.mxu2 %v8544_v0 }
0x11bf   :  { %v6293_v54 = vpop.f32.mrf.mxu0 }
0x11c0   :  { %v6294_v10 = vadd.f32 %v6293_v54, %v6261_v42  ;;  %v8557_v42 = vsub.f32 %v6570_v50, %v8532_v1  ;;  %v8560_v54 = vsub.f32 %v6569_v63, %v8534_v17 }
0x11c2   :  { %v6319_v61 = vadd.f32 %v6318_v7, %v6294_v10  ;;  %v6626_v10 = vand.u32 4294901760, %v6625_v26  ;;  %v6632_v7 = vand.u32 4294901760, %v8544_v0 }
0x11c4   :  { %6327 = vrot.lane.b32.xlu2 %v6319_v61, %s7007_s16  ;;  %v6321_v14 = vadd.f32 %v6319_v61, %v6133_v53 }
0x11c6   :  { %v6322_v62 = vmul.f32 0.5, %v6321_v14 }
0x11c8   :  { %6940 = vtanh.f32 %v6322_v62 }
0x11ce   :  { %v6941_v19 = vpop.eup %6940 }
0x11cf   :  { %v6324_v60 = vmul.f32 0.5, %v6941_v19 }
0x11d1   :  { %v6325_v43 = vadd.f32 0.5, %v6324_v60 }
0x11d3   :  { %v6337_v41 = vsub.f32 1.0, %v6325_v43  ;;  %v6343_v33 = vmul.f32 %v6325_v43, %v8463_v55  ;;  %v8519_v55 = vand.u32 4294901760, %v6572_v6 }
0x11d5   :  { %v8547_v15 = vsub.f32 %v6572_v6, %v8519_v55  ;;  %6596 = vmatpush.msrb.mxu0 %v8519_v55  ;;  %6728 = vmatpush.msrb.mxu3 %v8519_v55 }
0x11d7   :  { %v6638_v61 = vand.u32 4294901760, %v8547_v15  ;;  %6693 = vmatpush.msrb.mxu2 %v8547_v15  ;;  %6598 = vmatpush.msrb.mxu0 %v8530_v27 }
0x11d8   :  { %6730 = vmatpush.msrb.mxu3 %v8530_v27 }
0x11d9   :  { %6696 = vmatpush.msrb.mxu2 %v8554_v57  ;;  %6600 = vmatpush.msrb.mxu0 %v8532_v1 }
0x11da   :  { %6732 = vmatpush.msrb.mxu3 %v8532_v1 }
0x11db   :  { %6699 = vmatpush.msrb.mxu2 %v8557_v42  ;;  %6602 = vmatpush.msrb.mxu0 %v8534_v17 }
0x11dc   :  { %6734 = vmatpush.msrb.mxu3 %v8534_v17 }
0x11dd   :  { %6702 = vmatpush.msrb.mxu2 %v8560_v54  ;;  %6604 = vmatpush.msrb.mxu0 %v8551_v32 }
0x11de   :  { %6736 = vmatpush.msrb.mxu3 %v8551_v32 }
0x11e2   :  { %v6448_v31 = vpop.f32.mrf.mxu0 }
0x11e4   :  { %v6475_v47 = vpop.f32.mrf.mxu1 }
0x11e6   :  { %v6418_v58 = vpop.f32.mrf.mxu3 }
0x11ee   :  { %v6377_v49 = vpop.f32.mrf.mxu2  ;;  %v6533_v9 = vpop.f32.mrf.mxu3 }
0x11ef   :  { %v6378_v36 = vadd.f32 %v8312_v2, %v6377_v49  ;;  %v6644_v49 = vand.u32 4294901760, %v8554_v57 }
0x11f1   :  { %v6419_v11 = vadd.f32 %v6418_v58, %v6378_v36  ;;  %v8565_v58 = vand.u32 4294901760, %v6567_v24  ;;  %v8569_v36 = vsub.f32 %v6568_v46, %v8551_v32 }
0x11f3   :  { %v6449_v52 = vadd.f32 %v6448_v31, %v6419_v11  ;;  %v6627_v11 = vsub.f32 %v6625_v26, %v6626_v10  ;;  %v6633_v31 = vsub.f32 %v8544_v0, %v6632_v7  ;;  %v6662_v62 = vand.u32 4294901760, %v8569_v36  ;;  %6705 = vmatpush.msrb.mxu2 %v8569_v36  ;;  %6606 = vmatpush.msrb.mxu0 %v8565_v58 }
0x11f4   :  { %6738 = vmatpush.msrb.mxu3 %v8565_v58 }
0x11f5   :  { %v6476_v30 = vadd.f32 %v6475_v47, %v6449_v52  ;;  %v6639_v52 = vsub.f32 %v8547_v15, %v6638_v61  ;;  %v6650_v47 = vand.u32 4294901760, %v8557_v42  ;;  %6757 = vmatpush.msra.mxu0 %v6626_v10 }
0x11f6   :  { %v6508_v18 = vpop.f32.mrf.mxu2 }
0x11f7   :  { %v6509_v28 = vadd.f32 %v6508_v18, %v6476_v30  ;;  %v6656_v30 = vand.u32 4294901760, %v8560_v54  ;;  %v6628_v18 = vand.u32 4294901760, %v6627_v11  ;;  %v6651_v14 = vsub.f32 %v8557_v42, %v6650_v47  ;;  %6761 = vmatpush.msra.mxu0 %v6632_v7 }
0x11f9   :  { %v6534_v34 = vadd.f32 %v6533_v9, %v6509_v28  ;;  %v6634_v28 = vand.u32 4294901760, %v6633_v31  ;;  %v6645_v9 = vsub.f32 %v8554_v57, %v6644_v49  ;;  %6629 = vmatpush.msrb.mxu1 %v6628_v18  ;;  %v6657_v60 = vsub.f32 %v8560_v54, %v6656_v30  ;;  %6765 = vmatpush.msra.mxu0 %v6638_v61 }
0x11fb   :  { %6542 = vrot.lane.b32.xlu0 %v6534_v34, %s7007_s16  ;;  %v6536_v51 = vadd.f32 %v6534_v34, %v6345_v29  ;;  %v6667_v34 = vsub.f32 %v6567_v24, %v8565_v58  ;;  %6635 = vmatpush.msrb.mxu1 %v6634_v28  ;;  %v6646_v19 = vand.u32 4294901760, %v6645_v9 }
0x11fc   :  { %6769 = vmatpush.msra.mxu0 %v6644_v49 }
0x11fd   :  { %v6537_v20 = vmul.f32 0.5, %v6536_v51  ;;  %6708 = vmatpush.msrb.mxu2 %v6667_v34 }
0x11fe   :  { %6773 = vmatpush.msra.mxu0 %v6650_v47 }
0x11ff   :  { %6942 = vtanh.f32 %v6537_v20 }
0x1200   :  { %6777 = vmatpush.msra.mxu0 %v6656_v30 }
0x1202   :  { %6781 = vmatpush.msra.mxu0 %v6662_v62 }
0x1205   :  { %v6943_v23 = vpop.eup %6942 }
0x1206   :  { %v6539_v40 = vmul.f32 0.5, %v6943_v23 }
0x1208   :  { %v8498_v25 = vadd.f32 0.5, %v6539_v40 }
0x120a   :  { %v6552_v40 = vsub.f32 1.0, %v8498_v25 }
0x121e   :  { %v6328_v38 = vpop.permute.xlu2 %6327 }
0x121f   :  { %v6330_v2 = vmul.f32 %v6328_v38, %v6325_v43  ;;  %v6668_v43 = vand.u32 4294901760, %v6667_v34  ;;  %v6652_v38 = vand.u32 4294901760, %v6651_v14 }
0x1221   :  { %6332 = vrot.lane.b32.xlu1 %v6330_v2, %s7007_s16  ;;  %v6663_v2 = vsub.f32 %v8569_v36, %v6662_v62  ;;  %v6669_v51 = vsub.f32 %v6667_v34, %v6668_v43  ;;  %6785 = vmatpush.msra.mxu0 %v6668_v43 }
0x1223   :  { %v6664_v20 = vand.u32 4294901760, %v6663_v2  ;;  %v6670_v23 = vand.u32 4294901760, %v6669_v51 }
0x126d   :  { %v6543_v21 = vpop.permute.xlu0 %6542 }
0x126e   :  { %v6545_v12 = vmul.f32 %v6543_v21, %v8498_v25 }
0x1270   :  { %6547 = vrot.lane.b32.xlu2 %v6545_v12, %s7007_s16  ;;  %v6558_v12 = vmul.f32 %v8498_v25, %v8468_v44 }
0x1293   :  { %v6333_v13 = vpop.permute.xlu1 %6332 }
0x1294   :  { %v6335_v37 = vadd.f32 %v6333_v13, %v6133_v53  ;;  %v6640_v53 = vand.u32 4294901760, %v6639_v52 }
0x1296   :  { %6944 = vtanh.f32 %v6335_v37  ;;  %6641 = vmatpush.msrb.mxu1 %v6640_v53 }
0x1298   :  { %6647 = vmatpush.msrb.mxu1 %v6646_v19 }
0x129a   :  { %6653 = vmatpush.msrb.mxu1 %v6652_v38 }
0x129c   :  { %v6945_v16 = vpop.eup %6944 }
0x129d   :  { %6339 = vrot.lane.b32.xlu0 %v6945_v16, %s7008_s17 }
0x12ca   :  { %v6548_v3 = vpop.permute.xlu2 %6547 }
0x12cb   :  { %v6550_v4 = vadd.f32 %v6548_v3, %v6345_v29  ;;  %v6658_v29 = vand.u32 4294901760, %v6657_v60 }
0x12cd   :  { %6946 = vtanh.f32 %v6550_v4  ;;  %6659 = vmatpush.msrb.mxu1 %v6658_v29 }
0x12cf   :  { %6665 = vmatpush.msrb.mxu1 %v6664_v20 }
0x12d1   :  { %6671 = vmatpush.msrb.mxu1 %v6670_v23 }
0x12d3   :  { %v6947_v5 = vpop.eup %6946  ;;  %6800 = vmatpush.msra.mxu1 %v8515_v35 }
0x12d4   :  { %6554 = vrot.lane.b32.xlu1 %v6947_v5, %s7008_s17 }
0x12d5   :  { %6802 = vmatpush.msra.mxu1 %v8517_v8 }
0x12d7   :  { %6804 = vmatpush.msra.mxu1 %v8519_v55 }
0x12d9   :  { %6806 = vmatpush.msra.mxu1 %v8530_v27 }
0x12db   :  { %6808 = vmatpush.msra.mxu1 %v8532_v1 }
0x12dd   :  { %6810 = vmatpush.msra.mxu1 %v8534_v17 }
0x12df   :  { %6812 = vmatpush.msra.mxu1 %v8551_v32 }
0x12e1   :  { %6814 = vmatpush.msra.mxu1 %v8565_v58 }
0x130f   :  { %v6340_v59 = vpop.permute.xlu0 %6339 }
0x1310   :  { %v6342_v45 = vmul.f32 %v6340_v59, %v6337_v41 }
0x1312   :  { %v6344_v56 = vadd.f32 %v6343_v33, %v6342_v45  ;;  %v6883_v33 = vld [vmem:[%s8632_s6] ss:$0 sm:$0xff] }
0x1314   :  { %6561 = vrot.lane.b32.xlu2 %v6344_v56, %s7008_s17 }
0x1346   :  { %v6555_v21 = vpop.permute.xlu1 %6554 }
0x1347   :  { %v6557_v13 = vmul.f32 %v6555_v21, %v6552_v40 }
0x1349   :  { %v6559_v37 = vadd.f32 %v6558_v12, %v6557_v13 }
0x134b   :  { %6565 = vst.msk [vmem:[#allocation4] sm:$0xf] %vm3527_vm2, %v6559_v37 }
0x136e   :  { %v6562_v44 = vpop.permute.xlu2 %6561 }
0x136f   :  { %6564 = vst.msk [vmem:[#allocation4 + $0x1c] sm:$0xf] %vm3524_vm3, %v6562_v44  ;;  %v6566_v25 = vsel %vm46_vm0, %v6562_v44, %v6559_v37 }
0x1370   :  { %v6581_v16 = vsel %vm6579_vm4, %v6566_v25, 0  ;;  %6834 = dma.vmem_to_hbm [thread:$0]  %s6827_s12, 512, %s6829_s2, [#allocation5], %s7007_s16, %s7007_s16, %s7010_s15  }
0x1371   :  { %v6607_v3 = vand.u32 4294901760, %v6581_v16 }
0x1373   :  { %v6608_v4 = vsub.f32 %v6581_v16, %v6607_v3  ;;  %6673 = vmatmul.f32.vlgmr.msrb.gmra.mxu1 %v6607_v3 }
0x1375   :  { %v6609_v5 = vand.u32 4294901760, %v6608_v4  ;;  %6711 = vmatmul.f32.vlgmr.msrb.gmra.mxu2 %v6608_v4 }
0x1377   :  { %v6610_v41 = vsub.f32 %v6608_v4, %v6609_v5  ;;  %6742 = vmatmul.f32.vlgmr.msrb.gmra.mxu3 %v6609_v5 }
0x1379   :  { %v6611_v59 = vand.u32 4294901760, %v6610_v41 }
0x137b   :  { %6612 = vmatmul.f32.vlgmr.msrb.gmra.mxu0 %v6611_v59  ;;  %6816 = vmatmul.f32.vlgmr.msra.gmra.mxu1 %v6607_v3 }
0x1383   :  { %6787 = vmatmul.f32.vlgmr.msra.gmra.mxu0 %v6607_v3 }
0x13f0   :  { %v6674_v45 = vpop.f32.mrf.mxu1 }
0x13f8   :  { %v6613_v56 = vpop.f32.mrf.mxu0  ;;  %v6712_v6 = vpop.f32.mrf.mxu2 }
0x13f9   :  { %v6614_v48 = vadd.f32 %v6883_v33, %v6613_v56  ;;  %v6817_v63 = vpop.f32.mrf.mxu1 }
0x13fa   :  { %v6743_v8 = vpop.f32.mrf.mxu3 }
0x13fb   :  { %v6675_v22 = vadd.f32 %v6674_v45, %v6614_v48 }
0x13fd   :  { %v6713_v35 = vadd.f32 %v6712_v6, %v6675_v22 }
0x13ff   :  { %v6744_v55 = vadd.f32 %v6743_v8, %v6713_v35 }
0x1400   :  { %v6788_v39 = vpop.f32.mrf.mxu0 }
0x1401   :  { %v6789_v50 = vadd.f32 %v6788_v39, %v6744_v55 }
0x1403   :  { %v6818_v27 = vadd.f32 %v6817_v63, %v6789_v50 }
0x1405   :  { %6948 = vtanh.f32 %v6818_v27 }
0x140b   :  { %v6949_v1 = vpop.eup %6948 }
0x140c   :  { %6821 = vst.msk [vmem:[#allocation6] sm:$0xf] %vm3524_vm3, %v6949_v1 }
0x140d   :  { %6845 = dma.vmem_to_hbm [thread:$0]  %s6841_s18, 64, %s6843_s20, [#allocation7]  }
0x140e   :  { %7002 = dma.done.wait [#allocation5], 512  }
0x140f   :  { %7003 = vsyncadd [#allocation5], 4294966784 }
0x1410   :  { %7004 = dma.done.wait [#allocation7], 64  }
0x1411   :  { %7005 = vsyncadd [#allocation7], 4294967232 }
0x1412   :  { %6854 = vsyncpa [#allocation5], 1 }
0x1413   :  { %6855 = vsyncpa [#allocation7], 1 }

</bundles_post_ra>
